<compile_context>
chip_gen: v5e
topology: v5e:2x2
jax: 0.10.0
libtpu: 0.0.40
codegen_flags: <defaults>
</compile_context>

<pallas_src>
import functools

import jax
import jax.numpy as jnp
from jax.experimental import pallas as pl
from jax.experimental.pallas import tpu as pltpu

LN_EPS = 1e-6   # nn.LayerNorm(eps=1e-6) per the module
BN_EPS = 1e-5   # nn.BatchNorm1d default eps


def _round_up(x, m):
    return ((x + m - 1) // m) * m


def _vmem_limit_bytes():
    # v7x: 64 MiB VMEM per TensorCore vs 128 MiB on v5e/v6e -> keep the scoped
    # limit generation-aware so a tile choice validated on v6e can't OOM on v7x.
    try:
        cap = int(pltpu.get_tpu_info().vmem_capacity_bytes)
        return int(min(64 * 1024 * 1024, max(32 * 1024 * 1024, cap // 2)))
    except Exception:
        return 32 * 1024 * 1024


def _layernorm(x, g, b):
    # One-pass LayerNorm over the lane (channel) axis: sum(x) and sum(x*x) are
    # independent cross-lane reduces (shorter XLU critical path than mean->var).
    mu = jnp.mean(x, axis=-1, keepdims=True)
    ms = jnp.mean(x * x, axis=-1, keepdims=True)
    var = jnp.maximum(ms - mu * mu, 0.0)
    return (x - mu) * jax.lax.rsqrt(var + LN_EPS) * g + b


def _point_mlp_stage1(x, w1, b1, g1, be1):
    # h1 = relu(LN(x @ w1 + b1))  -> bf16 "pointfeat"
    h1 = jnp.dot(x, w1, preferred_element_type=jnp.float32) + b1
    return jnp.maximum(_layernorm(h1, g1, be1), 0.0).astype(jnp.bfloat16)


# --------------------------------------------------------------------------
# Phase 1: PointNetfeat point MLP (64/128/512) + running global max over N.
# Grid: (B, n_split, num_t_inner)  -- split axis gives v7x's 2 TCs work at B=1.
# --------------------------------------------------------------------------
def _feat_kernel(n_actual, n_tile, num_t_inner, need_mask,
                 x_ref,
                 w1_ref, b1_ref, g1_ref, be1_ref,
                 w2_ref, b2_ref, g2_ref, be2_ref,
                 w3_ref, b3_ref, g3_ref, be3_ref,
                 gx_ref):
    s = pl.program_id(1)
    ti = pl.program_id(2)

    x = x_ref[0]                                               # (nt, Cin) bf16

    h1 = _point_mlp_stage1(x, w1_ref[...], b1_ref[...], g1_ref[...], be1_ref[...])

    h2 = jnp.dot(h1, w2_ref[...], preferred_element_type=jnp.float32) + b2_ref[...]
    h2 = jnp.maximum(_layernorm(h2, g2_ref[...], be2_ref[...]), 0.0).astype(jnp.bfloat16)

    h3 = jnp.dot(h2, w3_ref[...], preferred_element_type=jnp.float32) + b3_ref[...]
    h3 = _layernorm(h3, g3_ref[...], be3_ref[...])             # (nt, m2) f32

    if need_mask:
        # Mask padded rows so they never win the global max.
        row = (s * num_t_inner + ti) * n_tile + jax.lax.broadcasted_iota(
            jnp.int32, (n_tile, 1), 0)
        h3 = jnp.where(row < n_actual, h3, -jnp.inf)

    @pl.when(ti == 0)
    def _():
        gx_ref[...] = jnp.full(gx_ref.shape, -jnp.inf, dtype=gx_ref.dtype)

    gx_ref[0] = jnp.maximum(gx_ref[0], jnp.max(h3, axis=0, keepdims=True))


# --------------------------------------------------------------------------
# Phase 2: dense segmentation head.  pointfeat (h1) is recomputed from the x
# tile (cheap) instead of being streamed through HBM; BatchNorm is folded into
# the weights; the concat is split into h1 @ c1[512:] + (gx @ c1[:512] + cb1').
# --------------------------------------------------------------------------
def _head_kernel(x_ref, gb_ref,
                 w1_ref, b1_ref, g1_ref, be1_ref,
                 c1p_ref, c2_ref, cb2_ref, c3_ref, cb3_ref, c4_ref, cb4_ref,
                 out_ref):
    x = x_ref[0]                                               # (nt, Cin) bf16

    h1 = _point_mlp_stage1(x, w1_ref[...], b1_ref[...], g1_ref[...], be1_ref[...])

    d1 = jnp.dot(h1, c1p_ref[...], preferred_element_type=jnp.float32) + gb_ref[0]
    d1 = jnp.maximum(d1, 0.0).astype(jnp.bfloat16)             # (nt, 512)

    d2 = jnp.dot(d1, c2_ref[...], preferred_element_type=jnp.float32) + cb2_ref[...]
    d2 = jnp.maximum(d2, 0.0).astype(jnp.bfloat16)             # (nt, 256)

    d3 = jnp.dot(d2, c3_ref[...], preferred_element_type=jnp.float32) + cb3_ref[...]
    d3 = jnp.maximum(d3, 0.0).astype(jnp.bfloat16)             # (nt, 128)

    out_ref[0] = (jnp.dot(d3, c4_ref[...], preferred_element_type=jnp.float32)
                  + cb4_ref[...]).astype(out_ref.dtype)        # (nt, kpad) bf16


# --------------------------------------------------------------------------
# Parameters (torch-equivalent, weights stored transposed as (Cin, Cout)).
# --------------------------------------------------------------------------
def init_params(key, in_ch=3, mlp_specs=(64, 128, 512), k=2):
    m0, m1, m2 = mlp_specs
    shapes = [
        # PointNetfeat: (W^T, bias, ln_gamma, ln_beta) x 3
        (in_ch, m0), (1, m0), (1, m0), (1, m0),
        (m0, m1), (1, m1), (1, m1), (1, m1),
        (m1, m2), (1, m2), (1, m2), (1, m2),
        # Head: (W^T, bias, bn_gamma, bn_beta) x 3 + final (W^T, bias)
        (m0 + m2, 512), (1, 512), (1, 512), (1, 512),
        (512, 256), (1, 256), (1, 256), (1, 256),
        (256, 128), (1, 128), (1, 128), (1, 128),
        (128, k), (1, k),
    ]
    keys = jax.random.split(key, len(shapes))
    return [0.1 * jax.random.normal(kk, s, dtype=jnp.float32)
            for kk, s in zip(keys, shapes)]


def prepare_params(params, *, mlp_specs=(64, 128, 512), k=2):
    """Fold eval-mode BN into head weights, split c1, pad c4, cast weights to bf16."""
    (w1, b1, g1, be1, w2, b2, g2, be2, w3, b3, g3, be3,
     c1, cb1, bg1, bb1, c2, cb2, bg2, bb2, c3, cb3, bg3, bb3, c4, cb4) = params
    m0, m1, m2 = mlp_specs

    # BatchNorm1d eval mode with running_mean=0 / running_var=1 -> pure affine.
    # TODO(synk): for trained checkpoints fold the real running_mean/var here.
    bn_s = 1.0 / jnp.sqrt(jnp.float32(1.0 + BN_EPS))
    s1, s2, s3 = bg1 * bn_s, bg2 * bn_s, bg3 * bn_s
    c1f, cb1f = c1 * s1, cb1 * s1 + bb1
    c2f, cb2f = c2 * s2, cb2 * s2 + bb2
    c3f, cb3f = c3 * s3, cb3 * s3 + bb3

    # cat = [global_x (m2), pointfeat (m0)] -> split c1 rows accordingly.
    c1g, c1p = c1f[:m2, :], c1f[m2:, :]

    # Pad the final classifier to a lane-dense (multiple-of-128) width.
    kpad = max(128, _round_up(k, 128))
    c4p = jnp.zeros((c4.shape[0], kpad), jnp.float32).at[:, :k].set(c4)
    cb4p = jnp.zeros((1, kpad), jnp.float32).at[:, :k].set(cb4)

    bf = lambda a: a.astype(jnp.bfloat16)
    mlp_params = [bf(w1), b1, g1, be1,
                  bf(w2), b2, g2, be2,
                  bf(w3), b3, g3, be3]
    head_params = [bf(c1p), bf(c2f), cb2f, bf(c3f), cb3f, bf(c4p), cb4p]
    gb_params = (bf(c1g), cb1f)
    return mlp_params, head_params, gb_params, kpad


# --------------------------------------------------------------------------
# Wrapper.
# --------------------------------------------------------------------------
def pointnet_dense_cls(x_ncw, params, *, mlp_specs=(64, 128, 512), k=2,
                       n_tile=1024, return_padded_logits=False):
    """x_ncw: (B, in_ch, N) float32, PyTorch NCW layout."""
    B, in_ch, N = x_ncw.shape
    m0, m1, m2 = mlp_specs

    mlp_params, head_params, gb_params, kpad = prepare_params(
        params, mlp_specs=mlp_specs, k=k)

    # Tile size / split selection.  nt is always a multiple of 8.
    nt = min(n_tile, _round_up(N, 8))
    # Give phase 1 a second "parallel" axis for small batches so both v7x
    # TensorCores get work (partial maxes are combined below).
    n_split = 2 if (B == 1 and N > nt) else 1
    n_pad = _round_up(N, nt * n_split)
    num_t = n_pad // nt
    num_t_inner = num_t // n_split

    # NCW -> point-major (B, N, Cin) straight in bf16 (kernels feed bf16 into the
    # MXU anyway); pad N up to a tile multiple.
    x = jnp.transpose(x_ncw, (0, 2, 1)).astype(jnp.bfloat16)
    if n_pad != N:
        x = jnp.pad(x, ((0, 0), (0, n_pad - N), (0, 0)))

    vmem_limit = _vmem_limit_bytes()

    # ---- phase 1: point MLP + global max (partial over splits) ---------------
    const_feat = lambda p: pl.BlockSpec(p.shape, lambda b, s, t: (0, 0))
    feat_in_specs = (
        [pl.BlockSpec((1, nt, in_ch),
                      lambda b, s, t: (b, s * num_t_inner + t, 0))]
        + [const_feat(p) for p in mlp_params])
    gx_partial = pl.pallas_call(
        functools.partial(_feat_kernel, N, nt, num_t_inner, n_pad != N),
        out_shape=jax.ShapeDtypeStruct((B, n_split, m2), jnp.float32),
        grid_spec=pltpu.PrefetchScalarGridSpec(
            num_scalar_prefetch=0,
            grid=(B, n_split, num_t_inner),
            in_specs=feat_in_specs,
            out_specs=pl.BlockSpec((1, 1, m2), lambda b, s, t: (b, s, 0))),
        compiler_params=pltpu.CompilerParams(
            dimension_semantics=("parallel", "parallel", "arbitrary"),
            vmem_limit_bytes=vmem_limit),
    )(x, *mlp_params)

    # Combine partial maxes and compute the per-batch head bias row
    # gbias = global_x @ c1[:m2] + cb1'   (tiny: B x m2 x 512 in plain JAX).
    gx = jnp.max(gx_partial, axis=1)                           # (B, m2) f32
    c1g, cb1f = gb_params
    gbias = (jnp.dot(gx.astype(jnp.bfloat16), c1g,
                     preferred_element_type=jnp.float32) + cb1f)[:, None, :]

    # ---- phase 2: dense segmentation head (bf16 lane-dense output) -----------
    const_head = lambda p: pl.BlockSpec(p.shape, lambda b, t: (0, 0))
    head_in_specs = (
        [pl.BlockSpec((1, nt, in_ch), lambda b, t: (b, t, 0)),
         pl.BlockSpec((1, 1, 512), lambda b, t: (b, 0, 0))]
        + [const_head(p) for p in (mlp_params[:4] + head_params)])
    dense_pad = pl.pallas_call(
        _head_kernel,
        out_shape=jax.ShapeDtypeStruct((B, n_pad, kpad), jnp.bfloat16),
        grid_spec=pltpu.PrefetchScalarGridSpec(
            num_scalar_prefetch=0,
            grid=(B, num_t),
            in_specs=head_in_specs,
            out_specs=pl.BlockSpec((1, nt, kpad), lambda b, t: (b, t, 0))),
        compiler_params=pltpu.CompilerParams(
            dimension_semantics=("parallel", "parallel"),
            vmem_limit_bytes=vmem_limit),
    )(x, gbias, *mlp_params[:4], *head_params)

    if return_padded_logits:
        # Skip the extra HBM pass of slicing; caller slices [:, :N, :k] lazily.
        return gx, dense_pad, None, None

    dense = dense_pad[:, :N, :k].astype(jnp.float32)           # (B, N, k) logits
    # trans / trans_feat are None for xyz_transform=False, feature_transform=False.
    return gx, dense, None, None


# --------------------------------------------------------------------------
# Pure-JAX reference of the same forward pass (bf16 matmuls, f32 elsewhere —
# mirrors the kernel's precision; remove the bf16 casts for full-f32 torch math).
# --------------------------------------------------------------------------
def reference_forward(x_ncw, params, *, mlp_specs=(64, 128, 512), k=2):
    (w1, b1, g1, be1, w2, b2, g2, be2, w3, b3, g3, be3,
     c1, cb1, bg1, bb1, c2, cb2, bg2, bb2, c3, cb3, bg3, bb3, c4, cb4) = params
    x = jnp.transpose(x_ncw, (0, 2, 1)).astype(jnp.float32)    # (B, N, Cin)

    bf = lambda a: a.astype(jnp.bfloat16)

    def mm(a, w):
        return jnp.dot(bf(a), bf(w), preferred_element_type=jnp.float32)

    def ln(h, g, b):
        mu = jnp.mean(h, axis=-1, keepdims=True)
        var = jnp.mean(jnp.square(h - mu), axis=-1, keepdims=True)
        return (h - mu) * jax.lax.rsqrt(var + LN_EPS) * g + b

    def bn(h, g, b):
        return h * (g / jnp.sqrt(1.0 + BN_EPS)) + b

    h1 = jax.nn.relu(ln(mm(x, w1) + b1, g1, be1))              # pointfeat
    h2 = jax.nn.relu(ln(mm(h1, w2) + b2, g2, be2))
    h3 = ln(mm(h2, w3) + b3, g3, be3)
    gx = jnp.max(h3, axis=1)                                   # (B, m2)

    B, N = x.shape[0], x.shape[1]
    cat = jnp.concatenate(
        [jnp.broadcast_to(gx[:, None, :], (B, N, gx.shape[-1])), h1], axis=-1)
    d1 = jax.nn.relu(bn(mm(cat, c1) + cb1, bg1, bb1))
    d2 = jax.nn.relu(bn(mm(d1, c2) + cb2, bg2, bb2))
    d3 = jax.nn.relu(bn(mm(d2, c3) + cb3, bg3, bb3))
    d4 = mm(d3, c4) + cb4
    return gx, d4


if __name__ == "__main__":
    MLP = (64, 128, 512)

    def run_case(key, B, in_ch, n_pts, k):
        kx, kp = jax.random.split(key)
        x = jax.random.normal(kx, (B, in_ch, n_pts), dtype=jnp.float32)  # NCW
        params = init_params(kp, in_ch=in_ch, mlp_specs=MLP, k=k)

        fwd = jax.jit(functools.partial(pointnet_dense_cls, mlp_specs=MLP, k=k))
        gx, dense, trans, trans_feat = jax.block_until_ready(fwd(x, params))

        gx_ref, dense_ref = reference_forward(x, params, mlp_specs=MLP, k=k)
        assert gx.shape == (B, MLP[2]) and dense.shape == (B, n_pts, k)
        assert trans is None and trans_feat is None
        assert jnp.allclose(gx, gx_ref, atol=2e-2, rtol=2e-2), \
            float(jnp.max(jnp.abs(gx - gx_ref)))
        assert jnp.allclose(dense, dense_ref, atol=3e-2, rtol=3e-2), \
            float(jnp.max(jnp.abs(dense - dense_ref)))

    key = jax.random.PRNGKey(0)
    k1, k2 = jax.random.split(key)
    # Small case: single tile, no padding.
    run_case(k1, B=2, in_ch=3, n_pts=64, k=2)
    # Larger case: exercises N padding/masking and the B=1 split-reduction path.
    run_case(k2, B=1, in_ch=3, n_pts=2500, k=2)

    print("KERNEL_OK")
</pallas_src>

<mosaic_0001>
module attributes {stable_mosaic.version = 11 : i64} {
  func.func @_feat_kernel(%arg0: i32, %arg1: i32, %arg2: i32, %arg3: memref<1x64x3xbf16, #tpu.memory_space<vmem>>, %arg4: memref<3x64xbf16, #tpu.memory_space<vmem>>, %arg5: memref<1x64xf32, #tpu.memory_space<vmem>>, %arg6: memref<1x64xf32, #tpu.memory_space<vmem>>, %arg7: memref<1x64xf32, #tpu.memory_space<vmem>>, %arg8: memref<64x128xbf16, #tpu.memory_space<vmem>>, %arg9: memref<1x128xf32, #tpu.memory_space<vmem>>, %arg10: memref<1x128xf32, #tpu.memory_space<vmem>>, %arg11: memref<1x128xf32, #tpu.memory_space<vmem>>, %arg12: memref<128x512xbf16, #tpu.memory_space<vmem>>, %arg13: memref<1x512xf32, #tpu.memory_space<vmem>>, %arg14: memref<1x512xf32, #tpu.memory_space<vmem>>, %arg15: memref<1x512xf32, #tpu.memory_space<vmem>>, %arg16: memref<1x1x512xf32, #tpu.memory_space<vmem>>) attributes {dimension_semantics = [#tpu.dimension_semantics<parallel>, #tpu.dimension_semantics<parallel>, #tpu.dimension_semantics<arbitrary>], iteration_bounds = array<i64: 2, 1, 1>, scalar_prefetch = 0 : i64, scratch_operands = 0 : i64, tpu.core_type = #tpu.core_type<tc>, window_params = [{transform_indices = @transform_0, window_bounds = array<i64: 1, 64, 3>}, {pipeline_mode = #tpu.pipeline_mode<synchronous>, transform_indices = @transform_1, window_bounds = array<i64: 3, 64>}, {pipeline_mode = #tpu.pipeline_mode<synchronous>, transform_indices = @transform_2, window_bounds = array<i64: 1, 64>}, {pipeline_mode = #tpu.pipeline_mode<synchronous>, transform_indices = @transform_3, window_bounds = array<i64: 1, 64>}, {pipeline_mode = #tpu.pipeline_mode<synchronous>, transform_indices = @transform_4, window_bounds = array<i64: 1, 64>}, {pipeline_mode = #tpu.pipeline_mode<synchronous>, transform_indices = @transform_5, window_bounds = array<i64: 64, 128>}, {pipeline_mode = #tpu.pipeline_mode<synchronous>, transform_indices = @transform_6, window_bounds = array<i64: 1, 128>}, {pipeline_mode = #tpu.pipeline_mode<synchronous>, transform_indices = @transform_7, window_bounds = array<i64: 1, 128>}, {pipeline_mode = #tpu.pipeline_mode<synchronous>, transform_indices = @transform_8, window_bounds = array<i64: 1, 128>}, {pipeline_mode = #tpu.pipeline_mode<synchronous>, transform_indices = @transform_9, window_bounds = array<i64: 128, 512>}, {pipeline_mode = #tpu.pipeline_mode<synchronous>, transform_indices = @transform_10, window_bounds = array<i64: 1, 512>}, {pipeline_mode = #tpu.pipeline_mode<synchronous>, transform_indices = @transform_11, window_bounds = array<i64: 1, 512>}, {pipeline_mode = #tpu.pipeline_mode<synchronous>, transform_indices = @transform_12, window_bounds = array<i64: 1, 512>}, {transform_indices = @transform_13, window_bounds = array<i64: 1, 1, 512>}]} {
    %c0 = arith.constant 0 : index
    %c0_0 = arith.constant 0 : index
    %c0_1 = arith.constant 0 : index
    %0 = vector.load %arg3[%c0, %c0_0, %c0_1] : memref<1x64x3xbf16, #tpu.memory_space<vmem>>, vector<1x64x3xbf16>
    %1 = vector.shape_cast %0 : vector<1x64x3xbf16> to vector<64x3xbf16>
    %c0_2 = arith.constant 0 : index
    %c0_3 = arith.constant 0 : index
    %2 = vector.load %arg4[%c0_2, %c0_3] : memref<3x64xbf16, #tpu.memory_space<vmem>>, vector<3x64xbf16>
    %c0_4 = arith.constant 0 : index
    %c0_5 = arith.constant 0 : index
    %3 = vector.load %arg5[%c0_4, %c0_5] : memref<1x64xf32, #tpu.memory_space<vmem>>, vector<1x64xf32>
    %c0_6 = arith.constant 0 : index
    %c0_7 = arith.constant 0 : index
    %4 = vector.load %arg6[%c0_6, %c0_7] : memref<1x64xf32, #tpu.memory_space<vmem>>, vector<1x64xf32>
    %c0_8 = arith.constant 0 : index
    %c0_9 = arith.constant 0 : index
    %5 = vector.load %arg7[%c0_8, %c0_9] : memref<1x64xf32, #tpu.memory_space<vmem>>, vector<1x64xf32>
    %cst = arith.constant dense<0.000000e+00> : vector<64x64xf32>
    %6 = tpu.matmul %1, %2, %cst {dimension_numbers = #tpu.dot_dimension_numbers<[1], [0], [0], [1], [0, 0, 1, 1], [], []>} : vector<64x3xbf16>, vector<3x64xbf16>, vector<64x64xf32> -> vector<64x64xf32>
    %7 = vector.broadcast %3 : vector<1x64xf32> to vector<64x64xf32>
    %8 = arith.addf %6, %7 : vector<64x64xf32>
    %cst_10 = arith.constant dense<0.000000e+00> : vector<64xf32>
    %9 = vector.multi_reduction <add>, %8, %cst_10 [1] : vector<64x64xf32> to vector<64xf32>
    %10 = vector.shape_cast %9 : vector<64xf32> to vector<64x1xf32>
    %cst_11 = arith.constant 6.400000e+01 : f32
    %11 = vector.broadcast %cst_11 : f32 to vector<64x1xf32>
    %12 = arith.divf %10, %11 : vector<64x1xf32>
    %13 = arith.mulf %8, %8 : vector<64x64xf32>
    %cst_12 = arith.constant dense<0.000000e+00> : vector<64xf32>
    %14 = vector.multi_reduction <add>, %13, %cst_12 [1] : vector<64x64xf32> to vector<64xf32>
    %15 = vector.shape_cast %14 : vector<64xf32> to vector<64x1xf32>
    %cst_13 = arith.constant 6.400000e+01 : f32
    %16 = vector.broadcast %cst_13 : f32 to vector<64x1xf32>
    %17 = arith.divf %15, %16 : vector<64x1xf32>
    %18 = arith.mulf %12, %12 : vector<64x1xf32>
    %19 = arith.subf %17, %18 : vector<64x1xf32>
    %cst_14 = arith.constant 0.000000e+00 : f32
    %20 = vector.broadcast %cst_14 : f32 to vector<64x1xf32>
    %21 = arith.maximumf %19, %20 : vector<64x1xf32>
    %22 = vector.broadcast %12 : vector<64x1xf32> to vector<64x64xf32>
    %23 = arith.subf %8, %22 : vector<64x64xf32>
    %cst_15 = arith.constant 9.99999997E-7 : f32
    %24 = vector.broadcast %cst_15 : f32 to vector<64x1xf32>
    %25 = arith.addf %21, %24 : vector<64x1xf32>
    %26 = math.rsqrt %25 : vector<64x1xf32>
    %27 = vector.broadcast %26 : vector<64x1xf32> to vector<64x64xf32>
    %28 = arith.mulf %23, %27 : vector<64x64xf32>
    %29 = vector.broadcast %4 : vector<1x64xf32> to vector<64x64xf32>
    %30 = arith.mulf %28, %29 : vector<64x64xf32>
    %31 = vector.broadcast %5 : vector<1x64xf32> to vector<64x64xf32>
    %32 = arith.addf %30, %31 : vector<64x64xf32>
    %cst_16 = arith.constant 0.000000e+00 : f32
    %33 = vector.broadcast %cst_16 : f32 to vector<64x64xf32>
    %34 = arith.maximumf %32, %33 : vector<64x64xf32>
    %35 = arith.truncf %34 : vector<64x64xf32> to vector<64x64xbf16>
    %c0_17 = arith.constant 0 : index
    %c0_18 = arith.constant 0 : index
    %36 = vector.load %arg8[%c0_17, %c0_18] : memref<64x128xbf16, #tpu.memory_space<vmem>>, vector<64x128xbf16>
    %cst_19 = arith.constant dense<0.000000e+00> : vector<64x128xf32>
    %37 = tpu.matmul %35, %36, %cst_19 {dimension_numbers = #tpu.dot_dimension_numbers<[1], [0], [0], [1], [0, 0, 1, 1], [], []>} : vector<64x64xbf16>, vector<64x128xbf16>, vector<64x128xf32> -> vector<64x128xf32>
    %c0_20 = arith.constant 0 : index
    %c0_21 = arith.constant 0 : index
    %38 = vector.load %arg9[%c0_20, %c0_21] : memref<1x128xf32, #tpu.memory_space<vmem>>, vector<1x128xf32>
    %39 = vector.broadcast %38 : vector<1x128xf32> to vector<64x128xf32>
    %40 = arith.addf %37, %39 : vector<64x128xf32>
    %c0_22 = arith.constant 0 : index
    %c0_23 = arith.constant 0 : index
    %41 = vector.load %arg10[%c0_22, %c0_23] : memref<1x128xf32, #tpu.memory_space<vmem>>, vector<1x128xf32>
    %c0_24 = arith.constant 0 : index
    %c0_25 = arith.constant 0 : index
    %42 = vector.load %arg11[%c0_24, %c0_25] : memref<1x128xf32, #tpu.memory_space<vmem>>, vector<1x128xf32>
    %cst_26 = arith.constant dense<0.000000e+00> : vector<64xf32>
    %43 = vector.multi_reduction <add>, %40, %cst_26 [1] : vector<64x128xf32> to vector<64xf32>
    %44 = vector.shape_cast %43 : vector<64xf32> to vector<64x1xf32>
    %cst_27 = arith.constant 1.280000e+02 : f32
    %45 = vector.broadcast %cst_27 : f32 to vector<64x1xf32>
    %46 = arith.divf %44, %45 : vector<64x1xf32>
    %47 = arith.mulf %40, %40 : vector<64x128xf32>
    %cst_28 = arith.constant dense<0.000000e+00> : vector<64xf32>
    %48 = vector.multi_reduction <add>, %47, %cst_28 [1] : vector<64x128xf32> to vector<64xf32>
    %49 = vector.shape_cast %48 : vector<64xf32> to vector<64x1xf32>
    %cst_29 = arith.constant 1.280000e+02 : f32
    %50 = vector.broadcast %cst_29 : f32 to vector<64x1xf32>
    %51 = arith.divf %49, %50 : vector<64x1xf32>
    %52 = arith.mulf %46, %46 : vector<64x1xf32>
    %53 = arith.subf %51, %52 : vector<64x1xf32>
    %cst_30 = arith.constant 0.000000e+00 : f32
    %54 = vector.broadcast %cst_30 : f32 to vector<64x1xf32>
    %55 = arith.maximumf %53, %54 : vector<64x1xf32>
    %56 = vector.broadcast %46 : vector<64x1xf32> to vector<64x128xf32>
    %57 = arith.subf %40, %56 : vector<64x128xf32>
    %cst_31 = arith.constant 9.99999997E-7 : f32
    %58 = vector.broadcast %cst_31 : f32 to vector<64x1xf32>
    %59 = arith.addf %55, %58 : vector<64x1xf32>
    %60 = math.rsqrt %59 : vector<64x1xf32>
    %61 = vector.broadcast %60 : vector<64x1xf32> to vector<64x128xf32>
    %62 = arith.mulf %57, %61 : vector<64x128xf32>
    %63 = vector.broadcast %41 : vector<1x128xf32> to vector<64x128xf32>
    %64 = arith.mulf %62, %63 : vector<64x128xf32>
    %65 = vector.broadcast %42 : vector<1x128xf32> to vector<64x128xf32>
    %66 = arith.addf %64, %65 : vector<64x128xf32>
    %cst_32 = arith.constant 0.000000e+00 : f32
    %67 = vector.broadcast %cst_32 : f32 to vector<64x128xf32>
    %68 = arith.maximumf %66, %67 : vector<64x128xf32>
    %69 = arith.truncf %68 : vector<64x128xf32> to vector<64x128xbf16>
    %c0_33 = arith.constant 0 : index
    %c0_34 = arith.constant 0 : index
    %70 = vector.load %arg12[%c0_33, %c0_34] : memref<128x512xbf16, #tpu.memory_space<vmem>>, vector<128x512xbf16>
    %cst_35 = arith.constant dense<0.000000e+00> : vector<64x512xf32>
    %71 = tpu.matmul %69, %70, %cst_35 {dimension_numbers = #tpu.dot_dimension_numbers<[1], [0], [0], [1], [0, 0, 1, 1], [], []>} : vector<64x128xbf16>, vector<128x512xbf16>, vector<64x512xf32> -> vector<64x512xf32>
    %c0_36 = arith.constant 0 : index
    %c0_37 = arith.constant 0 : index
    %72 = vector.load %arg13[%c0_36, %c0_37] : memref<1x512xf32, #tpu.memory_space<vmem>>, vector<1x512xf32>
    %73 = vector.broadcast %72 : vector<1x512xf32> to vector<64x512xf32>
    %74 = arith.addf %71, %73 : vector<64x512xf32>
    %c0_38 = arith.constant 0 : index
    %c0_39 = arith.constant 0 : index
    %75 = vector.load %arg14[%c0_38, %c0_39] : memref<1x512xf32, #tpu.memory_space<vmem>>, vector<1x512xf32>
    %c0_40 = arith.constant 0 : index
    %c0_41 = arith.constant 0 : index
    %76 = vector.load %arg15[%c0_40, %c0_41] : memref<1x512xf32, #tpu.memory_space<vmem>>, vector<1x512xf32>
    %cst_42 = arith.constant dense<0.000000e+00> : vector<64xf32>
    %77 = vector.multi_reduction <add>, %74, %cst_42 [1] : vector<64x512xf32> to vector<64xf32>
    %78 = vector.shape_cast %77 : vector<64xf32> to vector<64x1xf32>
    %cst_43 = arith.constant 5.120000e+02 : f32
    %79 = vector.broadcast %cst_43 : f32 to vector<64x1xf32>
    %80 = arith.divf %78, %79 : vector<64x1xf32>
    %81 = arith.mulf %74, %74 : vector<64x512xf32>
    %cst_44 = arith.constant dense<0.000000e+00> : vector<64xf32>
    %82 = vector.multi_reduction <add>, %81, %cst_44 [1] : vector<64x512xf32> to vector<64xf32>
    %83 = vector.shape_cast %82 : vector<64xf32> to vector<64x1xf32>
    %cst_45 = arith.constant 5.120000e+02 : f32
    %84 = vector.broadcast %cst_45 : f32 to vector<64x1xf32>
    %85 = arith.divf %83, %84 : vector<64x1xf32>
    %86 = arith.mulf %80, %80 : vector<64x1xf32>
    %87 = arith.subf %85, %86 : vector<64x1xf32>
    %cst_46 = arith.constant 0.000000e+00 : f32
    %88 = vector.broadcast %cst_46 : f32 to vector<64x1xf32>
    %89 = arith.maximumf %87, %88 : vector<64x1xf32>
    %90 = vector.broadcast %80 : vector<64x1xf32> to vector<64x512xf32>
    %91 = arith.subf %74, %90 : vector<64x512xf32>
    %cst_47 = arith.constant 9.99999997E-7 : f32
    %92 = vector.broadcast %cst_47 : f32 to vector<64x1xf32>
    %93 = arith.addf %89, %92 : vector<64x1xf32>
    %94 = math.rsqrt %93 : vector<64x1xf32>
    %95 = vector.broadcast %94 : vector<64x1xf32> to vector<64x512xf32>
    %96 = arith.mulf %91, %95 : vector<64x512xf32>
    %97 = vector.broadcast %75 : vector<1x512xf32> to vector<64x512xf32>
    %98 = arith.mulf %96, %97 : vector<64x512xf32>
    %99 = vector.broadcast %76 : vector<1x512xf32> to vector<64x512xf32>
    %100 = arith.addf %98, %99 : vector<64x512xf32>
    %c0_i32 = arith.constant 0 : i32
    %101 = arith.cmpi eq, %arg2, %c0_i32 : i32
    %102 = arith.extui %101 : i1 to i32
    %c0_i32_48 = arith.constant 0 : i32
    %103 = arith.cmpi ne, %102, %c0_i32_48 : i32
    scf.if %103 {
      %cst_56 = arith.constant 0xFF800000 : f32
      %112 = vector.broadcast %cst_56 : f32 to vector<1x1x512xf32>
      %c0_57 = arith.constant 0 : index
      %c0_58 = arith.constant 0 : index
      %c0_59 = arith.constant 0 : index
      %113 = vector.load %arg16[%c0_57, %c0_58, %c0_59] : memref<1x1x512xf32, #tpu.memory_space<vmem>>, vector<1x1x512xf32>
      tpu.vector_store %arg16[%c0_57, %c0_58, %c0_59], %112 {strides = array<i32>} : memref<1x1x512xf32, #tpu.memory_space<vmem>>, vector<1x1x512xf32>,
    } else {
    }
    %c0_49 = arith.constant 0 : index
    %c0_50 = arith.constant 0 : index
    %c0_51 = arith.constant 0 : index
    %104 = vector.load %arg16[%c0_49, %c0_50, %c0_51] : memref<1x1x512xf32, #tpu.memory_space<vmem>>, vector<1x1x512xf32>
    %105 = vector.shape_cast %104 : vector<1x1x512xf32> to vector<1x512xf32>
    %cst_52 = arith.constant dense<0xFF800000> : vector<512xf32>
    %106 = vector.multi_reduction <maximumf>, %100, %cst_52 [0] : vector<64x512xf32> to vector<512xf32>
    %107 = vector.shape_cast %106 : vector<512xf32> to vector<1x512xf32>
    %108 = arith.maximumf %105, %107 : vector<1x512xf32>
    %c0_53 = arith.constant 0 : index
    %c0_54 = arith.constant 0 : index
    %c0_55 = arith.constant 0 : index
    %109 = vector.load %arg16[%c0_53, %c0_54, %c0_55] : memref<1x1x512xf32, #tpu.memory_space<vmem>>, vector<1x1x512xf32>
    %110 = vector.shape_cast %109 : vector<1x1x512xf32> to vector<1x512xf32>
    %111 = vector.shape_cast %108 : vector<1x512xf32> to vector<1x1x512xf32>
    tpu.vector_store %arg16[%c0_53, %c0_54, %c0_55], %111 {strides = array<i32>} : memref<1x1x512xf32, #tpu.memory_space<vmem>>, vector<1x1x512xf32>,
    return
  }
  func.func @transform_0(%arg0: i32, %arg1: i32, %arg2: i32) -> (i32, i32, i32) {
    %c1_i32 = arith.constant 1 : i32
    %0 = arith.muli %arg1, %c1_i32 : i32
    %1 = arith.addi %0, %arg2 : i32
    %c0_i32 = arith.constant 0 : i32
    %c0_i32_0 = arith.constant 0 : i32
    return %arg0, %1, %c0_i32 : i32, i32, i32
  }
  func.func @transform_1(%arg0: i32, %arg1: i32, %arg2: i32) -> (i32, i32) {
    %c0_i32 = arith.constant 0 : i32
    %c0_i32_0 = arith.constant 0 : i32
    %c0_i32_1 = arith.constant 0 : i32
    return %c0_i32, %c0_i32_0 : i32, i32
  }
  func.func @transform_2(%arg0: i32, %arg1: i32, %arg2: i32) -> (i32, i32) {
    %c0_i32 = arith.constant 0 : i32
    %c0_i32_0 = arith.constant 0 : i32
    %c0_i32_1 = arith.constant 0 : i32
    return %c0_i32, %c0_i32_0 : i32, i32
  }
  func.func @transform_3(%arg0: i32, %arg1: i32, %arg2: i32) -> (i32, i32) {
    %c0_i32 = arith.constant 0 : i32
    %c0_i32_0 = arith.constant 0 : i32
    %c0_i32_1 = arith.constant 0 : i32
    return %c0_i32, %c0_i32_0 : i32, i32
  }
  func.func @transform_4(%arg0: i32, %arg1: i32, %arg2: i32) -> (i32, i32) {
    %c0_i32 = arith.constant 0 : i32
    %c0_i32_0 = arith.constant 0 : i32
    %c0_i32_1 = arith.constant 0 : i32
    return %c0_i32, %c0_i32_0 : i32, i32
  }
  func.func @transform_5(%arg0: i32, %arg1: i32, %arg2: i32) -> (i32, i32) {
    %c0_i32 = arith.constant 0 : i32
    %c0_i32_0 = arith.constant 0 : i32
    %c0_i32_1 = arith.constant 0 : i32
    return %c0_i32, %c0_i32_0 : i32, i32
  }
  func.func @transform_6(%arg0: i32, %arg1: i32, %arg2: i32) -> (i32, i32) {
    %c0_i32 = arith.constant 0 : i32
    %c0_i32_0 = arith.constant 0 : i32
    %c0_i32_1 = arith.constant 0 : i32
    return %c0_i32, %c0_i32_0 : i32, i32
  }
  func.func @transform_7(%arg0: i32, %arg1: i32, %arg2: i32) -> (i32, i32) {
    %c0_i32 = arith.constant 0 : i32
    %c0_i32_0 = arith.constant 0 : i32
    %c0_i32_1 = arith.constant 0 : i32
    return %c0_i32, %c0_i32_0 : i32, i32
  }
  func.func @transform_8(%arg0: i32, %arg1: i32, %arg2: i32) -> (i32, i32) {
    %c0_i32 = arith.constant 0 : i32
    %c0_i32_0 = arith.constant 0 : i32
    %c0_i32_1 = arith.constant 0 : i32
    return %c0_i32, %c0_i32_0 : i32, i32
  }
  func.func @transform_9(%arg0: i32, %arg1: i32, %arg2: i32) -> (i32, i32) {
    %c0_i32 = arith.constant 0 : i32
    %c0_i32_0 = arith.constant 0 : i32
    %c0_i32_1 = arith.constant 0 : i32
    return %c0_i32, %c0_i32_0 : i32, i32
  }
  func.func @transform_10(%arg0: i32, %arg1: i32, %arg2: i32) -> (i32, i32) {
    %c0_i32 = arith.constant 0 : i32
    %c0_i32_0 = arith.constant 0 : i32
    %c0_i32_1 = arith.constant 0 : i32
    return %c0_i32, %c0_i32_0 : i32, i32
  }
  func.func @transform_11(%arg0: i32, %arg1: i32, %arg2: i32) -> (i32, i32) {
    %c0_i32 = arith.constant 0 : i32
    %c0_i32_0 = arith.constant 0 : i32
    %c0_i32_1 = arith.constant 0 : i32
    return %c0_i32, %c0_i32_0 : i32, i32
  }
  func.func @transform_12(%arg0: i32, %arg1: i32, %arg2: i32) -> (i32, i32) {
    %c0_i32 = arith.constant 0 : i32
    %c0_i32_0 = arith.constant 0 : i32
    %c0_i32_1 = arith.constant 0 : i32
    return %c0_i32, %c0_i32_0 : i32, i32
  }
  func.func @transform_13(%arg0: i32, %arg1: i32, %arg2: i32) -> (i32, i32, i32) {
    %c0_i32 = arith.constant 0 : i32
    %c0_i32_0 = arith.constant 0 : i32
    return %arg0, %arg1, %c0_i32 : i32, i32, i32
  }
}

module attributes {stable_mosaic.version = 11 : i64} {
  func.func @_head_kernel(%arg0: i32, %arg1: i32, %arg2: memref<1x64x3xbf16, #tpu.memory_space<vmem>>, %arg3: memref<1x1x512xf32, #tpu.memory_space<vmem>>, %arg4: memref<3x64xbf16, #tpu.memory_space<vmem>>, %arg5: memref<1x64xf32, #tpu.memory_space<vmem>>, %arg6: memref<1x64xf32, #tpu.memory_space<vmem>>, %arg7: memref<1x64xf32, #tpu.memory_space<vmem>>, %arg8: memref<64x512xbf16, #tpu.memory_space<vmem>>, %arg9: memref<512x256xbf16, #tpu.memory_space<vmem>>, %arg10: memref<1x256xf32, #tpu.memory_space<vmem>>, %arg11: memref<256x128xbf16, #tpu.memory_space<vmem>>, %arg12: memref<1x128xf32, #tpu.memory_space<vmem>>, %arg13: memref<128x128xbf16, #tpu.memory_space<vmem>>, %arg14: memref<1x128xf32, #tpu.memory_space<vmem>>, %arg15: memref<1x64x128xbf16, #tpu.memory_space<vmem>>) attributes {dimension_semantics = [#tpu.dimension_semantics<parallel>, #tpu.dimension_semantics<parallel>], iteration_bounds = array<i64: 2, 1>, scalar_prefetch = 0 : i64, scratch_operands = 0 : i64, tpu.core_type = #tpu.core_type<tc>, window_params = [{transform_indices = @transform_0, window_bounds = array<i64: 1, 64, 3>}, {transform_indices = @transform_1, window_bounds = array<i64: 1, 1, 512>}, {pipeline_mode = #tpu.pipeline_mode<synchronous>, transform_indices = @transform_2, window_bounds = array<i64: 3, 64>}, {pipeline_mode = #tpu.pipeline_mode<synchronous>, transform_indices = @transform_3, window_bounds = array<i64: 1, 64>}, {pipeline_mode = #tpu.pipeline_mode<synchronous>, transform_indices = @transform_4, window_bounds = array<i64: 1, 64>}, {pipeline_mode = #tpu.pipeline_mode<synchronous>, transform_indices = @transform_5, window_bounds = array<i64: 1, 64>}, {pipeline_mode = #tpu.pipeline_mode<synchronous>, transform_indices = @transform_6, window_bounds = array<i64: 64, 512>}, {pipeline_mode = #tpu.pipeline_mode<synchronous>, transform_indices = @transform_7, window_bounds = array<i64: 512, 256>}, {pipeline_mode = #tpu.pipeline_mode<synchronous>, transform_indices = @transform_8, window_bounds = array<i64: 1, 256>}, {pipeline_mode = #tpu.pipeline_mode<synchronous>, transform_indices = @transform_9, window_bounds = array<i64: 256, 128>}, {pipeline_mode = #tpu.pipeline_mode<synchronous>, transform_indices = @transform_10, window_bounds = array<i64: 1, 128>}, {pipeline_mode = #tpu.pipeline_mode<synchronous>, transform_indices = @transform_11, window_bounds = array<i64: 128, 128>}, {pipeline_mode = #tpu.pipeline_mode<synchronous>, transform_indices = @transform_12, window_bounds = array<i64: 1, 128>}, {transform_indices = @transform_13, window_bounds = array<i64: 1, 64, 128>}]} {
    %c0 = arith.constant 0 : index
    %c0_0 = arith.constant 0 : index
    %c0_1 = arith.constant 0 : index
    %0 = vector.load %arg2[%c0, %c0_0, %c0_1] : memref<1x64x3xbf16, #tpu.memory_space<vmem>>, vector<1x64x3xbf16>
    %1 = vector.shape_cast %0 : vector<1x64x3xbf16> to vector<64x3xbf16>
    %c0_2 = arith.constant 0 : index
    %c0_3 = arith.constant 0 : index
    %2 = vector.load %arg4[%c0_2, %c0_3] : memref<3x64xbf16, #tpu.memory_space<vmem>>, vector<3x64xbf16>
    %c0_4 = arith.constant 0 : index
    %c0_5 = arith.constant 0 : index
    %3 = vector.load %arg5[%c0_4, %c0_5] : memref<1x64xf32, #tpu.memory_space<vmem>>, vector<1x64xf32>
    %c0_6 = arith.constant 0 : index
    %c0_7 = arith.constant 0 : index
    %4 = vector.load %arg6[%c0_6, %c0_7] : memref<1x64xf32, #tpu.memory_space<vmem>>, vector<1x64xf32>
    %c0_8 = arith.constant 0 : index
    %c0_9 = arith.constant 0 : index
    %5 = vector.load %arg7[%c0_8, %c0_9] : memref<1x64xf32, #tpu.memory_space<vmem>>, vector<1x64xf32>
    %cst = arith.constant dense<0.000000e+00> : vector<64x64xf32>
    %6 = tpu.matmul %1, %2, %cst {dimension_numbers = #tpu.dot_dimension_numbers<[1], [0], [0], [1], [0, 0, 1, 1], [], []>} : vector<64x3xbf16>, vector<3x64xbf16>, vector<64x64xf32> -> vector<64x64xf32>
    %7 = vector.broadcast %3 : vector<1x64xf32> to vector<64x64xf32>
    %8 = arith.addf %6, %7 : vector<64x64xf32>
    %cst_10 = arith.constant dense<0.000000e+00> : vector<64xf32>
    %9 = vector.multi_reduction <add>, %8, %cst_10 [1] : vector<64x64xf32> to vector<64xf32>
    %10 = vector.shape_cast %9 : vector<64xf32> to vector<64x1xf32>
    %cst_11 = arith.constant 6.400000e+01 : f32
    %11 = vector.broadcast %cst_11 : f32 to vector<64x1xf32>
    %12 = arith.divf %10, %11 : vector<64x1xf32>
    %13 = arith.mulf %8, %8 : vector<64x64xf32>
    %cst_12 = arith.constant dense<0.000000e+00> : vector<64xf32>
    %14 = vector.multi_reduction <add>, %13, %cst_12 [1] : vector<64x64xf32> to vector<64xf32>
    %15 = vector.shape_cast %14 : vector<64xf32> to vector<64x1xf32>
    %cst_13 = arith.constant 6.400000e+01 : f32
    %16 = vector.broadcast %cst_13 : f32 to vector<64x1xf32>
    %17 = arith.divf %15, %16 : vector<64x1xf32>
    %18 = arith.mulf %12, %12 : vector<64x1xf32>
    %19 = arith.subf %17, %18 : vector<64x1xf32>
    %cst_14 = arith.constant 0.000000e+00 : f32
    %20 = vector.broadcast %cst_14 : f32 to vector<64x1xf32>
    %21 = arith.maximumf %19, %20 : vector<64x1xf32>
    %22 = vector.broadcast %12 : vector<64x1xf32> to vector<64x64xf32>
    %23 = arith.subf %8, %22 : vector<64x64xf32>
    %cst_15 = arith.constant 9.99999997E-7 : f32
    %24 = vector.broadcast %cst_15 : f32 to vector<64x1xf32>
    %25 = arith.addf %21, %24 : vector<64x1xf32>
    %26 = math.rsqrt %25 : vector<64x1xf32>
    %27 = vector.broadcast %26 : vector<64x1xf32> to vector<64x64xf32>
    %28 = arith.mulf %23, %27 : vector<64x64xf32>
    %29 = vector.broadcast %4 : vector<1x64xf32> to vector<64x64xf32>
    %30 = arith.mulf %28, %29 : vector<64x64xf32>
    %31 = vector.broadcast %5 : vector<1x64xf32> to vector<64x64xf32>
    %32 = arith.addf %30, %31 : vector<64x64xf32>
    %cst_16 = arith.constant 0.000000e+00 : f32
    %33 = vector.broadcast %cst_16 : f32 to vector<64x64xf32>
    %34 = arith.maximumf %32, %33 : vector<64x64xf32>
    %35 = arith.truncf %34 : vector<64x64xf32> to vector<64x64xbf16>
    %c0_17 = arith.constant 0 : index
    %c0_18 = arith.constant 0 : index
    %36 = vector.load %arg8[%c0_17, %c0_18] : memref<64x512xbf16, #tpu.memory_space<vmem>>, vector<64x512xbf16>
    %cst_19 = arith.constant dense<0.000000e+00> : vector<64x512xf32>
    %37 = tpu.matmul %35, %36, %cst_19 {dimension_numbers = #tpu.dot_dimension_numbers<[1], [0], [0], [1], [0, 0, 1, 1], [], []>} : vector<64x64xbf16>, vector<64x512xbf16>, vector<64x512xf32> -> vector<64x512xf32>
    %c0_20 = arith.constant 0 : index
    %c0_21 = arith.constant 0 : index
    %c0_22 = arith.constant 0 : index
    %38 = vector.load %arg3[%c0_20, %c0_21, %c0_22] : memref<1x1x512xf32, #tpu.memory_space<vmem>>, vector<1x1x512xf32>
    %39 = vector.shape_cast %38 : vector<1x1x512xf32> to vector<1x512xf32>
    %40 = vector.broadcast %39 : vector<1x512xf32> to vector<64x512xf32>
    %41 = arith.addf %37, %40 : vector<64x512xf32>
    %cst_23 = arith.constant 0.000000e+00 : f32
    %42 = vector.broadcast %cst_23 : f32 to vector<64x512xf32>
    %43 = arith.maximumf %41, %42 : vector<64x512xf32>
    %44 = arith.truncf %43 : vector<64x512xf32> to vector<64x512xbf16>
    %c0_24 = arith.constant 0 : index
    %c0_25 = arith.constant 0 : index
    %45 = vector.load %arg9[%c0_24, %c0_25] : memref<512x256xbf16, #tpu.memory_space<vmem>>, vector<512x256xbf16>
    %cst_26 = arith.constant dense<0.000000e+00> : vector<64x256xf32>
    %46 = tpu.matmul %44, %45, %cst_26 {dimension_numbers = #tpu.dot_dimension_numbers<[1], [0], [0], [1], [0, 0, 1, 1], [], []>} : vector<64x512xbf16>, vector<512x256xbf16>, vector<64x256xf32> -> vector<64x256xf32>
    %c0_27 = arith.constant 0 : index
    %c0_28 = arith.constant 0 : index
    %47 = vector.load %arg10[%c0_27, %c0_28] : memref<1x256xf32, #tpu.memory_space<vmem>>, vector<1x256xf32>
    %48 = vector.broadcast %47 : vector<1x256xf32> to vector<64x256xf32>
    %49 = arith.addf %46, %48 : vector<64x256xf32>
    %cst_29 = arith.constant 0.000000e+00 : f32
    %50 = vector.broadcast %cst_29 : f32 to vector<64x256xf32>
    %51 = arith.maximumf %49, %50 : vector<64x256xf32>
    %52 = arith.truncf %51 : vector<64x256xf32> to vector<64x256xbf16>
    %c0_30 = arith.constant 0 : index
    %c0_31 = arith.constant 0 : index
    %53 = vector.load %arg11[%c0_30, %c0_31] : memref<256x128xbf16, #tpu.memory_space<vmem>>, vector<256x128xbf16>
    %cst_32 = arith.constant dense<0.000000e+00> : vector<64x128xf32>
    %54 = tpu.matmul %52, %53, %cst_32 {dimension_numbers = #tpu.dot_dimension_numbers<[1], [0], [0], [1], [0, 0, 1, 1], [], []>} : vector<64x256xbf16>, vector<256x128xbf16>, vector<64x128xf32> -> vector<64x128xf32>
    %c0_33 = arith.constant 0 : index
    %c0_34 = arith.constant 0 : index
    %55 = vector.load %arg12[%c0_33, %c0_34] : memref<1x128xf32, #tpu.memory_space<vmem>>, vector<1x128xf32>
    %56 = vector.broadcast %55 : vector<1x128xf32> to vector<64x128xf32>
    %57 = arith.addf %54, %56 : vector<64x128xf32>
    %cst_35 = arith.constant 0.000000e+00 : f32
    %58 = vector.broadcast %cst_35 : f32 to vector<64x128xf32>
    %59 = arith.maximumf %57, %58 : vector<64x128xf32>
    %60 = arith.truncf %59 : vector<64x128xf32> to vector<64x128xbf16>
    %c0_36 = arith.constant 0 : index
    %c0_37 = arith.constant 0 : index
    %61 = vector.load %arg13[%c0_36, %c0_37] : memref<128x128xbf16, #tpu.memory_space<vmem>>, vector<128x128xbf16>
    %cst_38 = arith.constant dense<0.000000e+00> : vector<64x128xf32>
    %62 = tpu.matmul %60, %61, %cst_38 {dimension_numbers = #tpu.dot_dimension_numbers<[1], [0], [0], [1], [0, 0, 1, 1], [], []>} : vector<64x128xbf16>, vector<128x128xbf16>, vector<64x128xf32> -> vector<64x128xf32>
    %c0_39 = arith.constant 0 : index
    %c0_40 = arith.constant 0 : index
    %63 = vector.load %arg14[%c0_39, %c0_40] : memref<1x128xf32, #tpu.memory_space<vmem>>, vector<1x128xf32>
    %64 = vector.broadcast %63 : vector<1x128xf32> to vector<64x128xf32>
    %65 = arith.addf %62, %64 : vector<64x128xf32>
    %66 = arith.truncf %65 : vector<64x128xf32> to vector<64x128xbf16>
    %c0_41 = arith.constant 0 : index
    %c0_42 = arith.constant 0 : index
    %c0_43 = arith.constant 0 : index
    %67 = vector.load %arg15[%c0_41, %c0_42, %c0_43] : memref<1x64x128xbf16, #tpu.memory_space<vmem>>, vector<1x64x128xbf16>
    %68 = vector.shape_cast %67 : vector<1x64x128xbf16> to vector<64x128xbf16>
    %69 = vector.shape_cast %66 : vector<64x128xbf16> to vector<1x64x128xbf16>
    tpu.vector_store %arg15[%c0_41, %c0_42, %c0_43], %69 {strides = array<i32>} : memref<1x64x128xbf16, #tpu.memory_space<vmem>>, vector<1x64x128xbf16>,
    return
  }
  func.func @transform_0(%arg0: i32, %arg1: i32) -> (i32, i32, i32) {
    %c0_i32 = arith.constant 0 : i32
    %c0_i32_0 = arith.constant 0 : i32
    return %arg0, %arg1, %c0_i32 : i32, i32, i32
  }
  func.func @transform_1(%arg0: i32, %arg1: i32) -> (i32, i32, i32) {
    %c0_i32 = arith.constant 0 : i32
    %c0_i32_0 = arith.constant 0 : i32
    %c0_i32_1 = arith.constant 0 : i32
    return %arg0, %c0_i32, %c0_i32_0 : i32, i32, i32
  }
  func.func @transform_2(%arg0: i32, %arg1: i32) -> (i32, i32) {
    %c0_i32 = arith.constant 0 : i32
    %c0_i32_0 = arith.constant 0 : i32
    %c0_i32_1 = arith.constant 0 : i32
    return %c0_i32, %c0_i32_0 : i32, i32
  }
  func.func @transform_3(%arg0: i32, %arg1: i32) -> (i32, i32) {
    %c0_i32 = arith.constant 0 : i32
    %c0_i32_0 = arith.constant 0 : i32
    %c0_i32_1 = arith.constant 0 : i32
    return %c0_i32, %c0_i32_0 : i32, i32
  }
  func.func @transform_4(%arg0: i32, %arg1: i32) -> (i32, i32) {
    %c0_i32 = arith.constant 0 : i32
    %c0_i32_0 = arith.constant 0 : i32
    %c0_i32_1 = arith.constant 0 : i32
    return %c0_i32, %c0_i32_0 : i32, i32
  }
  func.func @transform_5(%arg0: i32, %arg1: i32) -> (i32, i32) {
    %c0_i32 = arith.constant 0 : i32
    %c0_i32_0 = arith.constant 0 : i32
    %c0_i32_1 = arith.constant 0 : i32
    return %c0_i32, %c0_i32_0 : i32, i32
  }
  func.func @transform_6(%arg0: i32, %arg1: i32) -> (i32, i32) {
    %c0_i32 = arith.constant 0 : i32
    %c0_i32_0 = arith.constant 0 : i32
    %c0_i32_1 = arith.constant 0 : i32
    return %c0_i32, %c0_i32_0 : i32, i32
  }
  func.func @transform_7(%arg0: i32, %arg1: i32) -> (i32, i32) {
    %c0_i32 = arith.constant 0 : i32
    %c0_i32_0 = arith.constant 0 : i32
    %c0_i32_1 = arith.constant 0 : i32
    return %c0_i32, %c0_i32_0 : i32, i32
  }
  func.func @transform_8(%arg0: i32, %arg1: i32) -> (i32, i32) {
    %c0_i32 = arith.constant 0 : i32
    %c0_i32_0 = arith.constant 0 : i32
    %c0_i32_1 = arith.constant 0 : i32
    return %c0_i32, %c0_i32_0 : i32, i32
  }
  func.func @transform_9(%arg0: i32, %arg1: i32) -> (i32, i32) {
    %c0_i32 = arith.constant 0 : i32
    %c0_i32_0 = arith.constant 0 : i32
    %c0_i32_1 = arith.constant 0 : i32
    return %c0_i32, %c0_i32_0 : i32, i32
  }
  func.func @transform_10(%arg0: i32, %arg1: i32) -> (i32, i32) {
    %c0_i32 = arith.constant 0 : i32
    %c0_i32_0 = arith.constant 0 : i32
    %c0_i32_1 = arith.constant 0 : i32
    return %c0_i32, %c0_i32_0 : i32, i32
  }
  func.func @transform_11(%arg0: i32, %arg1: i32) -> (i32, i32) {
    %c0_i32 = arith.constant 0 : i32
    %c0_i32_0 = arith.constant 0 : i32
    %c0_i32_1 = arith.constant 0 : i32
    return %c0_i32, %c0_i32_0 : i32, i32
  }
  func.func @transform_12(%arg0: i32, %arg1: i32) -> (i32, i32) {
    %c0_i32 = arith.constant 0 : i32
    %c0_i32_0 = arith.constant 0 : i32
    %c0_i32_1 = arith.constant 0 : i32
    return %c0_i32, %c0_i32_0 : i32, i32
  }
  func.func @transform_13(%arg0: i32, %arg1: i32) -> (i32, i32, i32) {
    %c0_i32 = arith.constant 0 : i32
    %c0_i32_0 = arith.constant 0 : i32
    return %arg0, %arg1, %c0_i32 : i32, i32, i32
  }
}

</mosaic_0001>

<bundles_post_ra>
// kernel: pointnet_dense_cls.2
= control target key start
LH: loop header
LB: loop body
LE: loop exit
PB: predicated region body
PF: predicated region fallthrough
CT: control target
= control target key end

     0   :  { %s4220_s0 = inlined_call_operand.vmem [shape: bf16[2,64,3], index: 0, kind: input, shape index: {}]   ;;  %s4221_s1 = inlined_call_operand.vmem [shape: bf16[3,64], index: 1, kind: input, shape index: {}]   ;;  %s4222_s2 = inlined_call_operand.hbm [shape: f32[1,64], index: 2, kind: input, shape index: {}]   ;;  %s4223_s3 = inlined_call_operand.hbm [shape: f32[1,64], index: 3, kind: input, shape index: {}]   ;;  %s4224_s4 = inlined_call_operand.hbm [shape: f32[1,64], index: 4, kind: input, shape index: {}]   ;;  %s4225_s5 = inlined_call_operand.vmem [shape: bf16[64,128], index: 5, kind: input, shape index: {}]   ;;  %s4226_s6 = inlined_call_operand.hbm [shape: f32[1,128], index: 6, kind: input, shape index: {}]   ;;  %s4227_s7 = inlined_call_operand.hbm [shape: f32[1,128], index: 7, kind: input, shape index: {}]   ;;  %s4228_s8 = inlined_call_operand.hbm [shape: f32[1,128], index: 8, kind: input, shape index: {}]   ;;  %s4229_s9 = inlined_call_operand.vmem [shape: bf16[128,512], index: 9, kind: input, shape index: {}]   ;;  %s4230_s10 = inlined_call_operand.hbm [shape: f32[1,512], index: 10, kind: input, shape index: {}]   ;;  %s4231_s11 = inlined_call_operand.hbm [shape: f32[1,512], index: 11, kind: input, shape index: {}]   ;;  %s4232_s12 = inlined_call_operand.hbm [shape: f32[1,512], index: 12, kind: input, shape index: {}]   ;;  %s4233_s13 = inlined_call_operand.vmem [shape: f32[2,1,512], index: 13, kind: output, shape index: {}]  }
   0x1   :  { %4239 = sst [smem:[#allocation26_spill]] %s4222_s2 }
   0x2   :  { %4240 = sst [smem:[#allocation27_spill]] %s4223_s3 }
   0x3   :  { %4241 = sst [smem:[#allocation28_spill]] %s4226_s6 }
   0x4   :  { %18 = vsyncpa [#allocation3], 0 }
   0x5   :  { %19 = vsyncpa [#allocation5], 0 }
   0x6   :  { %20 = vsyncpa [#allocation8], 0 }
   0x7   :  { %21 = vsyncpa [#allocation11], 0 }
   0x8   :  { %22 = vsyncpa [#allocation14], 0  ;;  %s3041_s25 = smov 0   ;;  %s3043_s26 = smov 0  }
   0x9   :  { %s3045_s27 = smov 0  }
   0xa LB: > { %s4242_s3 = sld [smem:[#allocation27_spill]]  ;;  %s2221_s14 = sadd.s32 4294967295, %s2955_s27   ;;  %s2955_s27 = sphi %s3045_s27, %s28_s27   ;;  %s2951_s26 = sphi %s3043_s26, %s4274_s26   ;;  %s2947_s25 = sphi %s3041_s25, %s4273_s25  }
   0xb   : > { %p2223_p0 = scmp.ge.s32.totalorder %s2955_s27, 1  ;;  %p362_p1 = scmp.lt.s32.totalorder %s2955_s27, 3 }
   0xc   : > { %p3062_p2 = scmp.eq.s32.totalorder %s2221_s14, 0  ;;  %s2957_s17 = smov [#allocation4]  }
   0xd   : > { %p3066_p3 = pnand %p2223_p0, %p362_p1  ;;  %s391_s18 = sshll.u32 %s2957_s17, 4  ;;  %s392_s18 = int_to_ptr.vmem [resolvable:$true] %s391_s18 }
   0xe   : > { %s4245_s6 = sld [smem:[#allocation28_spill]]  ;;  %s440_s24 = sshll.u32 %s4228_s8, 4  ;;  %s441_s24 = int_to_ptr.hbm [resolvable:$true] %s440_s24 }
   0xf   : > { %p2499_p4 = pneg %p3066_p3  ;;  %s2958_s29 = smov [#allocation7]  }
  0x10   : > { %s389_s30 = sshll.u32 %s4242_s3, 4  ;;  %s418_s14 = sshll.u32 %s2958_s29, 4  ;;  %s390_s30 = int_to_ptr.hbm [resolvable:$true] %s389_s30  ;;  %s419_s14 = int_to_ptr.vmem [resolvable:$true] %s418_s14 }
  0x11   : > { %p3080_p5 = pnand %p3062_p2, %p2499_p4  ;;  %s2959_s17 = smov [#allocation10]  }
  0x12   : > { %s442_s19 = sshll.u32 %s2959_s17, 4  ;;  %s467_s23 = sshll.u32 %s4231_s11, 4  ;;  %s443_s19 = int_to_ptr.vmem [resolvable:$true] %s442_s19  ;;  %s468_s23 = int_to_ptr.hbm [resolvable:$true] %s467_s23 }
  0x13   : > { %2505 = dma.hbm_to_vmem [thread:$0]  (!%p3080_p5), %s390_s30, 16, %s392_s18, [#allocation5]  }
  0x14   : > { %s416_s21 = sshll.u32 %s4245_s6, 4  ;;  %s2960_s3 = smov [#allocation13]   ;;  %s417_s21 = int_to_ptr.hbm [resolvable:$true] %s416_s21 }
  0x15   : > { %2511 = dma.hbm_to_vmem [thread:$0]  (!%p3080_p5), %s417_s21, 16, %s419_s14, [#allocation8]  }
  0x16   : > { %2517 = dma.hbm_to_vmem [thread:$0]  (!%p3080_p5), %s441_s24, 16, %s443_s19, [#allocation11]  }
  0x17   : > { %s469_s6 = sshll.u32 %s2960_s3, 4  ;;  %s47_s29 = sadd.s32 1, %s2951_s26  ;;  %s470_s6 = int_to_ptr.vmem [resolvable:$true] %s469_s6 }
  0x18   : > { %2523 = dma.hbm_to_vmem [thread:$0]  (!%p3080_p5), %s468_s23, 64, %s470_s6, [#allocation14]  }
  0x19   : > { %p49_p6 = scmp.ge.s32.totalorder %s47_s29, 2  ;;  %s4247_s2 = sld [smem:[#allocation26_spill]] }
  0x1a   : > { %s2961_s14 = smov [#allocation2]   ;;  %s401_s3 = sshll.u32 %s4224_s4, 4  ;;  %s402_s3 = int_to_ptr.hbm [resolvable:$true] %s401_s3 }
  0x1b   : > { %s4276_s29 = smov (%p49_p6, %s47_s29), 0  ;;  %s379_s17 = sshll.u32 %s2961_s14, 4  ;;  %s380_s17 = int_to_ptr.vmem [resolvable:$true] %s379_s17 }
  0x1c   : > { %s428_s19 = sshll.u32 %s4227_s7, 4  ;;  %s2962_s23 = smov [#allocation6]   ;;  %s429_s19 = int_to_ptr.hbm [resolvable:$true] %s428_s19 }
  0x1d   : > { %s403_s30 = sshll.u32 %s2962_s23, 4  ;;  %s2963_s18 = smov [#allocation9]   ;;  %s404_s30 = int_to_ptr.vmem [resolvable:$true] %s403_s30 }
  0x1e   : > { %2508 = dma.hbm_to_vmem [thread:$0]  (!%p3080_p5), %s402_s3, 16, %s404_s30, [#allocation5]  }
  0x1f   : > { %s377_s21 = sshll.u32 %s4247_s2, 4  ;;  %s430_s14 = sshll.u32 %s2963_s18, 4  ;;  %s378_s21 = int_to_ptr.hbm [resolvable:$true] %s377_s21  ;;  %s431_s14 = int_to_ptr.vmem [resolvable:$true] %s430_s14 }
  0x20   : > { %2502 = dma.hbm_to_vmem [thread:$0]  (!%p3080_p5), %s378_s21, 16, %s380_s17, [#allocation3]  }
  0x21   : > { %s455_s2 = sshll.u32 %s4230_s10, 4  ;;  %s479_s6 = sshll.u32 %s4232_s12, 4  ;;  %s456_s2 = int_to_ptr.hbm [resolvable:$true] %s455_s2  ;;  %s480_s6 = int_to_ptr.hbm [resolvable:$true] %s479_s6 }
  0x22   : > { %2514 = dma.hbm_to_vmem [thread:$0]  (!%p3080_p5), %s429_s19, 16, %s431_s14, [#allocation8]  }
  0x23   : > { %s2964_s24 = smov [#allocation12]   ;;  %s2965_s3 = smov [#allocation15]  }
  0x24   : > { %s457_s23 = sshll.u32 %s2964_s24, 4  ;;  %s481_s30 = sshll.u32 %s2965_s3, 4  ;;  %s458_s23 = int_to_ptr.vmem [resolvable:$true] %s457_s23  ;;  %s482_s30 = int_to_ptr.vmem [resolvable:$true] %s481_s30 }
  0x25   : > { %2520 = dma.hbm_to_vmem [thread:$0]  (!%p3080_p5), %s456_s2, 64, %s458_s23, [#allocation11]  }
  0x26   : > { %2526 = dma.hbm_to_vmem [thread:$0]  (!%p3080_p5), %s480_s6, 64, %s482_s30, [#allocation14]  }
  0x27   : > { %509 = sbr.rel (%p3066_p3) target bundleno = 1019 (0x3fb), region = 72 }
  0x2c   : > { %2926 = dma.done.wait (%p3062_p2), [#allocation3], 16  }
  0x2d   : > { %2928 = vsyncadd (%p3062_p2), [#allocation3], 4294967280 }
  0x2e   : > { %2930 = dma.done.wait (%p3062_p2), [#allocation5], 32  }
  0x2f   : > { %2932 = vsyncadd (%p3062_p2), [#allocation5], 4294967264 }
  0x30   : > { %2934 = dma.done.wait (%p3062_p2), [#allocation8], 32  }
  0x31   : > { %2936 = vsyncadd (%p3062_p2), [#allocation8], 4294967264 }
  0x32   : > { %2938 = dma.done.wait (%p3062_p2), [#allocation11], 80  }
  0x33   : > { %2940 = vsyncadd (%p3062_p2), [#allocation11], 4294967216 }
  0x34   : > { %2942 = dma.done.wait (%p3062_p2), [#allocation14], 128  }
  0x35   : > { %2944 = vsyncadd (%p3062_p2), [#allocation14], 4294967168  ;;  %vm671_vm0 = vcmask 1040384   ;;  %p604_p7 = scmp.lt.s32.totalorder %s2947_s25, 1  ;;  %v1970_v0 = vlaneseq  ;;  %vm672_vm1 = vcmask 1041408   ;;  %v2966_v1 = vmov 65535  }
  0x36   : > { %v673_v2 = vsel %vm671_vm0, 4294967295, %v2966_v1  ;;  %v4248_v3 = vmov 0  ;;  %v2967_v5 = vmov -inf   ;;  %v631_v6 = vld [vmem:[%s4221_s1] sm:$0x3]  ;;  %vm658_vm3 = vcmask 23552  }
  0x37   : > { %s4278_s25 = smov (!%p604_p7, %s2947_s25), 1  ;;  %vm3148_vm2 = vcmp.lt.s32.totalorder %v1970_v0, 512  ;;  %v674_v4 = vsel %vm672_vm1, %v673_v2, 0  ;;  %v2583_v12 = vld [vmem:[#allocation2] ss:$0 sm:$0xff]  ;;  %vm707_vm4 = vcmask 523264  }
  0x38   : > { %v4249_v3 = vsel %vm3148_vm2, 4294967295, %v4248_v3  ;;  %s2417_s2 = sshll.u32 %s4278_s25, 5  ;;  %s2246_s16 = sshll.u32 %s4278_s25, 2  ;;  %v676_v7 = vand.u32 %v674_v4, %v631_v6  ;;  %v2968_v53 = vmov 64.0   ;;  %v2425_v61 = vld [vmem:[%s4225_s5 + $0x18] sm:$0xff]  ;;  %v2424_v2 = vld [vmem:[%s4225_s5 + $0x10] sm:$0xff] }
  0x39   : > { %4250 = vst [vmem:[#allocation21_spill] sm:$0xff] %v4249_v3  ;;  %s611_s19 = scalar_lea.vmem %s4220_s0, %s2417_s2  ;;  %s3159_s20 = scalar_lea.vmem %s4233_s13, %s2246_s16  ;;  %2589 = vrcp.f32 %v2968_v53  ;;  %1001 = vmatpush.bf16.msra.mxu1 %v2425_v61  ;;  %2459 = vmatpush.bf16.msra.mxu2 %v2425_v61 }
  0x3a   : > { %1974 = vst.msk [vmem:[%s3159_s20] sm:$0xf] %vm3148_vm2, %v2967_v5  ;;  %v2418_v8 = vld [vmem:[%s611_s19] sm:$0xff]  ;;  %v2420_v9 = vld [vmem:[%s611_s19 + $0x10] sm:$0xff]  ;;  %685 = vmatpush.bf16.msra.mxu0 %v676_v7  ;;  %2458 = vmatpush.bf16.msra.mxu3 %v676_v7  ;;  %v2419_v10 = vld [vmem:[%s611_s19 + $0x8] sm:$0xff] }
  0x3b   : > { %v2421_v11 = vld [vmem:[%s611_s19 + $0x18] sm:$0xff]  ;;  %v2423_v7 = vld [vmem:[%s4225_s5 + $0x8] sm:$0xff] }
  0x3d   : > { %2263 = vmatmul.msk.bf16.vlgmr.msra.gmra.mxu0 %vm658_vm3, %v2418_v8  ;;  %2265 = vmatmul.msk.bf16.vlgmr.msra.gmra.mxu3 %vm658_vm3, %v2420_v9 }
  0x3e   : > { %1002 = vmatpush.bf16.msra.mxu1 %v2424_v2  ;;  %2460 = vmatpush.bf16.msra.mxu2 %v2424_v2 }
  0x3f   : > { %v2590_v54 = vpop.eup %2589 }
  0x40   : > { %v733_v55 = vmul.f32 64.0, %v2590_v54  ;;  %vm737_vm5 = vweird.f32 %v2590_v54 }
  0x42   : > { %v734_v56 = vsub.f32 1.0, %v733_v55  ;;  %1003 = vmatpush.bf16.msra.mxu1 %v2423_v7  ;;  %2461 = vmatpush.bf16.msra.mxu2 %v2423_v7 }
  0x44   : > { %v735_v57 = vmul.f32 %v2590_v54, %v734_v56 }
  0x46   : > { %v736_v58 = vadd.f32 %v2590_v54, %v735_v57 }
  0x48   : > { %v3223_v59 = vsel %vm737_vm5, %v2590_v54, %v736_v58  ;;  %v3266_v58 = vld [vmem:[#allocation4] ss:$0 sm:$0xff] }
  0x4d   : > { %2264 = vmatmul.msk.bf16.gmra.mxu0 %vm658_vm3, %v2419_v10  ;;  %2266 = vmatmul.msk.bf16.gmra.mxu3 %vm658_vm3, %v2421_v11 }
  0xba   : > { %v687_v13 = vpop.f32.mrf.mxu0 }
  0xbb   : > { %v3167_v14 = vadd.f32 %v2583_v12, %v687_v13  ;;  %v2422_v13 = vld [vmem:[%s4225_s5] sm:$0xff] }
  0xbc   : > { %1004 = vmatpush.bf16.msra.mxu1 %v2422_v13  ;;  %2462 = vmatpush.bf16.msra.mxu2 %v2422_v13 }
  0xbd   : > { %v708_v15 = vsel %vm707_vm4, %v3167_v14, 0.0  ;;  %v747_v16 = vmul.f32 %v3167_v14, %v3167_v14 }
  0xbe   : > { %709 = vadd.xlane.f32.xlu0 %v708_v15 }
  0xbf   : > { %v755_v17 = vsel %vm707_vm4, %v747_v16, 0.0 }
  0xc0   : > { %756 = vadd.xlane.f32.xlu1 %v755_v17  ;;  %v697_v18 = vpop.f32.mrf.mxu3 }
  0xc1   : > { %v3198_v37 = vadd.f32 %v2583_v12, %v697_v18 }
  0xc2   : > { %v689_v19 = vpop.f32.mrf.mxu0 }
  0xc3   : > { %v3174_v20 = vadd.f32 %v2583_v12, %v689_v19  ;;  %v751_v41 = vmul.f32 %v3198_v37, %v3198_v37  ;;  %v720_v42 = vsel %vm707_vm4, %v3198_v37, 0.0 }
  0xc5   : > { %v711_v21 = vsel %vm707_vm4, %v3174_v20, 0.0  ;;  %v748_v22 = vmul.f32 %v3174_v20, %v3174_v20  ;;  %v767_v45 = vsel %vm707_vm4, %v751_v41, 0.0 }
  0xc6   : > { %712 = vadd.xlane.f32.xlu0 %v711_v21 }
  0xc7   : > { %v758_v23 = vsel %vm707_vm4, %v748_v22, 0.0 }
  0xc8   : > { %759 = vadd.xlane.f32.xlu1 %v758_v23  ;;  %v699_v24 = vpop.f32.mrf.mxu3 }
  0xc9   : > { %v3188_v31 = vadd.f32 %v2583_v12, %v699_v24 }
  0xca   : > { %v692_v25 = vpop.f32.mrf.mxu0 }
  0xcb   : > { %v3181_v26 = vadd.f32 %v2583_v12, %v692_v25  ;;  %v723_v36 = vsel %vm707_vm4, %v3188_v31, 0.0  ;;  %v752_v46 = vmul.f32 %v3188_v31, %v3188_v31 }
  0xcd   : > { %v714_v27 = vsel %vm707_vm4, %v3181_v26, 0.0  ;;  %v749_v28 = vmul.f32 %v3181_v26, %v3181_v26  ;;  %v770_v48 = vsel %vm707_vm4, %v752_v46, 0.0 }
  0xce   : > { %715 = vadd.xlane.f32.xlu2 %v714_v27 }
  0xcf   : > { %v761_v29 = vsel %vm707_vm4, %v749_v28, 0.0 }
  0xd0   : > { %762 = vadd.xlane.f32.xlu0 %v761_v29  ;;  %v702_v30 = vpop.f32.mrf.mxu3 }
  0xd1   : > { %v3201_v39 = vadd.f32 %v2583_v12, %v702_v30 }
  0xd2   : > { %v694_v32 = vpop.f32.mrf.mxu0 }
  0xd3   : > { %v3190_v33 = vadd.f32 %v2583_v12, %v694_v32  ;;  %v726_v43 = vsel %vm707_vm4, %v3201_v39, 0.0  ;;  %v753_v51 = vmul.f32 %v3201_v39, %v3201_v39 }
  0xd5   : > { %v717_v34 = vsel %vm707_vm4, %v3190_v33, 0.0  ;;  %v750_v35 = vmul.f32 %v3190_v33, %v3190_v33  ;;  %v773_v52 = vsel %vm707_vm4, %v753_v51, 0.0 }
  0xd6   : > { %718 = vadd.xlane.f32.xlu2 %v717_v34 }
  0xd7   : > { %v764_v38 = vsel %vm707_vm4, %v750_v35, 0.0 }
  0xd8   : > { %765 = vadd.xlane.f32.xlu1 %v764_v38  ;;  %724 = vadd.xlane.f32.xlu0 %v723_v36  ;;  %v704_v40 = vpop.f32.mrf.mxu3 }
  0xd9   : > { %v3209_v44 = vadd.f32 %v2583_v12, %v704_v40 }
  0xdb   : > { %v754_v47 = vmul.f32 %v3209_v44, %v3209_v44  ;;  %v729_v49 = vsel %vm707_vm4, %v3209_v44, 0.0 }
  0xdd   : > { %v776_v50 = vsel %vm707_vm4, %v754_v47, 0.0 }
  0xde   : > { %721 = vadd.xlane.f32.xlu2 %v720_v42 }
  0xe0   : > { %768 = vadd.xlane.f32.xlu1 %v767_v45  ;;  %727 = vadd.xlane.f32.xlu0 %v726_v43 }
  0xe6   : > { %771 = vadd.xlane.f32.xlu2 %v770_v48 }
  0xe8   : > { %730 = vadd.xlane.f32.xlu1 %v729_v49  ;;  %777 = vadd.xlane.f32.xlu0 %v776_v50 }
  0xee   : > { %774 = vadd.xlane.f32.xlu2 %v773_v52 }
 0x131   : > { %v710_v60 = vpop.xlane.xlu0 %709 }
 0x132   : > { %v3229_v62 = vmul.f32 %v3223_v59, %v710_v60 }
 0x133   : > { %v757_v63 = vpop.xlane.xlu1 %756 }
 0x134   : > { %v787_v0 = vmul.f32 %v3229_v62, %v3229_v62  ;;  %v779_v1 = vmul.f32 %v757_v63, %v3223_v59  ;;  %v811_v50 = vsub.f32 %v3167_v14, %v3229_v62 }
 0x136   : > { %v795_v4 = vsub.f32 %v779_v1, %v787_v0 }
 0x138   : > { %v803_v5 = vmax.f32 %v795_v4, 0.0 }
 0x139   : > { %v713_v6 = vpop.xlane.xlu0 %712 }
 0x13a   : > { %v819_v8 = vadd.f32 1e-06, %v803_v5  ;;  %v3241_v9 = vmul.f32 %v3223_v59, %v713_v6 }
 0x13b   : > { %v760_v10 = vpop.xlane.xlu1 %759 }
 0x13c   : > { %2591 = vrsqrt.f32 %v819_v8  ;;  %v788_v11 = vmul.f32 %v3241_v9, %v3241_v9  ;;  %v780_v12 = vmul.f32 %v760_v10, %v3223_v59  ;;  %vm833_vm7 = vweird.f32 %v819_v8 }
 0x13d   : > { %v812_v2 = vsub.f32 %v3174_v20, %v3241_v9 }
 0x13e   : > { %v796_v15 = vsub.f32 %v780_v12, %v788_v11 }
 0x140   : > { %v804_v16 = vmax.f32 %v796_v15, 0.0 }
 0x141   : > { %v716_v17 = vpop.xlane.xlu2 %715 }
 0x142   : > { %v2592_v18 = vpop.eup %2591  ;;  %v3250_v19 = vmul.f32 %v3223_v59, %v716_v17  ;;  %v820_v22 = vadd.f32 1e-06, %v804_v16 }
 0x143   : > { %v828_v21 = vmul.f32 %v2592_v18, %v819_v8  ;;  %v763_v23 = vpop.xlane.xlu0 %762  ;;  %vm834_vm6 = vweird.f32 %v2592_v18  ;;  %v3277_v8 = vld [vmem:[#allocation6] ss:$0 sm:$0xff] }
 0x144   : > { %v789_v24 = vmul.f32 %v3250_v19, %v3250_v19  ;;  %v781_v25 = vmul.f32 %v763_v23, %v3223_v59  ;;  %2593 = vrsqrt.f32 %v820_v22  ;;  %vm835_vm8 = vmor %vm833_vm7, %vm834_vm6  ;;  %vm843_vm10 = vweird.f32 %v820_v22 }
 0x145   : > { %v829_v27 = vmul.f32 %v2592_v18, %v828_v21 }
 0x146   : > { %v797_v28 = vsub.f32 %v781_v25, %v789_v24 }
 0x147   : > { %v830_v29 = vmul.f32 0.5, %v829_v27 }
 0x148   : > { %v805_v30 = vmax.f32 %v797_v28, 0.0 }
 0x149   : > { %v831_v32 = vsub.f32 1.5, %v830_v29  ;;  %v719_v34 = vpop.xlane.xlu2 %718 }
 0x14a   : > { %v821_v35 = vadd.f32 1e-06, %v805_v30  ;;  %v3256_v36 = vmul.f32 %v3223_v59, %v719_v34  ;;  %v2594_v38 = vpop.eup %2593 }
 0x14b   : > { %v832_v40 = vmul.f32 %v2592_v18, %v831_v32  ;;  %v766_v41 = vpop.xlane.xlu1 %765  ;;  %v725_v42 = vpop.xlane.xlu0 %724  ;;  %v838_v43 = vmul.f32 %v2594_v38, %v820_v22  ;;  %vm844_vm9 = vweird.f32 %v2594_v38 }
 0x14c   : > { %2595 = vrsqrt.f32 %v821_v35  ;;  %v790_v45 = vmul.f32 %v3256_v36, %v3256_v36  ;;  %v782_v46 = vmul.f32 %v766_v41, %v3223_v59  ;;  %vm845_vm11 = vmor %vm843_vm10, %vm844_vm9  ;;  %v3280_v15 = vmul.f32 %v3223_v59, %v725_v42 }
 0x14d   : > { %v839_v47 = vmul.f32 %v2594_v38, %v838_v43  ;;  %v836_v48 = vsel %vm835_vm8, %v2592_v18, %v832_v40  ;;  %vm853_vm13 = vweird.f32 %v821_v35  ;;  %v813_v43 = vsub.f32 %v3181_v26, %v3250_v19 }
 0x14e   : > { %v798_v49 = vsub.f32 %v782_v46, %v790_v45  ;;  %v907_v57 = vmul.f32 %v836_v48, %v811_v50  ;;  %v792_v23 = vmul.f32 %v3280_v15, %v3280_v15 }
 0x14f   : > { %v840_v51 = vmul.f32 0.5, %v839_v47 }
 0x150   : > { %v806_v52 = vmax.f32 %v798_v49, 0.0  ;;  %v918_v7 = vmul.f32 %v3266_v58, %v907_v57 }
 0x151   : > { %v722_v53 = vpop.xlane.xlu2 %721  ;;  %v841_v55 = vsub.f32 1.5, %v840_v51 }
 0x152   : > { %v2596_v54 = vpop.eup %2595  ;;  %v3264_v56 = vmul.f32 %v3223_v59, %v722_v53  ;;  %v3268_v61 = vadd.f32 1e-06, %v806_v52  ;;  %v929_v18 = vadd.f32 %v3277_v8, %v918_v7 }
 0x153   : > { %v848_v60 = vmul.f32 %v2596_v54, %v821_v35  ;;  %v769_v63 = vpop.xlane.xlu1 %768  ;;  %v728_v0 = vpop.xlane.xlu0 %727  ;;  %v842_v1 = vmul.f32 %v2594_v38, %v841_v55  ;;  %vm854_vm12 = vweird.f32 %v2596_v54 }
 0x154   : > { %v791_v14 = vmul.f32 %v3264_v56, %v3264_v56  ;;  %v783_v62 = vmul.f32 %v769_v63, %v3223_v59  ;;  %2597 = vrsqrt.f32 %v3268_v61  ;;  %vm3292_vm14 = vmor %vm853_vm13, %vm854_vm12  ;;  %v3297_v30 = vmul.f32 %v3223_v59, %v728_v0 }
 0x155   : > { %v849_v4 = vmul.f32 %v2596_v54, %v848_v60  ;;  %v846_v5 = vsel %vm845_vm11, %v2594_v38, %v842_v1  ;;  %v937_v41 = vmax.f32 %v929_v18, 0.0  ;;  %vm863_vm3 = vweird.f32 %v3268_v61 }
 0x156   : > { %v799_v6 = vsub.f32 %v783_v62, %v791_v14  ;;  %v908_v11 = vmul.f32 %v846_v5, %v812_v2  ;;  %v793_v48 = vmul.f32 %v3297_v30, %v3297_v30  ;;  %v814_v0 = vsub.f32 %v3190_v33, %v3256_v36 }
 0x157   : > { %v850_v10 = vmul.f32 0.5, %v849_v4 }
 0x158   : > { %v807_v12 = vmax.f32 %v799_v6, 0.0  ;;  %v919_v20 = vmul.f32 %v3266_v58, %v908_v11 }
 0x159   : > { %v851_v13 = vsub.f32 1.5, %v850_v10  ;;  %v772_v16 = vpop.xlane.xlu2 %771 }
 0x15a   : > { %v3283_v9 = vadd.f32 1e-06, %v807_v12  ;;  %v784_v17 = vmul.f32 %v772_v16, %v3223_v59  ;;  %v2598_v21 = vpop.eup %2597  ;;  %v930_v27 = vadd.f32 %v3277_v8, %v919_v20  ;;  %v815_v16 = vsub.f32 %v3198_v37, %v3264_v56 }
 0x15b   : > { %v852_v22 = vmul.f32 %v2596_v54, %v851_v13  ;;  %v731_v24 = vpop.xlane.xlu1 %730  ;;  %v778_v25 = vpop.xlane.xlu0 %777  ;;  %v858_v28 = vmul.f32 %v2598_v21, %v3268_v61  ;;  %vm864_vm15 = vweird.f32 %v2598_v21  ;;  %v816_v37 = vsub.f32 %v3188_v31, %v3280_v15 }
 0x15c   : > { %2599 = vrsqrt.f32 %v3283_v9  ;;  %v800_v32 = vsub.f32 %v784_v17, %v792_v23  ;;  %v3300_v34 = vmul.f32 %v3223_v59, %v731_v24  ;;  %v786_v38 = vmul.f32 %v778_v25, %v3223_v59  ;;  %vm865_vm5 = vmor %vm863_vm3, %vm864_vm15 }
 0x15d   : > { %v856_v35 = vsel %vm3292_vm14, %v2596_v54, %v852_v22  ;;  %v859_v40 = vmul.f32 %v2598_v21, %v858_v28  ;;  %v938_v42 = vmax.f32 %v930_v27, 0.0  ;;  %vm873_vm7 = vweird.f32 %v3283_v9 }
 0x15e   : > { %v808_v45 = vmax.f32 %v800_v32, 0.0  ;;  %v794_v46 = vmul.f32 %v3300_v34, %v3300_v34  ;;  %v909_v53 = vmul.f32 %v856_v35, %v813_v43  ;;  %v817_v15 = vsub.f32 %v3201_v39, %v3297_v30 }
 0x15f   : > { %v860_v47 = vmul.f32 0.5, %v859_v40  ;;  %v945_v49 = vpack.c.bf16 %v938_v42, %v937_v41 }
 0x160   : > { %v824_v50 = vadd.f32 1e-06, %v808_v45  ;;  %v802_v51 = vsub.f32 %v786_v38, %v794_v46  ;;  %v920_v14 = vmul.f32 %v3266_v58, %v909_v53 }
 0x161   : > { %v775_v52 = vpop.xlane.xlu2 %774  ;;  %v861_v55 = vsub.f32 1.5, %v860_v47  ;;  %2283 = vmatmul.msk.bf16.vlgmr.msra.gmra.mxu1 %vm707_vm4, %v945_v49 }
 0x162   : > { %v2600_v54 = vpop.eup %2599  ;;  %v785_v26 = vmul.f32 %v775_v52, %v3223_v59  ;;  %2601 = vrsqrt.f32 %v824_v50  ;;  %v810_v60 = vmax.f32 %v802_v51, 0.0  ;;  %v931_v11 = vadd.f32 %v3277_v8, %v920_v14  ;;  %v2586_v14 = vld [vmem:[#allocation7] ss:$0 sm:$0xff] }
 0x163   : > { %v868_v19 = vmul.f32 %v2600_v54, %v3283_v9  ;;  %v862_v57 = vmul.f32 %v2598_v21, %v861_v55  ;;  %vm874_vm6 = vweird.f32 %v2600_v54  ;;  %vm883_vm10 = vweird.f32 %v824_v50 }
 0x164   : > { %v801_v63 = vsub.f32 %v785_v26, %v793_v48  ;;  %v826_v2 = vadd.f32 1e-06, %v810_v60  ;;  %vm875_vm8 = vmor %vm873_vm7, %vm874_vm6  ;;  %v939_v17 = vmax.f32 %v931_v11, 0.0 }
 0x165   : > { %v869_v1 = vmul.f32 %v2600_v54, %v868_v19  ;;  %v866_v62 = vsel %vm865_vm5, %v2598_v21, %v862_v57 }
 0x166   : > { %v809_v4 = vmax.f32 %v801_v63, 0.0  ;;  %v910_v59 = vmul.f32 %v866_v62, %v814_v0  ;;  %2603 = vrsqrt.f32 %v826_v2  ;;  %vm903_vm15 = vweird.f32 %v826_v2 }
 0x167   : > { %v870_v5 = vmul.f32 0.5, %v869_v1 }
 0x168   : > { %v825_v6 = vadd.f32 1e-06, %v809_v4  ;;  %v2602_v7 = vpop.eup %2601  ;;  %v921_v61 = vmul.f32 %v3266_v58, %v910_v59 }
 0x169   : > { %v871_v10 = vsub.f32 1.5, %v870_v5  ;;  %v878_v12 = vmul.f32 %v2602_v7, %v824_v50  ;;  %vm884_vm9 = vweird.f32 %v2602_v7 }
 0x16a   : > { %2605 = vrsqrt.f32 %v825_v6  ;;  %v932_v36 = vadd.f32 %v3277_v8, %v921_v61  ;;  %vm885_vm11 = vmor %vm883_vm10, %vm884_vm9  ;;  %vm893_vm14 = vweird.f32 %v825_v6 }
 0x16b   : > { %v872_v33 = vmul.f32 %v2600_v54, %v871_v10  ;;  %v879_v13 = vmul.f32 %v2602_v7, %v878_v12 }
 0x16c   : > { %v940_v18 = vmax.f32 %v932_v36, 0.0  ;;  %v2604_v21 = vpop.eup %2603 }
 0x16d   : > { %v876_v20 = vsel %vm875_vm8, %v2600_v54, %v872_v33  ;;  %v880_v22 = vmul.f32 0.5, %v879_v13  ;;  %v898_v23 = vmul.f32 %v2604_v21, %v826_v2  ;;  %vm904_vm13 = vweird.f32 %v2604_v21 }
 0x16e   : > { %v946_v24 = vpack.c.bf16 %v940_v18, %v939_v17  ;;  %v911_v25 = vmul.f32 %v876_v20, %v815_v16  ;;  %vm905_vm5 = vmor %vm903_vm15, %vm904_vm13  ;;  %v818_v54 = vsub.f32 %v3209_v44, %v3300_v34 }
 0x16f   : > { %v881_v28 = vsub.f32 1.5, %v880_v22  ;;  %v899_v29 = vmul.f32 %v2604_v21, %v898_v23  ;;  %v2969_v23 = vmov 128.0  }
 0x170   : > { %v2606_v27 = vpop.eup %2605  ;;  %v922_v35 = vmul.f32 %v3266_v58, %v911_v25  ;;  %2607 = vrcp.f32 %v2969_v23  ;;  %v2337_v23 = vld [vmem:[%s4229_s9 + $0x60] sm:$0xf] }
 0x171   : > { %v888_v9 = vmul.f32 %v2606_v27, %v825_v6  ;;  %v882_v32 = vmul.f32 %v2602_v7, %v881_v28  ;;  %2284 = vmatmul.msk.bf16.gmra.mxu1 %vm707_vm4, %v946_v24  ;;  %v900_v56 = vmul.f32 0.5, %v899_v29  ;;  %vm894_vm12 = vweird.f32 %v2606_v27  ;;  %v2456_v28 = vld [vmem:[%s4229_s9 + $0xec] sm:$0xf0]  ;;  %v2454_v29 = vld [vmem:[%s4229_s9 + $0xe4] sm:$0xf] }
 0x172   : > { %v933_v47 = vadd.f32 %v3277_v8, %v922_v35  ;;  %vm895_vm3 = vmor %vm893_vm14, %vm894_vm12 }
 0x173   : > { %v889_v38 = vmul.f32 %v2606_v27, %v888_v9  ;;  %v886_v40 = vsel %vm885_vm11, %v2602_v7, %v882_v32  ;;  %v901_v41 = vsub.f32 1.5, %v900_v56  ;;  %v2403_v32 = vld [vmem:[%s4229_s9 + $0xf0] sm:$0xf0]  ;;  %v2457_v56 = vld [vmem:[%s4229_s9 + $0xf4] sm:$0xf0] }
 0x174   : > { %v912_v43 = vmul.f32 %v886_v40, %v816_v37  ;;  %v941_v51 = vmax.f32 %v933_v47, 0.0  ;;  %v2409_v37 = vld [vmem:[%s4229_s9 + $0xe8] sm:$0xf]  ;;  %v2455_v40 = vld [vmem:[%s4229_s9 + $0xec] sm:$0xf] }
 0x175   : > { %v890_v42 = vmul.f32 0.5, %v889_v38  ;;  %v902_v48 = vmul.f32 %v2604_v21, %v901_v41  ;;  %v2406_v38 = vor.u32 %v2454_v29, %v2403_v32  ;;  %v2410_v35 = vor.u32 %v2457_v56, %v2409_v37  ;;  %v2411_v41 = vld [vmem:[%s4229_s9 + $0xf8] sm:$0xf0]  ;;  %v2450_v47 = vld [vmem:[%s4229_s9 + $0xc4] sm:$0xf] }
 0x176   : > { %v923_v46 = vmul.f32 %v3266_v58, %v912_v43  ;;  %v3381_v24 = vpop.eup %2607  ;;  %v2414_v43 = vor.u32 %v2455_v40, %v2411_v41  ;;  %v2345_v29 = vld [vmem:[%s4229_s9 + $0x68] sm:$0xf] }
 0x177   : > { %v891_v45 = vsub.f32 1.5, %v890_v42  ;;  %v906_v53 = vsel %vm905_vm5, %v2604_v21, %v902_v48  ;;  %v1045_v25 = vmul.f32 128.0, %v3381_v24  ;;  %1484 = vmatpush.bf16.msrb.mxu3 %v2406_v38  ;;  %1513 = vmatpush.bf16.msrb.mxu0 %v2410_v35  ;;  %v2439_v38 = vld [vmem:[%s4229_s9 + $0x6c] sm:$0xf]  ;;  %v2347_v35 = vld [vmem:[%s4229_s9 + $0x78] sm:$0xf0] }
 0x178   : > { %v934_v31 = vadd.f32 %v3277_v8, %v923_v46  ;;  %v914_v19 = vmul.f32 %v906_v53, %v818_v54  ;;  %v2452_v46 = vld [vmem:[%s4229_s9 + $0xcc] sm:$0xf0]  ;;  %1542 = vmatpush.bf16.msrb.mxu1 %v2414_v43  ;;  %v2395_v53 = vld [vmem:[%s4229_s9 + $0xd8] sm:$0xf0]  ;;  %v2350_v41 = vor.u32 %v2439_v38, %v2347_v35  ;;  %v2321_v43 = vld [vmem:[%s4229_s9 + $0x40] sm:$0xf] }
 0x179   : > { %v892_v49 = vmul.f32 %v2606_v27, %v891_v45  ;;  %v1046_v42 = vsub.f32 1.0, %v1045_v25  ;;  %v2385_v45 = vld [vmem:[%s4229_s9 + $0xc0] sm:$0xf]  ;;  %v2440_v25 = vld [vmem:[%s4229_s9 + $0x6c] sm:$0xf0] }
 0x17a   : > { %v942_v52 = vmax.f32 %v934_v31, 0.0  ;;  %v925_v60 = vmul.f32 %v3266_v58, %v914_v19  ;;  %v2386_v48 = vor.u32 %v2452_v46, %v2385_v45  ;;  %v2393_v31 = vld [vmem:[%s4229_s9 + $0xc8] sm:$0xf]  ;;  %v2448_v19 = vld [vmem:[%s4229_s9 + $0xac] sm:$0xf0] }
 0x17b   : > { %v896_v50 = vsel %vm895_vm3, %v2606_v27, %v892_v49  ;;  %v2401_v27 = vld [vmem:[%s4229_s9 + $0xe0] sm:$0xf]  ;;  %v2387_v49 = vld [vmem:[%s4229_s9 + $0xd0] sm:$0xf0]  ;;  %v2436_v45 = vld [vmem:[%s4229_s9 + $0x4c] sm:$0xf0] }
 0x17c   : > { %v947_v55 = vpack.c.bf16 %v942_v52, %v941_v51  ;;  %v913_v26 = vmul.f32 %v896_v50, %v817_v15  ;;  %v936_v39 = vadd.f32 %v3277_v8, %v925_v60  ;;  %v2402_v9 = vor.u32 %v2456_v28, %v2401_v27  ;;  %v2453_v15 = vld [vmem:[%s4229_s9 + $0xd4] sm:$0xf0]  ;;  %v2451_v52 = vld [vmem:[%s4229_s9 + $0xcc] sm:$0xf]  ;;  %v2438_v27 = vld [vmem:[%s4229_s9 + $0x64] sm:$0xf] }
 0x17d   : > { %v2390_v50 = vor.u32 %v2450_v47, %v2387_v49  ;;  %v2394_v51 = vor.u32 %v2453_v15, %v2393_v31  ;;  %v2398_v54 = vor.u32 %v2451_v52, %v2395_v53  ;;  %v2338_v28 = vor.u32 %v2440_v25, %v2337_v23  ;;  %v2434_v46 = vld [vmem:[%s4229_s9 + $0x44] sm:$0xf]  ;;  %v2323_v31 = vld [vmem:[%s4229_s9 + $0x50] sm:$0xf0]  ;;  %v2329_v15 = vld [vmem:[%s4229_s9 + $0x48] sm:$0xf] }
 0x17e   : > { %2285 = vmatmul.msk.bf16.vlgmr.msra.gmra.mxu2 %vm707_vm4, %v947_v55  ;;  %v924_v57 = vmul.f32 %v3266_v58, %v913_v26  ;;  %v944_v0 = vmax.f32 %v936_v39, 0.0  ;;  %v1047_v55 = vmul.f32 %v3381_v24, %v1046_v42  ;;  %v2369_v26 = vld [vmem:[%s4229_s9 + $0xa0] sm:$0xf]  ;;  %v2377_v39 = vld [vmem:[%s4229_s9 + $0xa8] sm:$0xf]  ;;  %v2322_v49 = vor.u32 %v2436_v45, %v2321_v43 }
 0x17f   : > { %1455 = vmatpush.bf16.msrb.mxu2 %v2402_v9  ;;  %1485 = vmatpush.bf16.msrb.mxu3 %v2390_v50  ;;  %v2370_v60 = vor.u32 %v2448_v19, %v2369_v26  ;;  %v2441_v9 = vld [vmem:[%s4229_s9 + $0x74] sm:$0xf0]  ;;  %v2435_v53 = vld [vmem:[%s4229_s9 + $0x4c] sm:$0xf]  ;;  %v2305_v19 = vld [vmem:[%s4229_s9 + $0x20] sm:$0xf] }
 0x180   : > { %v935_v63 = vadd.f32 %v3277_v8, %v924_v57  ;;  %1514 = vmatpush.bf16.msrb.mxu0 %v2394_v51  ;;  %v2446_v57 = vld [vmem:[%s4229_s9 + $0xa4] sm:$0xf]  ;;  %1543 = vmatpush.bf16.msrb.mxu1 %v2398_v54  ;;  %v2346_v56 = vor.u32 %v2441_v9, %v2345_v29  ;;  %v2437_v50 = vld [vmem:[%s4229_s9 + $0x54] sm:$0xf0]  ;;  %v2326_v51 = vor.u32 %v2434_v46, %v2323_v31  ;;  %v2331_v54 = vld [vmem:[%s4229_s9 + $0x58] sm:$0xf0] }
 0x181   : > { %v2330_v52 = vor.u32 %v2437_v50, %v2329_v15  ;;  %v2334_v26 = vor.u32 %v2435_v53, %v2331_v54  ;;  %v2299_v29 = vld [vmem:[%s4229_s9 + $0x18] sm:$0xf0] }
 0x182   : > { %v943_v30 = vmax.f32 %v935_v63, 0.0  ;;  %v2371_v63 = vld [vmem:[%s4229_s9 + $0xb0] sm:$0xf0] }
 0x183   : > { %1456 = vmatpush.bf16.msrb.mxu2 %v2386_v48 }
 0x184   : > { %v948_v1 = vpack.c.bf16 %v944_v0, %v943_v30  ;;  %v2449_v30 = vld [vmem:[%s4229_s9 + $0xb4] sm:$0xf0]  ;;  %v2374_v0 = vor.u32 %v2446_v57, %v2371_v63  ;;  %v2432_v57 = vld [vmem:[%s4229_s9 + $0x2c] sm:$0xf0] }
 0x186   : > { %1486 = vmatpush.bf16.msrb.mxu3 %v2374_v0  ;;  %v2313_v0 = vld [vmem:[%s4229_s9 + $0x28] sm:$0xf] }
 0x187   : > { %1457 = vmatpush.bf16.msrb.mxu2 %v2370_v60  ;;  %v2430_v60 = vld [vmem:[%s4229_s9 + $0x24] sm:$0xf] }
 0x18e   : > { %2286 = vmatmul.msk.bf16.gmra.mxu2 %vm707_vm4, %v948_v1  ;;  %v2378_v1 = vor.u32 %v2449_v30, %v2377_v39  ;;  %vm1049_vm4 = vweird.f32 %v3381_v24  ;;  %v2306_v39 = vor.u32 %v2432_v57, %v2305_v19  ;;  %v2307_v30 = vld [vmem:[%s4229_s9 + $0x30] sm:$0xf0] }
 0x190   : > { %1515 = vmatpush.bf16.msrb.mxu0 %v2378_v1 }
 0x1de   : > { %v1006_v44 = vpop.f32.mrf.mxu1 }
 0x1df   : > { %v3341_v34 = vadd.f32 %v2586_v14, %v1006_v44  ;;  %v2379_v44 = vld [vmem:[%s4229_s9 + $0xb8] sm:$0xf0] }
 0x1e1   : > { %1028 = vadd.xlane.f32.xlu1 %v3341_v34  ;;  %v1059_v62 = vmul.f32 %v3341_v34, %v3341_v34 }
 0x1e3   : > { %1067 = vadd.xlane.f32.xlu0 %v1059_v62 }
 0x1e6   : > { %v1008_v58 = vpop.f32.mrf.mxu1 }
 0x1e7   : > { %v3346_v2 = vadd.f32 %v2586_v14, %v1008_v58  ;;  %v1048_v58 = vadd.f32 %v3381_v24, %v1047_v55 }
 0x1e9   : > { %1030 = vadd.xlane.f32.xlu2 %v3346_v2  ;;  %v1060_v8 = vmul.f32 %v3346_v2, %v3346_v2 }
 0x1eb   : > { %1069 = vadd.xlane.f32.xlu1 %v1060_v8  ;;  %v2353_v8 = vld [vmem:[%s4229_s9 + $0x80] sm:$0xf] }
 0x1ee   : > { %v1011_v4 = vpop.f32.mrf.mxu1 }
 0x1ef   : > { %v3351_v5 = vadd.f32 %v2586_v14, %v1011_v4  ;;  %v2444_v4 = vld [vmem:[%s4229_s9 + $0x8c] sm:$0xf0] }
 0x1f1   : > { %1032 = vadd.xlane.f32.xlu2 %v3351_v5  ;;  %v1061_v59 = vmul.f32 %v3351_v5, %v3351_v5 }
 0x1f3   : > { %1071 = vadd.xlane.f32.xlu1 %v1061_v59  ;;  %v2442_v59 = vld [vmem:[%s4229_s9 + $0x84] sm:$0xf] }
 0x1f6   : > { %v1013_v6 = vpop.f32.mrf.mxu1 }
 0x1f7   : > { %v3356_v7 = vadd.f32 %v2586_v14, %v1013_v6  ;;  %v2354_v6 = vor.u32 %v2444_v4, %v2353_v8 }
 0x1f9   : > { %1034 = vadd.xlane.f32.xlu0 %v3356_v7  ;;  %v1062_v10 = vmul.f32 %v3356_v7, %v3356_v7  ;;  %1458 = vmatpush.bf16.msrb.mxu2 %v2354_v6 }
 0x1fb   : > { %1073 = vadd.xlane.f32.xlu2 %v1062_v10  ;;  %v2355_v10 = vld [vmem:[%s4229_s9 + $0x90] sm:$0xf0] }
 0x1fd   : > { %1459 = vmatpush.bf16.msrb.mxu2 %v2338_v28 }
 0x201   : > { %v1016_v61 = vpop.f32.mrf.mxu2  ;;  %1460 = vmatpush.bf16.msrb.mxu2 %v2322_v49 }
 0x202   : > { %v3361_v11 = vadd.f32 %v2586_v14, %v1016_v61  ;;  %v2361_v61 = vld [vmem:[%s4229_s9 + $0x88] sm:$0xf] }
 0x204   : > { %1036 = vadd.xlane.f32.xlu0 %v3361_v11  ;;  %v1063_v12 = vmul.f32 %v3361_v11, %v3361_v11 }
 0x205   : > { %1461 = vmatpush.bf16.msrb.mxu2 %v2306_v39 }
 0x206   : > { %1075 = vadd.xlane.f32.xlu2 %v1063_v12  ;;  %v2445_v12 = vld [vmem:[%s4229_s9 + $0x94] sm:$0xf0] }
 0x209   : > { %v1018_v33 = vpop.f32.mrf.mxu2 }
 0x20a   : > { %v3366_v36 = vadd.f32 %v2586_v14, %v1018_v33  ;;  %v2358_v33 = vor.u32 %v2442_v59, %v2355_v10 }
 0x20c   : > { %1038 = vadd.xlane.f32.xlu1 %v3366_v36  ;;  %v1064_v13 = vmul.f32 %v3366_v36, %v3366_v36  ;;  %1487 = vmatpush.bf16.msrb.mxu3 %v2358_v33  ;;  %v2426_v33 = vld [vmem:[%s4229_s9 + $0x4] sm:$0xf] }
 0x20e   : > { %1077 = vadd.xlane.f32.xlu0 %v1064_v13  ;;  %v2362_v13 = vor.u32 %v2445_v12, %v2361_v61  ;;  %v2289_v61 = vld [vmem:[%s4229_s9] sm:$0xf]  ;;  %v2428_v12 = vld [vmem:[%s4229_s9 + $0xc] sm:$0xf0] }
 0x20f   : > { %v2290_v25 = vor.u32 %v2428_v12, %v2289_v61 }
 0x210   : > { %1516 = vmatpush.bf16.msrb.mxu0 %v2362_v13 }
 0x211   : > { %v1021_v16 = vpop.f32.mrf.mxu2  ;;  %1462 = vmatpush.bf16.msrb.mxu2 %v2290_v25 }
 0x212   : > { %v3371_v20 = vadd.f32 %v2586_v14, %v1021_v16  ;;  %v2443_v16 = vld [vmem:[%s4229_s9 + $0x8c] sm:$0xf] }
 0x214   : > { %1040 = vadd.xlane.f32.xlu1 %v3371_v20  ;;  %v1065_v17 = vmul.f32 %v3371_v20, %v3371_v20  ;;  %1517 = vmatpush.bf16.msrb.mxu0 %v2346_v56 }
 0x216   : > { %1079 = vadd.xlane.f32.xlu0 %v1065_v17  ;;  %v2363_v17 = vld [vmem:[%s4229_s9 + $0x98] sm:$0xf0] }
 0x218   : > { %1518 = vmatpush.bf16.msrb.mxu0 %v2330_v52 }
 0x219   : > { %v1023_v18 = vpop.f32.mrf.mxu2 }
 0x21a   : > { %v3376_v21 = vadd.f32 %v2586_v14, %v1023_v18  ;;  %v2447_v14 = vld [vmem:[%s4229_s9 + $0xac] sm:$0xf]  ;;  %v2366_v18 = vor.u32 %v2443_v16, %v2363_v17  ;;  %v2291_v16 = vld [vmem:[%s4229_s9 + $0x10] sm:$0xf0]  ;;  %v2297_v17 = vld [vmem:[%s4229_s9 + $0x8] sm:$0xf] }
 0x21b   : > { %v2382_v62 = vor.u32 %v2447_v14, %v2379_v44  ;;  %v2310_v14 = vor.u32 %v2430_v60, %v2307_v30  ;;  %v2433_v44 = vld [vmem:[%s4229_s9 + $0x34] sm:$0xf0] }
 0x21c   : > { %1042 = vadd.xlane.f32.xlu2 %v3376_v21  ;;  %v1066_v22 = vmul.f32 %v3376_v21, %v3376_v21  ;;  %v2314_v59 = vor.u32 %v2433_v44, %v2313_v0  ;;  %v3608_v44 = vld [vmem:[#allocation9] ss:$0 sm:$0xff] }
 0x21d   : > { %1544 = vmatpush.bf16.msrb.mxu1 %v2382_v62  ;;  %v2431_v62 = vld [vmem:[%s4229_s9 + $0x2c] sm:$0xf] }
 0x21e   : > { %1081 = vadd.xlane.f32.xlu1 %v1066_v22  ;;  %v3484_v22 = vsel %vm1049_vm4, %v3381_v24, %v1048_v58  ;;  %v2339_v24 = vld [vmem:[%s4229_s9 + $0x70] sm:$0xf0]  ;;  %v2315_v58 = vld [vmem:[%s4229_s9 + $0x38] sm:$0xf0]  ;;  %1519 = vmatpush.bf16.msrb.mxu0 %v2314_v59 }
 0x21f   : > { %v2342_v37 = vor.u32 %v2438_v27, %v2339_v24  ;;  %v2318_v6 = vor.u32 %v2431_v62, %v2315_v58  ;;  %v2294_v27 = vor.u32 %v2426_v33, %v2291_v16  ;;  %v2427_v24 = vld [vmem:[%s4229_s9 + $0xc] sm:$0xf]  ;;  %v3616_v33 = vld [vmem:[#allocation10] ss:$0 sm:$0xff] }
 0x220   : > { %v2302_v9 = vor.u32 %v2427_v24, %v2299_v29 }
 0x221   : > { %1545 = vmatpush.bf16.msrb.mxu1 %v2366_v18  ;;  %1488 = vmatpush.bf16.msrb.mxu3 %v2342_v37  ;;  %v2429_v18 = vld [vmem:[%s4229_s9 + $0x14] sm:$0xf0] }
 0x222   : > { %v2298_v28 = vor.u32 %v2429_v18, %v2297_v17 }
 0x224   : > { %1520 = vmatpush.bf16.msrb.mxu0 %v2298_v28 }
 0x225   : > { %1546 = vmatpush.bf16.msrb.mxu1 %v2350_v41  ;;  %1489 = vmatpush.bf16.msrb.mxu3 %v2326_v51 }
 0x229   : > { %1547 = vmatpush.bf16.msrb.mxu1 %v2334_v26  ;;  %1490 = vmatpush.bf16.msrb.mxu3 %v2310_v14 }
 0x22d   : > { %1548 = vmatpush.bf16.msrb.mxu1 %v2318_v6  ;;  %1491 = vmatpush.bf16.msrb.mxu3 %v2294_v27 }
 0x231   : > { %1549 = vmatpush.bf16.msrb.mxu1 %v2302_v9 }
 0x254   : > { %v1029_v32 = vpop.xlane.xlu1 %1028 }
 0x255   : > { %v3511_v40 = vmul.f32 %v3484_v22, %v1029_v32 }
 0x256   : > { %v1068_v42 = vpop.xlane.xlu0 %1067 }
 0x257   : > { %v1091_v47 = vmul.f32 %v3511_v40, %v3511_v40  ;;  %v1083_v48 = vmul.f32 %v1068_v42, %v3484_v22  ;;  %v1115_v39 = vsub.f32 %v3341_v34, %v3511_v40 }
 0x259   : > { %v1099_v55 = vsub.f32 %v1083_v48, %v1091_v47 }
 0x25b   : > { %v1107_v63 = vmax.f32 %v1099_v55, 0.0 }
 0x25c   : > { %v1031_v1 = vpop.xlane.xlu2 %1030 }
 0x25d   : > { %v1123_v8 = vadd.f32 1e-06, %v1107_v63  ;;  %v3565_v4 = vmul.f32 %v3484_v22, %v1031_v1 }
 0x25e   : > { %v1070_v10 = vpop.xlane.xlu1 %1069 }
 0x25f   : > { %2609 = vrsqrt.f32 %v1123_v8  ;;  %v1092_v13 = vmul.f32 %v3565_v4, %v3565_v4  ;;  %v1084_v23 = vmul.f32 %v1070_v10, %v3484_v22  ;;  %vm1137_vm7 = vweird.f32 %v1123_v8 }
 0x260   : > { %v1116_v6 = vsub.f32 %v3346_v2, %v3565_v4 }
 0x261   : > { %v1100_v32 = vsub.f32 %v1084_v23, %v1092_v13 }
 0x263   : > { %v1108_v37 = vmax.f32 %v1100_v32, 0.0 }
 0x264   : > { %v1033_v56 = vpop.xlane.xlu2 %1032 }
 0x265   : > { %v2610_v38 = vpop.eup %2609  ;;  %v3595_v35 = vmul.f32 %v3484_v22, %v1033_v56  ;;  %v1124_v42 = vadd.f32 1e-06, %v1108_v37 }
 0x266   : > { %v1132_v41 = vmul.f32 %v2610_v38, %v1123_v8  ;;  %v1072_v43 = vpop.xlane.xlu1 %1071  ;;  %vm1138_vm6 = vweird.f32 %v2610_v38 }
 0x267   : > { %v1093_v45 = vmul.f32 %v3595_v35, %v3595_v35  ;;  %v1085_v46 = vmul.f32 %v1072_v43, %v3484_v22  ;;  %2611 = vrsqrt.f32 %v1124_v42  ;;  %vm1139_vm8 = vmor %vm1137_vm7, %vm1138_vm6  ;;  %vm1147_vm10 = vweird.f32 %v1124_v42 }
 0x268   : > { %v1133_v47 = vmul.f32 %v2610_v38, %v1132_v41 }
 0x269   : > { %v1101_v48 = vsub.f32 %v1085_v46, %v1093_v45 }
 0x26a   : > { %v1134_v49 = vmul.f32 0.5, %v1133_v47 }
 0x26b   : > { %v1109_v31 = vmax.f32 %v1101_v48, 0.0 }
 0x26c   : > { %v1135_v15 = vsub.f32 1.5, %v1134_v49  ;;  %v1035_v50 = vpop.xlane.xlu0 %1034 }
 0x26d   : > { %v1125_v51 = vadd.f32 1e-06, %v1109_v31  ;;  %v3601_v52 = vmul.f32 %v3484_v22, %v1035_v50  ;;  %v2612_v53 = vpop.eup %2611 }
 0x26e   : > { %v1136_v54 = vmul.f32 %v2610_v38, %v1135_v15  ;;  %v1074_v55 = vpop.xlane.xlu2 %1073  ;;  %v1142_v26 = vmul.f32 %v2612_v53, %v1124_v42  ;;  %vm1148_vm9 = vweird.f32 %v2612_v53  ;;  %v1117_v15 = vsub.f32 %v3351_v5, %v3595_v35 }
 0x26f   : > { %2613 = vrsqrt.f32 %v1125_v51  ;;  %v1094_v19 = vmul.f32 %v3601_v52, %v3601_v52  ;;  %v1086_v57 = vmul.f32 %v1074_v55, %v3484_v22  ;;  %vm1149_vm11 = vmor %vm1147_vm10, %vm1148_vm9  ;;  %vm1157_vm13 = vweird.f32 %v1125_v51 }
 0x270   : > { %v1140_v60 = vsel %vm1139_vm8, %v2610_v38, %v1136_v54  ;;  %v1143_v63 = vmul.f32 %v2612_v53, %v1142_v26 }
 0x271   : > { %v1102_v30 = vsub.f32 %v1086_v57, %v1094_v19  ;;  %v1211_v1 = vmul.f32 %v1140_v60, %v1115_v39  ;;  %v1118_v57 = vsub.f32 %v3356_v7, %v3601_v52 }
 0x272   : > { %v1144_v0 = vmul.f32 0.5, %v1143_v63 }
 0x273   : > { %v1110_v14 = vmax.f32 %v1102_v30, 0.0  ;;  %v1222_v40 = vmul.f32 %v3608_v44, %v1211_v1 }
 0x274   : > { %v1145_v58 = vsub.f32 1.5, %v1144_v0 }
 0x275   : > { %v2614_v62 = vpop.eup %2613  ;;  %v1126_v59 = vadd.f32 1e-06, %v1110_v14  ;;  %v1233_v27 = vadd.f32 %v3616_v33, %v1222_v40 }
 0x276   : > { %v1152_v8 = vmul.f32 %v2614_v62, %v1125_v51  ;;  %v1146_v10 = vmul.f32 %v2612_v53, %v1145_v58  ;;  %vm1158_vm12 = vweird.f32 %v2614_v62 }
 0x277   : > { %v1037_v61 = vpop.xlane.xlu0 %1036  ;;  %2615 = vrsqrt.f32 %v1126_v59  ;;  %v1241_v41 = vmax.f32 %v1233_v27, 0.0  ;;  %vm1159_vm14 = vmor %vm1157_vm13, %vm1158_vm12  ;;  %vm1167_vm3 = vweird.f32 %v1126_v59 }
 0x278   : > { %v1153_v12 = vmul.f32 %v2614_v62, %v1152_v8  ;;  %v3613_v34 = vmul.f32 %v3484_v22, %v1037_v61  ;;  %v1150_v13 = vsel %vm1149_vm11, %v2612_v53, %v1146_v10 }
 0x279   : > { %v1076_v16 = vpop.xlane.xlu2 %1075  ;;  %v1212_v17 = vmul.f32 %v1150_v13, %v1116_v6 }
 0x27a   : > { %v1154_v18 = vmul.f32 0.5, %v1153_v12  ;;  %v1095_v2 = vmul.f32 %v3613_v34, %v3613_v34  ;;  %v1087_v4 = vmul.f32 %v1076_v16, %v3484_v22 }
 0x27b   : > { %v1223_v25 = vmul.f32 %v3608_v44, %v1212_v17 }
 0x27c   : > { %v1155_v23 = vsub.f32 1.5, %v1154_v18  ;;  %v1103_v28 = vsub.f32 %v1087_v4, %v1095_v2 }
 0x27d   : > { %v2616_v24 = vpop.eup %2615  ;;  %v1234_v9 = vadd.f32 %v3616_v33, %v1223_v25 }
 0x27e   : > { %v1156_v29 = vmul.f32 %v2614_v62, %v1155_v23  ;;  %v1162_v32 = vmul.f32 %v2616_v24, %v1126_v59  ;;  %v1111_v37 = vmax.f32 %v1103_v28, 0.0  ;;  %vm1168_vm15 = vweird.f32 %v2616_v24 }
 0x27f   : > { %v1039_v56 = vpop.xlane.xlu1 %1038  ;;  %v1242_v42 = vmax.f32 %v1234_v9, 0.0  ;;  %vm1169_vm5 = vmor %vm1167_vm3, %vm1168_vm15 }
 0x280   : > { %v3625_v38 = vmul.f32 %v3484_v22, %v1039_v56  ;;  %v1163_v43 = vmul.f32 %v2616_v24, %v1162_v32  ;;  %v1127_v45 = vadd.f32 1e-06, %v1111_v37  ;;  %v1160_v47 = vsel %vm1159_vm14, %v2614_v62, %v1156_v29 }
 0x281   : > { %v1078_v46 = vpop.xlane.xlu0 %1077  ;;  %v1249_v31 = vpack.c.bf16 %v1242_v42, %v1241_v41  ;;  %v1213_v53 = vmul.f32 %v1160_v47, %v1117_v15  ;;  %v1119_v29 = vsub.f32 %v3361_v11, %v3613_v34 }
 0x282   : > { %v1096_v48 = vmul.f32 %v3625_v38, %v3625_v38  ;;  %v1088_v49 = vmul.f32 %v1078_v46, %v3484_v22  ;;  %v1164_v50 = vmul.f32 0.5, %v1163_v43  ;;  %2617 = vrsqrt.f32 %v1127_v45 }
 0x283   : > { %1463 = vmatmul.bf16.vlgmr.msrb.gmra.mxu2 %v1249_v31  ;;  %1492 = vmatmul.bf16.vlgmr.msrb.gmra.mxu3 %v1249_v31  ;;  %v1224_v30 = vmul.f32 %v3608_v44, %v1213_v53  ;;  %vm1177_vm6 = vweird.f32 %v1127_v45  ;;  %v1120_v46 = vsub.f32 %v3366_v36, %v3625_v38 }
 0x284   : > { %v1104_v51 = vsub.f32 %v1088_v49, %v1096_v48  ;;  %v1165_v54 = vsub.f32 1.5, %v1164_v50  ;;  %1521 = vmatmul.bf16.vlgmr.msrb.gmra.mxu0 %v1249_v31  ;;  %1550 = vmatmul.bf16.vlgmr.msrb.gmra.mxu1 %v1249_v31 }
 0x285   : > { %v1235_v8 = vadd.f32 %v3616_v33, %v1224_v30 }
 0x286   : > { %v1112_v55 = vmax.f32 %v1104_v51, 0.0  ;;  %v1166_v26 = vmul.f32 %v2616_v24, %v1165_v54 }
 0x287   : > { %v1041_v19 = vpop.xlane.xlu1 %1040  ;;  %v1243_v4 = vmax.f32 %v1235_v8, 0.0 }
 0x288   : > { %v1128_v60 = vadd.f32 1e-06, %v1112_v55  ;;  %v3635_v5 = vmul.f32 %v3484_v22, %v1041_v19  ;;  %v2618_v35 = vpop.eup %2617  ;;  %v1170_v63 = vsel %vm1169_vm5, %v2616_v24, %v1166_v26 }
 0x289   : > { %v1080_v39 = vpop.xlane.xlu0 %1079  ;;  %v1214_v0 = vmul.f32 %v1170_v63, %v1118_v57  ;;  %v1172_v1 = vmul.f32 %v2618_v35, %v1127_v45  ;;  %vm1178_vm4 = vweird.f32 %v2618_v35 }
 0x28a   : > { %2619 = vrsqrt.f32 %v1128_v60  ;;  %v1097_v14 = vmul.f32 %v3635_v5, %v3635_v5  ;;  %v1089_v62 = vmul.f32 %v1080_v39, %v3484_v22  ;;  %vm1179_vm7 = vmor %vm1177_vm6, %vm1178_vm4  ;;  %vm1187_vm9 = vweird.f32 %v1128_v60 }
 0x28b   : > { %v1173_v58 = vmul.f32 %v2618_v35, %v1172_v1  ;;  %v1225_v7 = vmul.f32 %v3608_v44, %v1214_v0  ;;  %v1121_v57 = vsub.f32 %v3371_v20, %v3635_v5 }
 0x28c   : > { %v1105_v52 = vsub.f32 %v1089_v62, %v1097_v14 }
 0x28d   : > { %v1174_v59 = vmul.f32 0.5, %v1173_v58  ;;  %v1236_v6 = vadd.f32 %v3616_v33, %v1225_v7 }
 0x28e   : > { %v1113_v10 = vmax.f32 %v1105_v52, 0.0 }
 0x28f   : > { %v1043_v61 = vpop.xlane.xlu2 %1042  ;;  %v1175_v40 = vsub.f32 1.5, %v1174_v59  ;;  %v1244_v16 = vmax.f32 %v1236_v6, 0.0 }
 0x290   : > { %v2620_v12 = vpop.eup %2619  ;;  %v3645_v13 = vmul.f32 %v3484_v22, %v1043_v61  ;;  %v1129_v18 = vadd.f32 1e-06, %v1113_v10  ;;  %v1285_v10 = vld [vmem:[#allocation12] sm:$0xf] }
 0x291   : > { %v1182_v17 = vmul.f32 %v2620_v12, %v1128_v60  ;;  %v1082_v2 = vpop.xlane.xlu1 %1081  ;;  %v1176_v23 = vmul.f32 %v2618_v35, %v1175_v40  ;;  %v1250_v24 = vpack.c.bf16 %v1244_v16, %v1243_v4  ;;  %vm1188_vm8 = vweird.f32 %v2620_v12 }
 0x292   : > { %v1098_v25 = vmul.f32 %v3645_v13, %v3645_v13  ;;  %v1090_v27 = vmul.f32 %v1082_v2, %v3484_v22  ;;  %2621 = vrsqrt.f32 %v1129_v18  ;;  %vm1189_vm10 = vmor %vm1187_vm9, %vm1188_vm8  ;;  %vm1197_vm12 = vweird.f32 %v1129_v18 }
 0x293   : > { %v1183_v28 = vmul.f32 %v2620_v12, %v1182_v17  ;;  %v1180_v9 = vsel %vm1179_vm7, %v2618_v35, %v1176_v23  ;;  %1468 = vmatmul.bf16.gmra.mxu2 %v1250_v24  ;;  %1497 = vmatmul.bf16.gmra.mxu3 %v1250_v24  ;;  %v1122_v1 = vsub.f32 %v3376_v21, %v3645_v13  ;;  %v3666_v61 = vperm.slane %v1285_v10, 0 }
 0x294   : > { %v1106_v32 = vsub.f32 %v1090_v27, %v1098_v25  ;;  %v1215_v56 = vmul.f32 %v1180_v9, %v1119_v29  ;;  %1526 = vmatmul.bf16.gmra.mxu0 %v1250_v24  ;;  %1555 = vmatmul.bf16.gmra.mxu1 %v1250_v24  ;;  %v3670_v40 = vperm.slane %v1285_v10, 2  ;;  %v3672_v16 = vperm.slane %v1285_v10, 3 }
 0x295   : > { %v1184_v37 = vmul.f32 0.5, %v1183_v28 }
 0x296   : > { %v1114_v41 = vmax.f32 %v1106_v32, 0.0  ;;  %v1226_v34 = vmul.f32 %v3608_v44, %v1215_v56 }
 0x297   : > { %v1185_v42 = vsub.f32 1.5, %v1184_v37 }
 0x298   : > { %v1130_v43 = vadd.f32 1e-06, %v1114_v41  ;;  %v2622_v22 = vpop.eup %2621  ;;  %v1237_v50 = vadd.f32 %v3616_v33, %v1226_v34 }
 0x299   : > { %v1186_v45 = vmul.f32 %v2620_v12, %v1185_v42  ;;  %v1192_v11 = vmul.f32 %v2622_v22, %v1129_v18  ;;  %vm1198_vm11 = vweird.f32 %v2622_v22 }
 0x29a   : > { %2623 = vrsqrt.f32 %v1130_v43  ;;  %v1245_v38 = vmax.f32 %v1237_v50, 0.0  ;;  %vm1199_vm13 = vmor %vm1197_vm12, %vm1198_vm11  ;;  %vm1207_vm15 = vweird.f32 %v1130_v43 }
 0x29b   : > { %v1190_v47 = vsel %vm1189_vm10, %v2620_v12, %v1186_v45  ;;  %v1193_v49 = vmul.f32 %v2622_v22, %v1192_v11  ;;  %v3668_v12 = vperm.slane %v1285_v10, 1 }
 0x29c   : > { %v1216_v48 = vmul.f32 %v1190_v47, %v1120_v46 }
 0x29d   : > { %v1194_v31 = vmul.f32 0.5, %v1193_v49 }
 0x29e   : > { %v1227_v15 = vmul.f32 %v3608_v44, %v1216_v48 }
 0x29f   : > { %v1195_v53 = vsub.f32 1.5, %v1194_v31 }
 0x2a0   : > { %v2624_v51 = vpop.eup %2623  ;;  %v1238_v54 = vadd.f32 %v3616_v33, %v1227_v15 }
 0x2a1   : > { %v1202_v55 = vmul.f32 %v2624_v51, %v1130_v43  ;;  %v1196_v36 = vmul.f32 %v2622_v22, %v1195_v53  ;;  %vm1208_vm14 = vweird.f32 %v2624_v51 }
 0x2a2   : > { %v1246_v26 = vmax.f32 %v1238_v54, 0.0  ;;  %vm1209_vm3 = vmor %vm1207_vm15, %vm1208_vm14 }
 0x2a3   : > { %v1203_v19 = vmul.f32 %v2624_v51, %v1202_v55  ;;  %v1200_v60 = vsel %vm1199_vm13, %v2622_v22, %v1196_v36 }
 0x2a4   : > { %v1251_v35 = vpack.c.bf16 %v1246_v26, %v1245_v38  ;;  %v1217_v39 = vmul.f32 %v1200_v60, %v1121_v57 }
 0x2a5   : > { %v1204_v63 = vmul.f32 0.5, %v1203_v19 }
 0x2a6   : > { %1473 = vmatmul.bf16.gmra.mxu2 %v1251_v35  ;;  %1502 = vmatmul.bf16.gmra.mxu3 %v1251_v35  ;;  %v1228_v14 = vmul.f32 %v3608_v44, %v1217_v39 }
 0x2a7   : > { %v1205_v30 = vsub.f32 1.5, %v1204_v63  ;;  %1531 = vmatmul.bf16.gmra.mxu0 %v1251_v35  ;;  %1560 = vmatmul.bf16.gmra.mxu1 %v1251_v35 }
 0x2a8   : > { %v1239_v58 = vadd.f32 %v3616_v33, %v1228_v14 }
 0x2a9   : > { %v1206_v0 = vmul.f32 %v2624_v51, %v1205_v30 }
 0x2aa   : > { %v1247_v52 = vmax.f32 %v1239_v58, 0.0 }
 0x2ab   : > { %v1210_v62 = vsel %vm1209_vm3, %v2624_v51, %v1206_v0 }
 0x2ac   : > { %v1218_v20 = vmul.f32 %v1210_v62, %v1122_v1 }
 0x2ae   : > { %v1229_v5 = vmul.f32 %v3608_v44, %v1218_v20 }
 0x2b0   : > { %v1240_v7 = vadd.f32 %v3616_v33, %v1229_v5 }
 0x2b2   : > { %v1248_v8 = vmax.f32 %v1240_v7, 0.0 }
 0x2b4   : > { %v1252_v59 = vpack.c.bf16 %v1248_v8, %v1247_v52 }
 0x2b6   : > { %1478 = vmatmul.bf16.gmra.mxu2 %v1252_v59  ;;  %1507 = vmatmul.bf16.gmra.mxu3 %v1252_v59 }
 0x2b7   : > { %1536 = vmatmul.bf16.gmra.mxu0 %v1252_v59  ;;  %1565 = vmatmul.bf16.gmra.mxu1 %v1252_v59 }
 0x301   : > { %v1522_v6 = vpop.f32.mrf.mxu0  ;;  %v1551_v21 = vpop.f32.mrf.mxu1 }
 0x302   : > { %v3681_v18 = vadd.f32 %v1522_v6, %v3670_v40  ;;  %v3690_v28 = vadd.f32 %v1551_v21, %v3672_v16 }
 0x304   : > { %v1630_v56 = vmul.f32 %v3681_v18, %v3681_v18  ;;  %v1631_v31 = vmul.f32 %v3690_v28, %v3690_v28 }
 0x306   : > { %v1464_v44 = vpop.f32.mrf.mxu2  ;;  %v1493_v13 = vpop.f32.mrf.mxu3 }
 0x307   : > { %v3675_v33 = vadd.f32 %v1464_v44, %v3666_v61  ;;  %v3678_v17 = vadd.f32 %v1493_v13, %v3668_v12 }
 0x309   : > { %v1628_v2 = vmul.f32 %v3675_v33, %v3675_v33  ;;  %v1573_v4 = vadd.f32 %v3678_v17, %v3675_v33  ;;  %v1629_v23 = vmul.f32 %v3678_v17, %v3678_v17  ;;  %v1524_v25 = vpop.f32.mrf.mxu0  ;;  %v1553_v27 = vpop.f32.mrf.mxu1 }
 0x30a   : > { %v3703_v43 = vadd.f32 %v1524_v25, %v3670_v40  ;;  %v3712_v48 = vadd.f32 %v1553_v27, %v3672_v16 }
 0x30b   : > { %v1574_v24 = vadd.f32 %v1573_v4, %v3681_v18  ;;  %v1660_v9 = vadd.f32 %v1629_v23, %v1628_v2 }
 0x30c   : > { %v1634_v53 = vmul.f32 %v3703_v43, %v3703_v43  ;;  %v1635_v0 = vmul.f32 %v3712_v48, %v3712_v48 }
 0x30d   : > { %v1575_v29 = vadd.f32 %v1574_v24, %v3690_v28  ;;  %v1661_v11 = vadd.f32 %v1660_v9, %v1630_v56 }
 0x30e   : > { %v1466_v32 = vpop.f32.mrf.mxu2  ;;  %v1495_v37 = vpop.f32.mrf.mxu3 }
 0x30f   : > { %v3697_v41 = vadd.f32 %v1466_v32, %v3666_v61  ;;  %v3700_v42 = vadd.f32 %v1495_v37, %v3668_v12  ;;  %1576 = vadd.xlane.f32.xlu2 %v1575_v29  ;;  %v1662_v50 = vadd.f32 %v1661_v11, %v1631_v31 }
 0x311   : > { %v1632_v22 = vmul.f32 %v3697_v41, %v3697_v41  ;;  %v1578_v45 = vadd.f32 %v3700_v42, %v3697_v41  ;;  %v1633_v46 = vmul.f32 %v3700_v42, %v3700_v42  ;;  %v1527_v34 = vpop.f32.mrf.mxu0  ;;  %v1556_v47 = vpop.f32.mrf.mxu1 }
 0x312   : > { %v3721_v36 = vadd.f32 %v1527_v34, %v3670_v40  ;;  %v3730_v57 = vadd.f32 %v1556_v47, %v3672_v16 }
 0x313   : > { %v1579_v49 = vadd.f32 %v1578_v45, %v3703_v43  ;;  %v1665_v51 = vadd.f32 %v1633_v46, %v1632_v22 }
 0x314   : > { %v1638_v1 = vmul.f32 %v3721_v36, %v3721_v36  ;;  %v1639_v58 = vmul.f32 %v3730_v57, %v3730_v57 }
 0x315   : > { %v1580_v15 = vadd.f32 %v1579_v49, %v3712_v48  ;;  %v1666_v19 = vadd.f32 %v1665_v51, %v1634_v53 }
 0x316   : > { %v1469_v54 = vpop.f32.mrf.mxu2  ;;  %v1498_v55 = vpop.f32.mrf.mxu3 }
 0x317   : > { %1581 = vadd.xlane.f32.xlu0 %v1580_v15  ;;  %1663 = vadd.xlane.f32.xlu2 %v1662_v50  ;;  %v3724_v38 = vadd.f32 %v1469_v54, %v3666_v61  ;;  %v3727_v26 = vadd.f32 %v1498_v55, %v3668_v12  ;;  %v1667_v20 = vadd.f32 %v1666_v19, %v1635_v0 }
 0x319   : > { %v1636_v60 = vmul.f32 %v3724_v38, %v3724_v38  ;;  %v1583_v35 = vadd.f32 %v3727_v26, %v3724_v38  ;;  %v1637_v63 = vmul.f32 %v3727_v26, %v3727_v26  ;;  %v1529_v39 = vpop.f32.mrf.mxu0  ;;  %v1558_v30 = vpop.f32.mrf.mxu1 }
 0x31a   : > { %v3753_v10 = vadd.f32 %v1529_v39, %v3670_v40  ;;  %v3762_v25 = vadd.f32 %v1558_v30, %v3672_v16 }
 0x31b   : > { %v1584_v14 = vadd.f32 %v1583_v35, %v3721_v36  ;;  %v1670_v62 = vadd.f32 %v1637_v63, %v1636_v60 }
 0x31c   : > { %v1642_v9 = vmul.f32 %v3753_v10, %v3753_v10  ;;  %v1643_v15 = vmul.f32 %v3762_v25, %v3762_v25 }
 0x31d   : > { %v1585_v5 = vadd.f32 %v1584_v14, %v3730_v57  ;;  %v1671_v7 = vadd.f32 %v1670_v62, %v1638_v1 }
 0x31e   : > { %v1471_v52 = vpop.f32.mrf.mxu2  ;;  %v1500_v8 = vpop.f32.mrf.mxu3 }
 0x31f   : > { %1668 = vadd.xlane.f32.xlu0 %v1667_v20  ;;  %v3747_v59 = vadd.f32 %v1471_v52, %v3666_v61  ;;  %v3750_v6 = vadd.f32 %v1500_v8, %v3668_v12  ;;  %1586 = vadd.xlane.f32.xlu1 %v1585_v5  ;;  %v1672_v21 = vadd.f32 %v1671_v7, %v1639_v58 }
 0x321   : > { %v1640_v44 = vmul.f32 %v3747_v59, %v3747_v59  ;;  %v1588_v13 = vadd.f32 %v3750_v6, %v3747_v59  ;;  %v1641_v2 = vmul.f32 %v3750_v6, %v3750_v6  ;;  %1673 = vadd.xlane.f32.xlu2 %v1672_v21 }
 0x323   : > { %v1589_v27 = vadd.f32 %v1588_v13, %v3753_v10  ;;  %v1675_v29 = vadd.f32 %v1641_v2, %v1640_v44 }
 0x324   : > { %v1532_v4 = vpop.f32.mrf.mxu0  ;;  %v1561_v23 = vpop.f32.mrf.mxu1 }
 0x325   : > { %v1590_v24 = vadd.f32 %v1589_v27, %v3762_v25  ;;  %v1676_v45 = vadd.f32 %v1675_v29, %v1642_v9  ;;  %v3775_v46 = vadd.f32 %v1532_v4, %v3670_v40  ;;  %v3786_v50 = vadd.f32 %v1561_v23, %v3672_v16 }
 0x327   : > { %1591 = vadd.xlane.f32.xlu1 %v1590_v24  ;;  %v1677_v53 = vadd.f32 %v1676_v45, %v1643_v15  ;;  %v1646_v35 = vmul.f32 %v3775_v46, %v3775_v46  ;;  %v1647_v52 = vmul.f32 %v3786_v50, %v3786_v50 }
 0x329   : > { %v1474_v32 = vpop.f32.mrf.mxu2  ;;  %v1503_v37 = vpop.f32.mrf.mxu3 }
 0x32a   : > { %v3769_v56 = vadd.f32 %v1474_v32, %v3666_v61  ;;  %v3772_v22 = vadd.f32 %v1503_v37, %v3668_v12 }
 0x32c   : > { %v1644_v11 = vmul.f32 %v3769_v56, %v3769_v56  ;;  %v1593_v34 = vadd.f32 %v3772_v22, %v3769_v56  ;;  %v1645_v47 = vmul.f32 %v3772_v22, %v3772_v22  ;;  %v1534_v49 = vpop.f32.mrf.mxu0  ;;  %v1563_v31 = vpop.f32.mrf.mxu1 }
 0x32d   : > { %v3799_v30 = vadd.f32 %v1534_v49, %v3670_v40  ;;  %v3808_v5 = vadd.f32 %v1563_v31, %v3672_v16 }
 0x32e   : > { %v1594_v51 = vadd.f32 %v1593_v34, %v3775_v46  ;;  %v1680_v55 = vadd.f32 %v1645_v47, %v1644_v11 }
 0x32f   : > { %1678 = vadd.xlane.f32.xlu1 %v1677_v53  ;;  %v1650_v4 = vmul.f32 %v3799_v30, %v3799_v30  ;;  %v1651_v11 = vmul.f32 %v3808_v5, %v3808_v5 }
 0x330   : > { %v1595_v54 = vadd.f32 %v1594_v51, %v3786_v50  ;;  %v1681_v62 = vadd.f32 %v1680_v55, %v1646_v35 }
 0x331   : > { %v1476_v19 = vpop.f32.mrf.mxu2  ;;  %v1505_v60 = vpop.f32.mrf.mxu3 }
 0x332   : > { %v3793_v63 = vadd.f32 %v1476_v19, %v3666_v61  ;;  %v3796_v39 = vadd.f32 %v1505_v60, %v3668_v12  ;;  %1596 = vadd.xlane.f32.xlu0 %v1595_v54  ;;  %v1682_v21 = vadd.f32 %v1681_v62, %v1647_v52 }
 0x334   : > { %v1648_v0 = vmul.f32 %v3793_v63, %v3793_v63  ;;  %v1598_v1 = vadd.f32 %v3796_v39, %v3793_v63  ;;  %v1649_v14 = vmul.f32 %v3796_v39, %v3796_v39  ;;  %v1537_v20 = vpop.f32.mrf.mxu0  ;;  %v1566_v58 = vpop.f32.mrf.mxu1 }
 0x335   : > { %v3823_v24 = vadd.f32 %v1537_v20, %v3670_v40  ;;  %v3832_v45 = vadd.f32 %v1566_v58, %v3672_v16 }
 0x336   : > { %v1599_v7 = vadd.f32 %v1598_v1, %v3799_v30  ;;  %v1685_v44 = vadd.f32 %v1649_v14, %v1648_v0 }
 0x337   : > { %v1654_v53 = vmul.f32 %v3823_v24, %v3823_v24  ;;  %v1655_v20 = vmul.f32 %v3832_v45, %v3832_v45 }
 0x338   : > { %v1600_v8 = vadd.f32 %v1599_v7, %v3808_v5  ;;  %v1686_v37 = vadd.f32 %v1685_v44, %v1650_v4  ;;  %v2970_v44 = vmov 512.0  }
 0x339   : > { %v1479_v13 = vpop.f32.mrf.mxu2  ;;  %v1508_v2 = vpop.f32.mrf.mxu3  ;;  %2625 = vrcp.f32 %v2970_v44 }
 0x33a   : > { %v3817_v23 = vadd.f32 %v1479_v13, %v3666_v61  ;;  %v3820_v27 = vadd.f32 %v1508_v2, %v3668_v12  ;;  %1601 = vadd.xlane.f32.xlu2 %v1600_v8  ;;  %1683 = vadd.xlane.f32.xlu0 %v1682_v21  ;;  %v1687_v31 = vadd.f32 %v1686_v37, %v1651_v11 }
 0x33c   : > { %v1652_v29 = vmul.f32 %v3817_v23, %v3817_v23  ;;  %v1603_v9 = vadd.f32 %v3820_v27, %v3817_v23  ;;  %v1653_v32 = vmul.f32 %v3820_v27, %v3820_v27  ;;  %v1539_v47 = vpop.f32.mrf.mxu0  ;;  %v1568_v49 = vpop.f32.mrf.mxu1 }
 0x33d   : > { %v3841_v19 = vadd.f32 %v1539_v47, %v3670_v40  ;;  %v3850_v0 = vadd.f32 %v1568_v49, %v3672_v16 }
 0x33e   : > { %v1604_v34 = vadd.f32 %v1603_v9, %v3823_v24  ;;  %v1690_v51 = vadd.f32 %v1653_v32, %v1652_v29 }
 0x33f   : > { %4253 = vst [vmem:[#allocation22_spill] sm:$0xff] %v3841_v19  ;;  %v1659_v52 = vmul.f32 %v3850_v0, %v3850_v0  ;;  %v2626_v13 = vpop.eup %2625 }
 0x340   : > { %v1605_v15 = vadd.f32 %v1604_v34, %v3832_v45  ;;  %4256 = vst [vmem:[#allocation25_spill] sm:$0xff] %v3850_v0  ;;  %v1691_v62 = vadd.f32 %v1690_v51, %v1654_v53  ;;  %v1614_v2 = vmul.f32 512.0, %v2626_v13  ;;  %vm1618_vm5 = vweird.f32 %v2626_v13 }
 0x341   : > { %v1481_v54 = vpop.f32.mrf.mxu2  ;;  %v1510_v55 = vpop.f32.mrf.mxu3 }
 0x342   : > { %v3844_v60 = vadd.f32 %v1481_v54, %v3666_v61  ;;  %v3847_v35 = vadd.f32 %v1510_v55, %v3668_v12  ;;  %1688 = vadd.xlane.f32.xlu2 %v1687_v31  ;;  %1606 = vadd.xlane.f32.xlu1 %v1605_v15  ;;  %v1658_v61 = vmul.f32 %v3841_v19, %v3841_v19  ;;  %v1615_v4 = vsub.f32 1.0, %v1614_v2 }
 0x343   : > { %v1692_v7 = vadd.f32 %v1691_v62, %v1655_v20 }
 0x344   : > { %4254 = vst [vmem:[#allocation23_spill] sm:$0xff] %v3844_v60  ;;  %v1656_v1 = vmul.f32 %v3844_v60, %v3844_v60  ;;  %v1608_v14 = vadd.f32 %v3847_v35, %v3844_v60  ;;  %v1657_v40 = vmul.f32 %v3847_v35, %v3847_v35  ;;  %v1616_v29 = vmul.f32 %v2626_v13, %v1615_v4 }
 0x345   : > { %4255 = vst [vmem:[#allocation24_spill] sm:$0xff] %v3847_v35 }
 0x346   : > { %v1609_v12 = vadd.f32 %v1608_v14, %v3841_v19  ;;  %v1695_v16 = vadd.f32 %v1657_v40, %v1656_v1  ;;  %v1617_v9 = vadd.f32 %v2626_v13, %v1616_v29 }
 0x348   : > { %v1610_v58 = vadd.f32 %v1609_v12, %v3850_v0  ;;  %v1696_v8 = vadd.f32 %v1695_v16, %v1658_v61  ;;  %v3866_v37 = vsel %vm1618_vm5, %v2626_v13, %v1617_v9 }
 0x34a   : > { %1611 = vadd.xlane.f32.xlu0 %v1610_v58  ;;  %1693 = vadd.xlane.f32.xlu1 %v1692_v7  ;;  %v1697_v21 = vadd.f32 %v1696_v8, %v1659_v52 }
 0x34c   : > { %1698 = vadd.xlane.f32.xlu2 %v1697_v21 }
 0x382   : > { %v1577_v32 = vpop.xlane.xlu2 %1576 }
 0x383   : > { %v3869_v11 = vmul.f32 %v3866_v37, %v1577_v32 }
 0x385   : > { %v1708_v49 = vmul.f32 %v3869_v11, %v3869_v11 }
 0x38a   : > { %v1664_v34 = vpop.xlane.xlu2 %1663  ;;  %v1582_v47 = vpop.xlane.xlu0 %1581 }
 0x38b   : > { %v1700_v31 = vmul.f32 %v1664_v34, %v3866_v37  ;;  %v3875_v53 = vmul.f32 %v3866_v37, %v1582_v47 }
 0x38d   : > { %v1716_v15 = vsub.f32 %v1700_v31, %v1708_v49  ;;  %v1709_v14 = vmul.f32 %v3875_v53, %v3875_v53  ;;  %v1737_v3 = vsub.f32 %v3700_v42, %v3875_v53 }
 0x38f   : > { %v1724_v51 = vmax.f32 %v1716_v15, 0.0 }
 0x391   : > { %v1764_v54 = vadd.f32 1e-06, %v1724_v51 }
 0x392   : > { %v1669_v55 = vpop.xlane.xlu0 %1668  ;;  %v1587_v1 = vpop.xlane.xlu1 %1586 }
 0x393   : > { %2627 = vrsqrt.f32 %v1764_v54  ;;  %v1701_v40 = vmul.f32 %v1669_v55, %v3866_v37  ;;  %v3881_v62 = vmul.f32 %v3866_v37, %v1587_v1  ;;  %vm1778_vm6 = vweird.f32 %v1764_v54 }
 0x394   : > { %v1674_v12 = vpop.xlane.xlu2 %1673 }
 0x395   : > { %v1717_v61 = vsub.f32 %v1701_v40, %v1709_v14  ;;  %v1702_v16 = vmul.f32 %v1674_v12, %v3866_v37  ;;  %v1710_v58 = vmul.f32 %v3881_v62, %v3881_v62  ;;  %v1571_v40 = vld [vmem:[#allocation13] sm:$0xf] }
 0x397   : > { %v1725_v20 = vmax.f32 %v1717_v61, 0.0  ;;  %v1718_v8 = vsub.f32 %v1702_v16, %v1710_v58  ;;  %v1572_v61 = vld [vmem:[#allocation15] sm:$0xf] }
 0x399   : > { %v2628_v7 = vpop.eup %2627  ;;  %v3886_v52 = vadd.f32 1e-06, %v1725_v20  ;;  %v1726_v44 = vmax.f32 %v1718_v8, 0.0  ;;  %v3907_v8 = vperm.slane %v1571_v40, 0 }
 0x39a   : > { %v1773_v21 = vmul.f32 %v2628_v7, %v1764_v54  ;;  %v1592_v13 = vpop.xlane.xlu1 %1591  ;;  %vm1779_vm4 = vweird.f32 %v2628_v7  ;;  %v1734_v54 = vsub.f32 %v3681_v18, %v3869_v11 }
 0x39b   : > { %2629 = vrsqrt.f32 %v3886_v52  ;;  %v3889_v4 = vadd.f32 1e-06, %v1726_v44  ;;  %v3893_v29 = vmul.f32 %v3866_v37, %v1592_v13  ;;  %v3911_v44 = vperm.slane %v1571_v40, 2  ;;  %vm1780_vm7 = vmor %vm1778_vm6, %vm1779_vm4 }
 0x39c   : > { %v1774_v2 = vmul.f32 %v2628_v7, %v1773_v21  ;;  %v3909_v21 = vperm.slane %v1571_v40, 1  ;;  %vm1788_vm9 = vweird.f32 %v3886_v52 }
 0x39d   : > { %2631 = vrsqrt.f32 %v3889_v4  ;;  %v1711_v49 = vmul.f32 %v3893_v29, %v3893_v29  ;;  %vm1798_vm11 = vweird.f32 %v3889_v4 }
 0x39e   : > { %v1775_v32 = vmul.f32 0.5, %v1774_v2  ;;  %v3915_v2 = vperm.slane %v1571_v40, 3 }
 0x3a0   : > { %v1776_v55 = vsub.f32 1.5, %v1775_v32  ;;  %v3917_v32 = vperm.slane %v1572_v61, 0 }
 0x3a1   : > { %v3895_v9 = vpop.eup %2629 }
 0x3a2   : > { %v1783_v34 = vmul.f32 %v3895_v9, %v3886_v52  ;;  %v1679_v47 = vpop.xlane.xlu1 %1678  ;;  %v1777_v16 = vmul.f32 %v2628_v7, %v1776_v55  ;;  %vm1789_vm8 = vweird.f32 %v3895_v9 }
 0x3a3   : > { %v1703_v31 = vmul.f32 %v1679_v47, %v3866_v37  ;;  %v3902_v51 = vpop.eup %2631  ;;  %v3921_v47 = vperm.slane %v1572_v61, 2  ;;  %vm1790_vm10 = vmor %vm1788_vm9, %vm1789_vm8 }
 0x3a4   : > { %v1784_v1 = vmul.f32 %v3895_v9, %v1783_v34  ;;  %v1793_v12 = vmul.f32 %v3902_v51, %v3889_v4  ;;  %v3919_v34 = vperm.slane %v1572_v61, 1  ;;  %v1781_v40 = vsel %vm1780_vm7, %v2628_v7, %v1777_v16 }
 0x3a5   : > { %v1597_v15 = vpop.xlane.xlu0 %1596  ;;  %v1719_v14 = vsub.f32 %v1703_v31, %v1711_v49  ;;  %v3923_v49 = vperm.slane %v1572_v61, 3  ;;  %v1735_v61 = vsub.f32 %v3690_v28, %v3869_v11  ;;  %vm1799_vm12 = vweird.f32 %v3902_v51 }
 0x3a6   : > { %v1785_v58 = vmul.f32 0.5, %v1784_v1  ;;  %v1794_v31 = vmul.f32 %v3902_v51, %v1793_v12  ;;  %v1732_v1 = vsub.f32 %v3675_v33, %v3869_v11  ;;  %v1736_v12 = vsub.f32 %v3697_v41, %v3875_v53  ;;  %vm1800_vm13 = vmor %vm1798_vm11, %vm1799_vm12 }
 0x3a7   : > { %v1727_v20 = vmax.f32 %v1719_v14, 0.0  ;;  %v1733_v14 = vsub.f32 %v3678_v17, %v3869_v11  ;;  %v1738_v33 = vsub.f32 %v3703_v43, %v3875_v53  ;;  %v1739_v17 = vsub.f32 %v3712_v48, %v3875_v53 }
 0x3a8   : > { %v3946_v18 = vmul.f32 %v3866_v37, %v1597_v15  ;;  %v1852_v28 = vmul.f32 %v1781_v40, %v1732_v1  ;;  %v1795_v16 = vmul.f32 0.5, %v1794_v31  ;;  %v1855_v15 = vmul.f32 %v1781_v40, %v1735_v61 }
 0x3a9   : > { %v3913_v13 = vadd.f32 1e-06, %v1727_v20  ;;  %v1786_v20 = vsub.f32 1.5, %v1785_v58  ;;  %v1853_v11 = vmul.f32 %v1781_v40, %v1733_v14  ;;  %v1854_v58 = vmul.f32 %v1781_v40, %v1734_v54 }
 0x3aa   : > { %v1893_v54 = vmul.f32 %v3907_v8, %v1852_v28  ;;  %v1796_v61 = vsub.f32 1.5, %v1795_v16  ;;  %v1896_v28 = vmul.f32 %v3915_v2, %v1855_v15 }
 0x3ab   : > { %2633 = vrsqrt.f32 %v3913_v13  ;;  %v1787_v43 = vmul.f32 %v3895_v9, %v1786_v20  ;;  %v1894_v40 = vmul.f32 %v3909_v21, %v1853_v11  ;;  %v1895_v41 = vmul.f32 %v3911_v44, %v1854_v58 }
 0x3ac   : > { %v3987_v7 = vadd.f32 %v3917_v32, %v1893_v54  ;;  %v1797_v15 = vmul.f32 %v3902_v51, %v1796_v61  ;;  %v4002_v60 = vadd.f32 %v3923_v49, %v1896_v28  ;;  %vm1808_vm14 = vweird.f32 %v3913_v13 }
 0x3ad   : > { %v1602_v55 = vpop.xlane.xlu2 %1601  ;;  %v1684_v0 = vpop.xlane.xlu0 %1683  ;;  %v1791_v42 = vsel %vm1790_vm10, %v3895_v9, %v1787_v43 }
 0x3ae   : > { %v1704_v48 = vmul.f32 %v1684_v0, %v3866_v37  ;;  %v3965_v20 = vmul.f32 %v3866_v37, %v1602_v55  ;;  %v1712_v0 = vmul.f32 %v3946_v18, %v3946_v18  ;;  %v1856_v58 = vmul.f32 %v1791_v42, %v1736_v12 }
 0x3af   : > { %v1858_v35 = vmul.f32 %v1791_v42, %v1738_v33  ;;  %v1859_v54 = vmul.f32 %v1791_v42, %v1739_v17  ;;  %v1748_v12 = vsub.f32 %v3769_v56, %v3946_v18  ;;  %v1749_v33 = vsub.f32 %v3772_v22, %v3946_v18 }
 0x3b0   : > { %v1720_v14 = vsub.f32 %v1704_v48, %v1712_v0  ;;  %v1713_v9 = vmul.f32 %v3965_v20, %v3965_v20  ;;  %v3990_v48 = vadd.f32 %v3919_v34, %v1894_v40  ;;  %v1750_v17 = vsub.f32 %v3775_v46, %v3946_v18 }
 0x3b1   : > { %v3955_v53 = vpop.eup %2633 }
 0x3b2   : > { %v1803_v55 = vmul.f32 %v3955_v53, %v3913_v13  ;;  %v1728_v52 = vmax.f32 %v1720_v14, 0.0  ;;  %vm1809_vm15 = vweird.f32 %v3955_v53  ;;  %v1755_v13 = vsub.f32 %v3808_v5, %v3965_v20 }
 0x3b3   : > { %vm1810_vm3 = vmor %vm1808_vm14, %vm1809_vm15 }
 0x3b4   : > { %v1804_v16 = vmul.f32 %v3955_v53, %v1803_v55  ;;  %v3993_v19 = vadd.f32 1e-06, %v1728_v52  ;;  %v3999_v55 = vadd.f32 %v3921_v47, %v1895_v41  ;;  %v1897_v41 = vmul.f32 %v3907_v8, %v1856_v58 }
 0x3b5   : > { %v1689_v1 = vpop.xlane.xlu2 %1688  ;;  %v1607_v31 = vpop.xlane.xlu1 %1606 }
 0x3b6   : > { %v1705_v43 = vmul.f32 %v1689_v1, %v3866_v37  ;;  %v1805_v0 = vmul.f32 0.5, %v1804_v16  ;;  %v3996_v14 = vmul.f32 %v3866_v37, %v1607_v31  ;;  %v1857_v1 = vmul.f32 %v1791_v42, %v1737_v3 }
 0x3b7   : > { %2635 = vrsqrt.f32 %v3993_v19  ;;  %v1801_v3 = vsel %vm1800_vm13, %v3902_v51, %v1797_v15  ;;  %v1900_v51 = vmul.f32 %v3915_v2, %v1859_v54  ;;  %v1751_v16 = vsub.f32 %v3786_v50, %v3946_v18 }
 0x3b8   : > { %v1721_v11 = vsub.f32 %v1705_v43, %v1713_v9  ;;  %v1806_v40 = vsub.f32 1.5, %v1805_v0  ;;  %v1714_v61 = vmul.f32 %v3996_v14, %v3996_v14  ;;  %v1898_v28 = vmul.f32 %v3909_v21, %v1857_v1 }
 0x3b9   : > { %v4257_v9 = vsub.f32 %v3724_v38, %v3881_v62  ;;  %v1938_v15 = vadd.f32 %v3917_v32, %v1897_v41  ;;  %v4258_v0 = vsub.f32 %v3727_v26, %v3881_v62  ;;  %v4259_v1 = vsub.f32 %v3721_v36, %v3881_v62 }
 0x3ba   : > { %v1729_v31 = vmax.f32 %v1721_v11, 0.0  ;;  %v1899_v11 = vmul.f32 %v3911_v44, %v1858_v35  ;;  %v1939_v26 = vadd.f32 %v3919_v34, %v1898_v28  ;;  %v1941_v36 = vadd.f32 %v3923_v49, %v1900_v51 }
 0x3bb   : > { %v1860_v43 = vmul.f32 %v1801_v3, %v4257_v9  ;;  %v1861_v35 = vmul.f32 %v1801_v3, %v4258_v0  ;;  %v1862_v54 = vmul.f32 %v1801_v3, %v4259_v1  ;;  %vm1818_vm4 = vweird.f32 %v3993_v19 }
 0x3bc   : > { %v4017_v4 = vadd.f32 1e-06, %v1729_v31  ;;  %v1940_v0 = vadd.f32 %v3921_v47, %v1899_v11  ;;  %v1758_v22 = vsub.f32 %v3823_v24, %v3996_v14 }
 0x3bd   : > { %v1694_v42 = vpop.xlane.xlu1 %1693  ;;  %v2636_v38 = vpop.eup %2635  ;;  %v1901_v31 = vmul.f32 %v3907_v8, %v1860_v43  ;;  %v1902_v28 = vmul.f32 %v3909_v21, %v1861_v35  ;;  %v1903_v11 = vmul.f32 %v3911_v44, %v1862_v54  ;;  %v2015_v35 = vmax.f32 %v4002_v60, %v1941_v36 }
 0x3be   : > { %v1706_v52 = vmul.f32 %v1694_v42, %v3866_v37  ;;  %2637 = vrsqrt.f32 %v4017_v4  ;;  %v4260_v42 = vsub.f32 %v3730_v57, %v3881_v62  ;;  %v1813_v62 = vmul.f32 %v2636_v38, %v3993_v19 }
 0x3bf   : > { %v1699_v43 = vpop.xlane.xlu2 %1698  ;;  %v1942_v54 = vadd.f32 %v3917_v32, %v1901_v31  ;;  %vm1819_vm5 = vweird.f32 %v2636_v38  ;;  %v4262_v36 = vsub.f32 %v3750_v6, %v3893_v29  ;;  %vm1828_vm8 = vweird.f32 %v4017_v4 }
 0x3c0   : > { %v1722_v58 = vsub.f32 %v1706_v52, %v1714_v61  ;;  %v1863_v9 = vmul.f32 %v1801_v3, %v4260_v42  ;;  %v1807_v61 = vmul.f32 %v3955_v53, %v1806_v40  ;;  %v1612_v52 = vpop.xlane.xlu0 %1611  ;;  %v1976_v40 = vmax.f32 %v3987_v7, %v1938_v15  ;;  %vm1820_vm6 = vmor %vm1818_vm4, %vm1819_vm5 }
 0x3c1   : > { %v4063_v51 = vmul.f32 %v3866_v37, %v1612_v52  ;;  %v1989_v7 = vmax.f32 %v3990_v48, %v1939_v26  ;;  %v2002_v15 = vmax.f32 %v3999_v55, %v1940_v0  ;;  %v4261_v48 = vsub.f32 %v3747_v59, %v3893_v29 }
 0x3c2   : > { %v1730_v41 = vmax.f32 %v1722_v58, 0.0  ;;  %v1904_v42 = vmul.f32 %v3915_v2, %v1863_v9  ;;  %v1811_v57 = vsel %vm1810_vm3, %v3955_v53, %v1807_v61  ;;  %v1707_v9 = vmul.f32 %v1699_v43, %v3866_v37 }
 0x3c3   : > { %v1943_v53 = vadd.f32 %v3919_v34, %v1902_v28  ;;  %v1944_v61 = vadd.f32 %v3921_v47, %v1903_v11  ;;  %v1864_v55 = vmul.f32 %v1811_v57, %v4261_v48  ;;  %v1715_v60 = vmul.f32 %v4063_v51, %v4063_v51 }
 0x3c4   : > { %v4055_v3 = vadd.f32 1e-06, %v1730_v41  ;;  %v2638_v58 = vpop.eup %2637  ;;  %v1814_v41 = vmul.f32 %v2636_v38, %v1813_v62  ;;  %v1945_v26 = vadd.f32 %v3923_v49, %v1904_v42  ;;  %v1865_v37 = vmul.f32 %v1811_v57, %v4262_v36 }
 0x3c5   : > { %v1823_v1 = vmul.f32 %v2638_v58, %v4017_v4  ;;  %v4263_v62 = vsub.f32 %v3753_v10, %v3893_v29  ;;  %v4264_v59 = vsub.f32 %v3762_v25, %v3893_v29  ;;  %v1723_v43 = vsub.f32 %v1707_v9, %v1715_v60 }
 0x3c6   : > { %2639 = vrsqrt.f32 %v4055_v3  ;;  %v1815_v52 = vmul.f32 0.5, %v1814_v41  ;;  %v4095_v48 = vmax.f32 %v1976_v40, %v1942_v54  ;;  %v1905_v6 = vmul.f32 %v3907_v8, %v1864_v55 }
 0x3c7   : > { %v1824_v31 = vmul.f32 %v2638_v58, %v1823_v1  ;;  %v1866_v28 = vmul.f32 %v1811_v57, %v4263_v62  ;;  %v1867_v11 = vmul.f32 %v1811_v57, %v4264_v59  ;;  %v1731_v36 = vmax.f32 %v1723_v43, 0.0 }
 0x3c8   : > { %v1816_v0 = vsub.f32 1.5, %v1815_v52  ;;  %v4098_v52 = vmax.f32 %v1989_v7, %v1943_v53  ;;  %v4103_v25 = vmax.f32 %v2002_v15, %v1944_v61  ;;  %vm1829_vm7 = vweird.f32 %v2638_v58 }
 0x3c9   : > { %v1825_v1 = vmul.f32 0.5, %v1824_v31  ;;  %v1906_v40 = vmul.f32 %v3909_v21, %v1865_v37  ;;  %v1907_v54 = vmul.f32 %v3911_v44, %v1866_v28  ;;  %v1908_v19 = vmul.f32 %v3915_v2, %v1867_v11  ;;  %vm1830_vm9 = vmor %vm1828_vm8, %vm1829_vm7 }
 0x3ca   : > { %v1817_v42 = vmul.f32 %v2636_v38, %v1816_v0  ;;  %v4113_v15 = vadd.f32 1e-06, %v1731_v36  ;;  %v1946_v61 = vadd.f32 %v3917_v32, %v1905_v6  ;;  %v1756_v4 = vsub.f32 %v3817_v23, %v3996_v14 }
 0x3cb   : > { %v1826_v57 = vsub.f32 1.5, %v1825_v1  ;;  %v1757_v60 = vsub.f32 %v3820_v27, %v3996_v14  ;;  %v1759_v23 = vsub.f32 %v3832_v45, %v3996_v14  ;;  %v1947_v46 = vadd.f32 %v3919_v34, %v1906_v40  ;;  %v4267_v45 = vld [vmem:[#allocation23_spill] sm:$0xff] }
 0x3cc   : > { %v4093_v41 = vpop.eup %2639  ;;  %v1821_v29 = vsel %vm1820_vm6, %v2636_v38, %v1817_v42  ;;  %v4115_v38 = vmax.f32 %v2015_v35, %v1945_v26  ;;  %2641 = vrsqrt.f32 %v4113_v15  ;;  %v1949_v50 = vadd.f32 %v3923_v49, %v1908_v19 }
 0x3cd   : > { %v1833_v10 = vmul.f32 %v4093_v41, %v4055_v3  ;;  %v1868_v7 = vmul.f32 %v1821_v29, %v1748_v12  ;;  %v1827_v9 = vmul.f32 %v2638_v58, %v1826_v57  ;;  %v1869_v55 = vmul.f32 %v1821_v29, %v1749_v33 }
 0x3ce   : > { %v1870_v56 = vmul.f32 %v1821_v29, %v1750_v17  ;;  %v1871_v12 = vmul.f32 %v1821_v29, %v1751_v16  ;;  %v1948_v17 = vadd.f32 %v3921_v47, %v1907_v54  ;;  %v4265_v16 = vsub.f32 %v3793_v63, %v3965_v20 }
 0x3cf   : > { %v1834_v53 = vmul.f32 %v4093_v41, %v1833_v10  ;;  %v1831_v35 = vsel %vm1830_vm9, %v2638_v58, %v1827_v9  ;;  %v1909_v18 = vmul.f32 %v3907_v8, %v1868_v7  ;;  %v4266_v27 = vsub.f32 %v3796_v39, %v3965_v20 }
 0x3d0   : > { %v1872_v58 = vmul.f32 %v1831_v35, %v4265_v16  ;;  %vm1838_vm10 = vweird.f32 %v4055_v3  ;;  %v1760_v14 = vsub.f32 %v4267_v45, %v4063_v51  ;;  %v1978_v26 = vmax.f32 %v4095_v48, %v1946_v61  ;;  %v4269_v16 = vld [vmem:[#allocation24_spill] sm:$0xff]  ;;  %v4271_v45 = vld [vmem:[#allocation25_spill] sm:$0xff] }
 0x3d1   : > { %v1835_v33 = vmul.f32 0.5, %v1834_v53  ;;  %v1873_v24 = vmul.f32 %v1831_v35, %v4266_v27  ;;  %v1910_v0 = vmul.f32 %v3909_v21, %v1869_v55  ;;  %v1911_v31 = vmul.f32 %v3911_v44, %v1870_v56  ;;  %v4270_v27 = vld [vmem:[#allocation22_spill] sm:$0xff] }
 0x3d2   : > { %v1912_v37 = vmul.f32 %v3915_v2, %v1871_v12  ;;  %v4268_v63 = vsub.f32 %v3799_v30, %v3965_v20  ;;  %v1875_v39 = vmul.f32 %v1831_v35, %v1755_v13  ;;  %vm1839_vm11 = vweird.f32 %v4093_v41  ;;  %v2642_v59 = vpop.eup %2641 }
 0x3d3   : > { %v1836_v28 = vsub.f32 1.5, %v1835_v33  ;;  %v1991_v11 = vmax.f32 %v4098_v52, %v1947_v46  ;;  %v2004_v43 = vmax.f32 %v4103_v25, %v1948_v17  ;;  %v2017_v48 = vmax.f32 %v4115_v38, %v1949_v50  ;;  %vm1840_vm12 = vmor %vm1838_vm10, %vm1839_vm11 }
 0x3d4   : > { %v1874_v62 = vmul.f32 %v1831_v35, %v4268_v63  ;;  %v1950_v42 = vadd.f32 %v3917_v32, %v1909_v18  ;;  %v1913_v1 = vmul.f32 %v3907_v8, %v1872_v58  ;;  %v1914_v30 = vmul.f32 %v3909_v21, %v1873_v24 }
 0x3d5   : > { %v1837_v6 = vmul.f32 %v4093_v41, %v1836_v28  ;;  %v1843_v5 = vmul.f32 %v2642_v59, %v4113_v15  ;;  %v1951_v20 = vadd.f32 %v3919_v34, %v1910_v0  ;;  %v1952_v13 = vadd.f32 %v3921_v47, %v1911_v31 }
 0x3d6   : > { %v1953_v52 = vadd.f32 %v3923_v49, %v1912_v37  ;;  %vm1848_vm13 = vweird.f32 %v4113_v15  ;;  %v1915_v10 = vmul.f32 %v3911_v44, %v1874_v62  ;;  %v1916_v36 = vmul.f32 %v3915_v2, %v1875_v39 }
 0x3d7   : > { %v1841_v25 = vsel %vm1840_vm12, %v4093_v41, %v1837_v6  ;;  %v1844_v29 = vmul.f32 %v2642_v59, %v1843_v5  ;;  %v1979_v7 = vmax.f32 %v1978_v26, %v1950_v42  ;;  %v1954_v9 = vadd.f32 %v3917_v32, %v1913_v1 }
 0x3d8   : > { %v1876_v57 = vmul.f32 %v1841_v25, %v1756_v4  ;;  %v1877_v40 = vmul.f32 %v1841_v25, %v1757_v60  ;;  %v1878_v54 = vmul.f32 %v1841_v25, %v1758_v22  ;;  %v1879_v19 = vmul.f32 %v1841_v25, %v1759_v23 }
 0x3d9   : > { %v1955_v53 = vadd.f32 %v3919_v34, %v1914_v30  ;;  %v1845_v3 = vmul.f32 0.5, %v1844_v29  ;;  %v1956_v41 = vadd.f32 %v3921_v47, %v1915_v10  ;;  %v1957_v4 = vadd.f32 %v3923_v49, %v1916_v36 }
 0x3da   : > { %v1917_v38 = vmul.f32 %v3907_v8, %v1876_v57  ;;  %v1918_v61 = vmul.f32 %v3909_v21, %v1877_v40  ;;  %v1919_v55 = vmul.f32 %v3911_v44, %v1878_v54  ;;  %v1920_v56 = vmul.f32 %v3915_v2, %v1879_v19 }
 0x3db   : > { %v1846_v12 = vsub.f32 1.5, %v1845_v3  ;;  %vm1849_vm14 = vweird.f32 %v2642_v59  ;;  %v1992_v35 = vmax.f32 %v1991_v11, %v1951_v20  ;;  %v2005_v60 = vmax.f32 %v2004_v43, %v1952_v13 }
 0x3dc   : > { %v2018_v22 = vmax.f32 %v2017_v48, %v1953_v52  ;;  %v1958_v23 = vadd.f32 %v3917_v32, %v1917_v38  ;;  %v1959_v33 = vadd.f32 %v3919_v34, %v1918_v61  ;;  %v1960_v46 = vadd.f32 %v3921_v47, %v1919_v55  ;;  %vm1850_vm15 = vmor %vm1848_vm13, %vm1849_vm14 }
 0x3dd   : > { %v1961_v17 = vadd.f32 %v3923_v49, %v1920_v56  ;;  %v1847_v50 = vmul.f32 %v2642_v59, %v1846_v12  ;;  %v1980_v18 = vmax.f32 %v1979_v7, %v1954_v9  ;;  %v1761_v58 = vsub.f32 %v4269_v16, %v4063_v51 }
 0x3de   : > { %v1762_v24 = vsub.f32 %v4270_v27, %v4063_v51  ;;  %v1763_v26 = vsub.f32 %v4271_v45, %v4063_v51  ;;  %v1993_v0 = vmax.f32 %v1992_v35, %v1955_v53  ;;  %v2006_v31 = vmax.f32 %v2005_v60, %v1956_v41 }
 0x3df   : > { %v2019_v37 = vmax.f32 %v2018_v22, %v1957_v4  ;;  %v1851_v63 = vsel %vm1850_vm15, %v2642_v59, %v1847_v50  ;;  %v1981_v43 = vmax.f32 %v1980_v18, %v1958_v23  ;;  %vm2036_vm3 = vcmask 1042434   ;;  %v1975_v22 = vld [vmem:[%s3159_s20] sm:$0xf] }
 0x3e0   : > { %v1880_v62 = vmul.f32 %v1851_v63, %v1760_v14  ;;  %v1881_v39 = vmul.f32 %v1851_v63, %v1761_v58  ;;  %v1882_v28 = vmul.f32 %v1851_v63, %v1762_v24  ;;  %v1883_v11 = vmul.f32 %v1851_v63, %v1763_v26 }
 0x3e1   : > { %v1994_v48 = vmax.f32 %v1993_v0, %v1959_v33  ;;  %v2007_v42 = vmax.f32 %v2006_v31, %v1960_v46  ;;  %v2020_v1 = vmax.f32 %v2019_v37, %v1961_v17 }
 0x3e2   : > { %v1921_v30 = vmul.f32 %v3907_v8, %v1880_v62  ;;  %v1922_v6 = vmul.f32 %v3909_v21, %v1881_v39  ;;  %v1923_v51 = vmul.f32 %v3911_v44, %v1882_v28  ;;  %v1924_v15 = vmul.f32 %v3915_v2, %v1883_v11 }
 0x3e4   : > { %v1962_v5 = vadd.f32 %v3917_v32, %v1921_v30  ;;  %v1963_v59 = vadd.f32 %v3919_v34, %v1922_v6  ;;  %v1964_v14 = vadd.f32 %v3921_v47, %v1923_v51  ;;  %v1965_v20 = vadd.f32 %v3923_v49, %v1924_v15 }
 0x3e6   : > { %v1982_v13 = vmax.f32 %v1981_v43, %v1962_v5  ;;  %v1995_v52 = vmax.f32 %v1994_v48, %v1963_v59  ;;  %v2008_v10 = vmax.f32 %v2007_v42, %v1964_v14  ;;  %v2021_v36 = vmax.f32 %v2020_v1, %v1965_v20 }
 0x3e8   : > { %v1983_v25 = vrot.slane %v1982_v13, 4  ;;  %v1996_v8 = vrot.slane %v1995_v52, 4  ;;  %v2009_v29 = vrot.slane %v2008_v10, 4  ;;  %v2022_v21 = vrot.slane %v2021_v36, 4 }
 0x3ea   : > { %v1984_v57 = vmax.f32 %v1982_v13, %v1983_v25  ;;  %v1997_v44 = vmax.f32 %v1995_v52, %v1996_v8  ;;  %v2010_v40 = vmax.f32 %v2008_v10, %v2009_v29  ;;  %v2023_v2 = vmax.f32 %v2021_v36, %v2022_v21 }
 0x3ec   : > { %v1985_v54 = vrot.slane %v1984_v57, 2  ;;  %v1998_v32 = vrot.slane %v1997_v44, 2  ;;  %v2011_v19 = vrot.slane %v2010_v40, 2  ;;  %v2024_v34 = vrot.slane %v2023_v2, 2 }
 0x3ee   : > { %v1986_v7 = vmax.f32 %v1984_v57, %v1985_v54  ;;  %v1999_v47 = vmax.f32 %v1997_v44, %v1998_v32  ;;  %v2012_v49 = vmax.f32 %v2010_v40, %v2011_v19  ;;  %v2025_v9 = vmax.f32 %v2023_v2, %v2024_v34 }
 0x3f0   : > { %v1987_v53 = vrot.slane %v1986_v7, 1  ;;  %v2000_v3 = vrot.slane %v1999_v47, 1  ;;  %v2013_v38 = vrot.slane %v2012_v49, 1  ;;  %v2026_v61 = vrot.slane %v2025_v9, 1 }
 0x3f2   : > { %v2001_v55 = vmax.f32 %v1999_v47, %v2000_v3  ;;  %v2014_v56 = vmax.f32 %v2012_v49, %v2013_v38  ;;  %v2027_v41 = vmax.f32 %v2025_v9, %v2026_v61  ;;  %v1988_v4 = vmax.f32 %v1986_v7, %v1987_v53 }
 0x3f4   : > { %v2032_v12 = vrot.slane %v2001_v55, 7  ;;  %v2033_v35 = vrot.slane %v2014_v56, 6  ;;  %v2034_v60 = vrot.slane %v2027_v41, 5 }
 0x3f6   : > { %v2035_v23 = vsel %vm671_vm0, %v1988_v4, %v2032_v12  ;;  %v2037_v33 = vsel %vm2036_vm3, %v2033_v35, %v2034_v60 }
 0x3f7   : > { %v2038_v46 = vsel %vm672_vm1, %v2035_v23, %v2037_v33 }
 0x3f8   : > { %v2040_v17 = vmax.f32 %v1975_v22, %v2038_v46 }
 0x3fa   : > { %2045 = vst.msk [vmem:[%s3159_s20] sm:$0xf] %vm3148_vm2, %v2040_v17 }
 0x3fb PF: > { %s28_s27 = sadd.s32 1, %s2955_s27   ;;  %s4273_s25 = smov %s2951_s26 }
 0x3fc   : > { %p25_p8 = scmp.ge.s32.totalorder %s28_s27, 4   ;;  %s4274_s26 = smov %s4276_s29 }
 0x3fe   :  { %27 = sbr.rel (!%p25_p8) target bundleno = 10 (0xa), region = 143 }
 0x403   :  { %2073 = vsyncpa [#allocation3], 1 }
 0x404   :  { %2075 = vsyncpa [#allocation3 + $0x1], 1 }
 0x405   :  { %2076 = vsyncpa [#allocation5], 1 }
 0x406   :  { %2077 = vsyncpa [#allocation8], 1 }
 0x407   :  { %2078 = vsyncpa [#allocation11], 1 }
 0x408   :  { %2079 = vsyncpa [#allocation14], 1 }

// kernel: pointnet_dense_cls.3
= control target key start
LH: loop header
LB: loop body
LE: loop exit
PB: predicated region body
PF: predicated region fallthrough
CT: control target
= control target key end

     0   :  { %s2908_s25 = smov 0   ;;  %s2910_s26 = smov 0   ;;  %s3839_s0 = inlined_call_operand.vmem [shape: bf16[2,64,3], index: 0, kind: input, shape index: {}]   ;;  %s3840_s1 = inlined_call_operand.vmem [shape: f32[2,1,512], index: 1, kind: input, shape index: {}]   ;;  %s3841_s2 = inlined_call_operand.vmem [shape: bf16[3,64], index: 2, kind: input, shape index: {}]   ;;  %s3842_s3 = inlined_call_operand.vmem [shape: f32[1,64], index: 3, kind: input, shape index: {}]   ;;  %s3843_s4 = inlined_call_operand.vmem [shape: f32[1,64], index: 4, kind: input, shape index: {}]   ;;  %s3844_s5 = inlined_call_operand.vmem [shape: f32[1,64], index: 5, kind: input, shape index: {}]   ;;  %s3845_s6 = inlined_call_operand.vmem [shape: bf16[64,512], index: 6, kind: input, shape index: {}]   ;;  %s3846_s7 = inlined_call_operand.vmem [shape: bf16[512,256], index: 7, kind: input, shape index: {}]   ;;  %s3847_s8 = inlined_call_operand.vmem [shape: f32[1,256], index: 8, kind: input, shape index: {}]   ;;  %s3848_s9 = inlined_call_operand.vmem [shape: bf16[256,128], index: 9, kind: input, shape index: {}]   ;;  %s3849_s10 = inlined_call_operand.vmem [shape: f32[1,128], index: 10, kind: input, shape index: {}]   ;;  %s3850_s11 = inlined_call_operand.vmem [shape: bf16[128,128], index: 11, kind: input, shape index: {}]   ;;  %s3851_s12 = inlined_call_operand.vmem [shape: f32[1,128], index: 12, kind: input, shape index: {}]   ;;  %s3852_s13 = inlined_call_operand.vmem [shape: bf16[2,64,128], index: 13, kind: output, shape index: {}]  }
   0x1   :  { %s2912_s27 = smov 0  }
   0x2 LB: > { %s35_s28 = sadd.s32 1, %s2830_s26  ;;  %p2170_p0 = scmp.ge.s32.totalorder %s2834_s27, 1  ;;  %s2834_s27 = sphi %s2912_s27, %s23_s27   ;;  %s2830_s26 = sphi %s2910_s26, %s3860_s26   ;;  %s2826_s25 = sphi %s2908_s25, %s3859_s25  }
   0x3   : > { %p37_p1 = scmp.ge.s32.totalorder %s35_s28, 2  ;;  %p417_p2 = scmp.lt.s32.totalorder %s2834_s27, 3 }
   0x5   : > { %s3862_s28 = smov (%p37_p1, %s35_s28), 0  ;;  %p418_p3 = pnand %p2170_p0, %p417_p2 }
   0x6   : > { %p474_p4 = scmp.lt.s32.totalorder (!%p418_p3), %s2826_s25, 1 }
   0x7   : > { %421 = sbr.rel (%p418_p3) target bundleno = 1010 (0x3f2), region = 72 }
   0xc   : > { %v506_v0 = vld [vmem:[%s3841_s2] sm:$0x3]  ;;  %vm546_vm0 = vcmask 1040384   ;;  %vm547_vm1 = vcmask 1041408   ;;  %v2836_v1 = vmov 65535   ;;  %s3864_s25 = smov (!%p474_p4, %s2826_s25), 1 }
   0xd   : > { %v548_v2 = vsel %vm546_vm0, 4294967295, %v2836_v1  ;;  %s2630_s14 = sshll.u32 %s3864_s25, 5  ;;  %vm533_vm2 = vcmask 23552   ;;  %v2789_v9 = vld [vmem:[%s3842_s3] ss:$0 sm:$0xff]  ;;  %vm582_vm3 = vcmask 523264  }
   0xe   : > { %v549_v3 = vsel %vm547_vm1, %v548_v2, 0  ;;  %s481_s17 = scalar_lea.vmem %s3839_s0, %s2630_s14  ;;  %v2649_v30 = vld [vmem:[%s3845_s6 + $0x6c] sm:$0xf]  ;;  %v2256_v31 = vld [vmem:[%s3845_s6 + $0x78] sm:$0xf0]  ;;  %v2837_v53 = vmov 64.0   ;;  %s495_s21 = scalar_lea.vmem %s3852_s13, %s2630_s14 }
   0xf   : > { %v551_v4 = vand.u32 %v549_v3, %v506_v0  ;;  %v2632_v5 = vld [vmem:[%s481_s17] sm:$0xff]  ;;  %v2633_v6 = vld [vmem:[%s481_s17 + $0x8] sm:$0xff]  ;;  %v2634_v7 = vld [vmem:[%s481_s17 + $0x10] sm:$0xff]  ;;  %v2259_v32 = vor.u32 %v2649_v30, %v2256_v31  ;;  %2794 = vrcp.f32 %v2837_v53  ;;  %s2173_s16 = sshll.u32 %s3864_s25, 2 }
  0x10   : > { %v2635_v8 = vld [vmem:[%s481_s17 + $0x18] sm:$0xff]  ;;  %v2246_v60 = vld [vmem:[%s3845_s6 + $0x60] sm:$0xf]  ;;  %v2650_v61 = vld [vmem:[%s3845_s6 + $0x6c] sm:$0xf0]  ;;  %s486_s18 = scalar_lea.vmem %s3840_s1, %s2173_s16 }
  0x11   : > { %560 = vmatpush.bf16.msra.mxu0 %v551_v4  ;;  %v2648_v62 = vld [vmem:[%s3845_s6 + $0x64] sm:$0xf]  ;;  %v2247_v63 = vor.u32 %v2650_v61, %v2246_v60  ;;  %v2248_v0 = vld [vmem:[%s3845_s6 + $0x70] sm:$0xf0]  ;;  %v2254_v1 = vld [vmem:[%s3845_s6 + $0x68] sm:$0xf] }
  0x12   : > { %v2651_v2 = vld [vmem:[%s3845_s6 + $0x74] sm:$0xf0]  ;;  %v2251_v4 = vor.u32 %v2648_v62, %v2248_v0  ;;  %v2206_v53 = vld [vmem:[%s3845_s6 + $0x8] sm:$0xf]  ;;  %v2637_v60 = vld [vmem:[%s3845_s6 + $0xc] sm:$0xf] }
  0x13   : > { %946 = vmatpush.bf16.msra.mxu1 %v2247_v63  ;;  %v2208_v61 = vld [vmem:[%s3845_s6 + $0x18] sm:$0xf0] }
  0x14   : > { %2192 = vmatmul.msk.bf16.vlgmr.msra.gmra.mxu0 %vm533_vm2, %v2632_v5  ;;  %v2255_v5 = vor.u32 %v2651_v2, %v2254_v1  ;;  %975 = vmatpush.bf16.msra.mxu2 %v2251_v4  ;;  %v2211_v62 = vor.u32 %v2637_v60, %v2208_v61 }
  0x15   : > { %1033 = vmatpush.bf16.msrb.mxu0 %v2259_v32  ;;  %v2795_v54 = vpop.eup %2794  ;;  %v2642_v32 = vld [vmem:[%s3845_s6 + $0x2c] sm:$0xf0] }
  0x16   : > { %v608_v55 = vmul.f32 64.0, %v2795_v54  ;;  %vm612_vm4 = vweird.f32 %v2795_v54  ;;  %1004 = vmatpush.bf16.msra.mxu3 %v2255_v5 }
  0x18   : > { %v609_v56 = vsub.f32 1.0, %v608_v55 }
  0x1a   : > { %v610_v57 = vmul.f32 %v2795_v54, %v609_v56 }
  0x1c   : > { %v611_v58 = vadd.f32 %v2795_v54, %v610_v57 }
  0x1e   : > { %v3002_v59 = vsel %vm612_vm4, %v2795_v54, %v611_v58  ;;  %v2639_v54 = vld [vmem:[%s3845_s6 + $0x14] sm:$0xf0] }
  0x1f   : > { %v2207_v58 = vor.u32 %v2639_v54, %v2206_v53  ;;  %v3137_v54 = vld [vmem:[%s3844_s5] ss:$0 sm:$0xff] }
  0x24   : > { %2193 = vmatmul.msk.bf16.gmra.mxu0 %vm533_vm2, %v2633_v6 }
  0x34   : > { %2194 = vmatmul.msk.bf16.gmra.mxu0 %vm533_vm2, %v2634_v7 }
  0x44   : > { %2195 = vmatmul.msk.bf16.gmra.mxu0 %vm533_vm2, %v2635_v8  ;;  %v2645_v8 = vld [vmem:[%s3845_s6 + $0x4c] sm:$0xf] }
  0x91   : > { %v562_v10 = vpop.f32.mrf.mxu0 }
  0x92   : > { %v2940_v11 = vadd.f32 %v2789_v9, %v562_v10  ;;  %v2230_v10 = vld [vmem:[%s3845_s6 + $0x40] sm:$0xf] }
  0x94   : > { %v583_v12 = vsel %vm582_vm3, %v2940_v11, 0.0  ;;  %v622_v13 = vmul.f32 %v2940_v11, %v2940_v11 }
  0x95   : > { %584 = vadd.xlane.f32.xlu0 %v583_v12 }
  0x96   : > { %v630_v14 = vsel %vm582_vm3, %v622_v13, 0.0 }
  0x97   : > { %631 = vadd.xlane.f32.xlu1 %v630_v14 }
  0x99   : > { %v564_v15 = vpop.f32.mrf.mxu0 }
  0x9a   : > { %v2947_v16 = vadd.f32 %v2789_v9, %v564_v15  ;;  %v2646_v15 = vld [vmem:[%s3845_s6 + $0x4c] sm:$0xf0] }
  0x9c   : > { %v586_v17 = vsel %vm582_vm3, %v2947_v16, 0.0  ;;  %v623_v18 = vmul.f32 %v2947_v16, %v2947_v16 }
  0x9d   : > { %587 = vadd.xlane.f32.xlu0 %v586_v17  ;;  %v2644_v17 = vld [vmem:[%s3845_s6 + $0x44] sm:$0xf] }
  0x9e   : > { %v633_v19 = vsel %vm582_vm3, %v623_v18, 0.0  ;;  %v2232_v18 = vld [vmem:[%s3845_s6 + $0x50] sm:$0xf0] }
  0x9f   : > { %634 = vadd.xlane.f32.xlu1 %v633_v19  ;;  %v2231_v19 = vor.u32 %v2646_v15, %v2230_v10 }
  0xa1   : > { %v567_v20 = vpop.f32.mrf.mxu0  ;;  %947 = vmatpush.bf16.msra.mxu1 %v2231_v19 }
  0xa2   : > { %v2954_v21 = vadd.f32 %v2789_v9, %v567_v20  ;;  %v2235_v20 = vor.u32 %v2644_v17, %v2232_v18 }
  0xa4   : > { %v589_v22 = vsel %vm582_vm3, %v2954_v21, 0.0  ;;  %v624_v23 = vmul.f32 %v2954_v21, %v2954_v21  ;;  %976 = vmatpush.bf16.msra.mxu2 %v2235_v20 }
  0xa5   : > { %590 = vadd.xlane.f32.xlu2 %v589_v22  ;;  %v2238_v22 = vld [vmem:[%s3845_s6 + $0x48] sm:$0xf] }
  0xa6   : > { %v636_v24 = vsel %vm582_vm3, %v624_v23, 0.0  ;;  %v2647_v23 = vld [vmem:[%s3845_s6 + $0x54] sm:$0xf0] }
  0xa7   : > { %637 = vadd.xlane.f32.xlu0 %v636_v24 }
  0xa9   : > { %v569_v25 = vpop.f32.mrf.mxu0 }
  0xaa   : > { %v2961_v26 = vadd.f32 %v2789_v9, %v569_v25  ;;  %v2239_v25 = vor.u32 %v2647_v23, %v2238_v22 }
  0xac   : > { %v592_v27 = vsel %vm582_vm3, %v2961_v26, 0.0  ;;  %v625_v28 = vmul.f32 %v2961_v26, %v2961_v26  ;;  %1005 = vmatpush.bf16.msra.mxu3 %v2239_v25 }
  0xad   : > { %593 = vadd.xlane.f32.xlu2 %v592_v27  ;;  %v2641_v27 = vld [vmem:[%s3845_s6 + $0x2c] sm:$0xf] }
  0xae   : > { %v639_v29 = vsel %vm582_vm3, %v625_v28, 0.0  ;;  %v2224_v28 = vld [vmem:[%s3845_s6 + $0x38] sm:$0xf0] }
  0xaf   : > { %640 = vadd.xlane.f32.xlu1 %v639_v29  ;;  %v2214_v29 = vld [vmem:[%s3845_s6 + $0x20] sm:$0xf]  ;;  %v2227_v31 = vor.u32 %v2641_v27, %v2224_v28 }
  0xb1   : > { %v572_v33 = vpop.f32.mrf.mxu0 }
  0xb2   : > { %v2974_v34 = vadd.f32 %v2789_v9, %v572_v33  ;;  %v2640_v33 = vld [vmem:[%s3845_s6 + $0x24] sm:$0xf] }
  0xb4   : > { %v595_v35 = vsel %vm582_vm3, %v2974_v34, 0.0  ;;  %v626_v36 = vmul.f32 %v2974_v34, %v2974_v34 }
  0xb5   : > { %596 = vadd.xlane.f32.xlu2 %v595_v35 }
  0xb6   : > { %v642_v37 = vsel %vm582_vm3, %v626_v36, 0.0  ;;  %v2215_v36 = vor.u32 %v2642_v32, %v2214_v29 }
  0xb7   : > { %643 = vadd.xlane.f32.xlu1 %v642_v37  ;;  %v2216_v37 = vld [vmem:[%s3845_s6 + $0x30] sm:$0xf0] }
  0xb8   : > { %948 = vmatpush.bf16.msra.mxu1 %v2215_v36 }
  0xb9   : > { %v574_v38 = vpop.f32.mrf.mxu0 }
  0xba   : > { %v2981_v39 = vadd.f32 %v2789_v9, %v574_v38  ;;  %v2222_v38 = vld [vmem:[%s3845_s6 + $0x28] sm:$0xf] }
  0xbc   : > { %v598_v40 = vsel %vm582_vm3, %v2981_v39, 0.0  ;;  %v627_v41 = vmul.f32 %v2981_v39, %v2981_v39 }
  0xbd   : > { %599 = vadd.xlane.f32.xlu0 %v598_v40  ;;  %v2643_v40 = vld [vmem:[%s3845_s6 + $0x34] sm:$0xf0] }
  0xbe   : > { %v645_v42 = vsel %vm582_vm3, %v627_v41, 0.0 }
  0xbf   : > { %646 = vadd.xlane.f32.xlu2 %v645_v42 }
  0xc1   : > { %v577_v43 = vpop.f32.mrf.mxu0 }
  0xc2   : > { %v2988_v44 = vadd.f32 %v2789_v9, %v577_v43  ;;  %v2219_v43 = vor.u32 %v2640_v33, %v2216_v37 }
  0xc4   : > { %v601_v45 = vsel %vm582_vm3, %v2988_v44, 0.0  ;;  %v628_v46 = vmul.f32 %v2988_v44, %v2988_v44  ;;  %977 = vmatpush.bf16.msra.mxu2 %v2219_v43 }
  0xc5   : > { %602 = vadd.xlane.f32.xlu0 %v601_v45  ;;  %v2223_v45 = vor.u32 %v2643_v40, %v2222_v38 }
  0xc6   : > { %v648_v47 = vsel %vm582_vm3, %v628_v46, 0.0 }
  0xc7   : > { %649 = vadd.xlane.f32.xlu2 %v648_v47  ;;  %v2198_v47 = vld [vmem:[%s3845_s6] sm:$0xf]  ;;  %1006 = vmatpush.bf16.msra.mxu3 %v2223_v45 }
  0xc9   : > { %v579_v48 = vpop.f32.mrf.mxu0 }
  0xca   : > { %v2995_v49 = vadd.f32 %v2789_v9, %v579_v48  ;;  %v2240_v9 = vld [vmem:[%s3845_s6 + $0x58] sm:$0xf0]  ;;  %v2638_v48 = vld [vmem:[%s3845_s6 + $0xc] sm:$0xf0] }
  0xcb   : > { %v2243_v14 = vor.u32 %v2645_v8, %v2240_v9  ;;  %v2199_v56 = vor.u32 %v2638_v48, %v2198_v47  ;;  %1007 = vmatpush.bf16.msra.mxu3 %v2207_v58 }
  0xcc   : > { %v604_v50 = vsel %vm582_vm3, %v2995_v49, 0.0  ;;  %v629_v51 = vmul.f32 %v2995_v49, %v2995_v49 }
  0xcd   : > { %605 = vadd.xlane.f32.xlu1 %v604_v50  ;;  %1034 = vmatpush.bf16.msrb.mxu0 %v2243_v14  ;;  %v2636_v50 = vld [vmem:[%s3845_s6 + $0x4] sm:$0xf] }
  0xce   : > { %v651_v52 = vsel %vm582_vm3, %v629_v51, 0.0  ;;  %949 = vmatpush.bf16.msra.mxu1 %v2199_v56 }
  0xcf   : > { %652 = vadd.xlane.f32.xlu0 %v651_v52  ;;  %v2200_v52 = vld [vmem:[%s3845_s6 + $0x10] sm:$0xf0] }
  0xd0   : > { %v2203_v57 = vor.u32 %v2636_v50, %v2200_v52 }
  0xd1   : > { %1035 = vmatpush.bf16.msrb.mxu0 %v2227_v31 }
  0xd2   : > { %978 = vmatpush.bf16.msra.mxu2 %v2203_v57 }
  0xd5   : > { %1036 = vmatpush.bf16.msrb.mxu0 %v2211_v62 }
 0x108   : > { %v585_v3 = vpop.xlane.xlu0 %584 }
 0x109   : > { %v3023_v6 = vmul.f32 %v3002_v59, %v585_v3 }
 0x10a   : > { %v632_v7 = vpop.xlane.xlu1 %631 }
 0x10b   : > { %v662_v12 = vmul.f32 %v3023_v6, %v3023_v6  ;;  %v654_v13 = vmul.f32 %v632_v7, %v3002_v59  ;;  %v686_v31 = vsub.f32 %v2940_v11, %v3023_v6 }
 0x10d   : > { %v670_v24 = vsub.f32 %v654_v13, %v662_v12 }
 0x10f   : > { %v678_v30 = vmax.f32 %v670_v24, 0.0 }
 0x110   : > { %v588_v35 = vpop.xlane.xlu0 %587 }
 0x111   : > { %v694_v41 = vadd.f32 1e-06, %v678_v30  ;;  %v3077_v42 = vmul.f32 %v3002_v59, %v588_v35 }
 0x112   : > { %v635_v46 = vpop.xlane.xlu1 %634 }
 0x113   : > { %2796 = vrsqrt.f32 %v694_v41  ;;  %v663_v51 = vmul.f32 %v3077_v42, %v3077_v42  ;;  %v655_v55 = vmul.f32 %v635_v46, %v3002_v59  ;;  %vm708_vm6 = vweird.f32 %v694_v41 }
 0x114   : > { %v687_v48 = vsub.f32 %v2947_v16, %v3077_v42 }
 0x115   : > { %v671_v63 = vsub.f32 %v655_v55, %v663_v51 }
 0x117   : > { %v679_v0 = vmax.f32 %v671_v63, 0.0 }
 0x118   : > { %v591_v1 = vpop.xlane.xlu2 %590 }
 0x119   : > { %v2797_v2 = vpop.eup %2796  ;;  %v3107_v3 = vmul.f32 %v3002_v59, %v591_v1  ;;  %v695_v5 = vadd.f32 1e-06, %v679_v0 }
 0x11a   : > { %v703_v4 = vmul.f32 %v2797_v2, %v694_v41  ;;  %v638_v7 = vpop.xlane.xlu0 %637  ;;  %vm709_vm5 = vweird.f32 %v2797_v2  ;;  %v3126_v41 = vld [vmem:[%s3843_s4] ss:$0 sm:$0xff] }
 0x11b   : > { %v664_v8 = vmul.f32 %v3107_v3, %v3107_v3  ;;  %v656_v9 = vmul.f32 %v638_v7, %v3002_v59  ;;  %2798 = vrsqrt.f32 %v695_v5  ;;  %vm710_vm7 = vmor %vm708_vm6, %vm709_vm5  ;;  %vm718_vm9 = vweird.f32 %v695_v5 }
 0x11c   : > { %v704_v10 = vmul.f32 %v2797_v2, %v703_v4 }
 0x11d   : > { %v672_v12 = vsub.f32 %v656_v9, %v664_v8 }
 0x11e   : > { %v705_v13 = vmul.f32 0.5, %v704_v10 }
 0x11f   : > { %v680_v14 = vmax.f32 %v672_v12, 0.0 }
 0x120   : > { %v706_v15 = vsub.f32 1.5, %v705_v13  ;;  %v594_v17 = vpop.xlane.xlu2 %593 }
 0x121   : > { %v696_v18 = vadd.f32 1e-06, %v680_v14  ;;  %v3113_v19 = vmul.f32 %v3002_v59, %v594_v17  ;;  %v2799_v20 = vpop.eup %2798  ;;  %v688_v14 = vsub.f32 %v2954_v21, %v3107_v3 }
 0x122   : > { %v707_v22 = vmul.f32 %v2797_v2, %v706_v15  ;;  %v641_v23 = vpop.xlane.xlu1 %640  ;;  %v713_v24 = vmul.f32 %v2799_v20, %v695_v5  ;;  %vm719_vm8 = vweird.f32 %v2799_v20 }
 0x123   : > { %2800 = vrsqrt.f32 %v696_v18  ;;  %v665_v25 = vmul.f32 %v3113_v19, %v3113_v19  ;;  %v657_v27 = vmul.f32 %v641_v23, %v3002_v59  ;;  %vm720_vm10 = vmor %vm718_vm9, %vm719_vm8  ;;  %vm728_vm12 = vweird.f32 %v696_v18 }
 0x124   : > { %v714_v28 = vmul.f32 %v2799_v20, %v713_v24  ;;  %v711_v29 = vsel %vm710_vm7, %v2797_v2, %v707_v22 }
 0x125   : > { %v673_v30 = vsub.f32 %v657_v27, %v665_v25  ;;  %v782_v37 = vmul.f32 %v711_v29, %v686_v31  ;;  %v689_v31 = vsub.f32 %v2961_v26, %v3113_v19 }
 0x126   : > { %v715_v32 = vmul.f32 0.5, %v714_v28 }
 0x127   : > { %v681_v33 = vmax.f32 %v673_v30, 0.0  ;;  %v793_v53 = vmul.f32 %v3126_v41, %v782_v37 }
 0x128   : > { %v597_v35 = vpop.xlane.xlu2 %596  ;;  %v716_v38 = vsub.f32 1.5, %v715_v32 }
 0x129   : > { %v2801_v36 = vpop.eup %2800  ;;  %v3121_v40 = vmul.f32 %v3002_v59, %v597_v35  ;;  %v697_v45 = vadd.f32 1e-06, %v681_v33  ;;  %v804_v62 = vadd.f32 %v3137_v54, %v793_v53 }
 0x12a   : > { %v723_v43 = vmul.f32 %v2801_v36, %v696_v18  ;;  %v644_v46 = vpop.xlane.xlu1 %643  ;;  %v717_v47 = vmul.f32 %v2799_v20, %v716_v38  ;;  %vm729_vm11 = vweird.f32 %v2801_v36 }
 0x12b   : > { %v666_v11 = vmul.f32 %v3121_v40, %v3121_v40  ;;  %v658_v6 = vmul.f32 %v644_v46, %v3002_v59  ;;  %2802 = vrsqrt.f32 %v697_v45  ;;  %vm730_vm13 = vmor %vm728_vm12, %vm729_vm11  ;;  %v812_v9 = vmax.f32 %v804_v62, 0.0 }
 0x12c   : > { %v724_v50 = vmul.f32 %v2801_v36, %v723_v43  ;;  %v721_v51 = vsel %vm720_vm10, %v2799_v20, %v717_v47  ;;  %vm738_vm15 = vweird.f32 %v697_v45 }
 0x12d   : > { %v674_v52 = vsub.f32 %v658_v6, %v666_v11  ;;  %v783_v55 = vmul.f32 %v721_v51, %v687_v48 }
 0x12e   : > { %v725_v56 = vmul.f32 0.5, %v724_v50 }
 0x12f   : > { %v682_v57 = vmax.f32 %v674_v52, 0.0  ;;  %v794_v61 = vmul.f32 %v3126_v41, %v783_v55 }
 0x130   : > { %v726_v58 = vsub.f32 1.5, %v725_v56  ;;  %v600_v60 = vpop.xlane.xlu0 %599 }
 0x131   : > { %v3140_v16 = vadd.f32 1e-06, %v682_v57  ;;  %v3143_v42 = vmul.f32 %v3002_v59, %v600_v60  ;;  %v2803_v63 = vpop.eup %2802  ;;  %v805_v2 = vadd.f32 %v3137_v54, %v794_v61  ;;  %v690_v61 = vsub.f32 %v2974_v34, %v3121_v40  ;;  %v2398_v34 = vld [vmem:[%s3846_s7 + $0xf0] sm:$0xf]  ;;  %v2683_v40 = vld [vmem:[%s3846_s7 + $0xf4] sm:$0xf0] }
 0x132   : > { %v727_v0 = vmul.f32 %v2801_v36, %v726_v58  ;;  %v647_v1 = vpop.xlane.xlu2 %646  ;;  %v733_v4 = vmul.f32 %v2803_v63, %v697_v45  ;;  %vm739_vm14 = vweird.f32 %v2803_v63 }
 0x133   : > { %2804 = vrsqrt.f32 %v3140_v16  ;;  %v667_v5 = vmul.f32 %v3143_v42, %v3143_v42  ;;  %v659_v7 = vmul.f32 %v647_v1, %v3002_v59  ;;  %v813_v10 = vmax.f32 %v805_v2, 0.0  ;;  %vm740_vm0 = vmor %vm738_vm15, %vm739_vm14 }
 0x134   : > { %v734_v8 = vmul.f32 %v2803_v63, %v733_v4  ;;  %v731_v12 = vsel %vm730_vm13, %v2801_v36, %v727_v0  ;;  %vm748_vm2 = vweird.f32 %v3140_v16 }
 0x135   : > { %v675_v13 = vsub.f32 %v659_v7, %v667_v5  ;;  %v820_v17 = vpack.c.bf16 %v813_v10, %v812_v9  ;;  %v784_v18 = vmul.f32 %v731_v12, %v688_v14  ;;  %v691_v7 = vsub.f32 %v2981_v39, %v3143_v42  ;;  %v2462_v12 = vld [vmem:[%s3846_s7 + $0x170] sm:$0xf]  ;;  %v2661_v9 = vld [vmem:[%s3846_s7 + $0x44] sm:$0xf0] }
 0x136   : > { %v735_v15 = vmul.f32 0.5, %v734_v8  ;;  %v2399_v10 = vor.u32 %v2683_v40, %v2398_v34 }
 0x137   : > { %v683_v20 = vmax.f32 %v675_v13, 0.0  ;;  %2260 = vmatmul.msk.bf16.vlgmr.msra.gmra.mxu1 %vm582_vm3, %v820_v17  ;;  %2264 = vmatmul.msk.bf16.vlgmr.msra.gmra.mxu2 %vm582_vm3, %v820_v17  ;;  %v795_v36 = vmul.f32 %v3126_v41, %v784_v18  ;;  %v2699_v13 = vld [vmem:[%s3846_s7 + $0x174] sm:$0xf0]  ;;  %v2681_v18 = vld [vmem:[%s3846_s7 + $0xe4] sm:$0xf0] }
 0x138   : > { %v603_v22 = vpop.xlane.xlu0 %602  ;;  %v736_v24 = vsub.f32 1.5, %v735_v15  ;;  %2268 = vmatmul.msk.bf16.vlgmr.msra.gmra.mxu3 %vm582_vm3, %v820_v17  ;;  %2272 = vmatmul.msk.bf16.vlgmr.msrb.gmra.mxu0 %vm582_vm3, %v820_v17  ;;  %v2463_v42 = vor.u32 %v2699_v13, %v2462_v12  ;;  %v2334_v15 = vld [vmem:[%s3846_s7 + $0x70] sm:$0xf]  ;;  %v2667_v17 = vld [vmem:[%s3846_s7 + $0x74] sm:$0xf0] }
 0x139   : > { %v2805_v23 = vpop.eup %2804  ;;  %v3156_v25 = vmul.f32 %v3002_v59, %v603_v22  ;;  %v699_v28 = vadd.f32 1e-06, %v683_v20  ;;  %v806_v26 = vadd.f32 %v3137_v54, %v795_v36  ;;  %v2390_v20 = vld [vmem:[%s3846_s7 + $0xe0] sm:$0xf]  ;;  %1525 = vmatpush.bf16.msrb.mxu2 %v2399_v10  ;;  %v2382_v36 = vld [vmem:[%s3846_s7 + $0xd0] sm:$0xf] }
 0x13a   : > { %v743_v27 = vmul.f32 %v2805_v23, %v3140_v16  ;;  %v650_v21 = vpop.xlane.xlu2 %649  ;;  %v737_v3 = vmul.f32 %v2803_v63, %v736_v24  ;;  %vm749_vm1 = vweird.f32 %v2805_v23  ;;  %v2454_v24 = vld [vmem:[%s3846_s7 + $0x160] sm:$0xf]  ;;  %1554 = vmatpush.bf16.msrb.mxu3 %v2463_v42  ;;  %v2366_v12 = vld [vmem:[%s3846_s7 + $0xb0] sm:$0xf]  ;;  %v2675_v42 = vld [vmem:[%s3846_s7 + $0xb4] sm:$0xf0] }
 0x13b   : > { %v668_v29 = vmul.f32 %v3156_v25, %v3156_v25  ;;  %v660_v30 = vmul.f32 %v650_v21, %v3002_v59  ;;  %2806 = vrsqrt.f32 %v699_v28  ;;  %vm750_vm4 = vmor %vm748_vm2, %vm749_vm1  ;;  %v814_v58 = vmax.f32 %v806_v26, 0.0 }
 0x13c   : > { %v744_v32 = vmul.f32 %v2805_v23, %v743_v27  ;;  %v741_v33 = vsel %vm740_vm0, %v2803_v63, %v737_v3  ;;  %vm758_vm6 = vweird.f32 %v699_v28  ;;  %v2697_v27 = vld [vmem:[%s3846_s7 + $0x164] sm:$0xf0]  ;;  %v2391_v3 = vor.u32 %v2681_v18, %v2390_v20  ;;  %v2691_v20 = vld [vmem:[%s3846_s7 + $0x134] sm:$0xf0] }
 0x13d   : > { %v676_v35 = vsub.f32 %v660_v30, %v668_v29  ;;  %v785_v37 = vmul.f32 %v741_v33, %v689_v31  ;;  %v2455_v29 = vor.u32 %v2697_v27, %v2454_v24  ;;  %v2526_v30 = vld [vmem:[%s3846_s7 + $0x1f0] sm:$0xf]  ;;  %v2715_v31 = vld [vmem:[%s3846_s7 + $0x1f4] sm:$0xf0]  ;;  %v2326_v33 = vld [vmem:[%s3846_s7 + $0x60] sm:$0xf]  ;;  %v692_v10 = vsub.f32 %v2988_v44, %v3156_v25 }
 0x13e   : > { %v745_v38 = vmul.f32 0.5, %v744_v32  ;;  %v2527_v32 = vor.u32 %v2715_v31, %v2526_v30  ;;  %1526 = vmatpush.bf16.msrb.mxu2 %v2391_v3  ;;  %v2302_v24 = vld [vmem:[%s3846_s7 + $0x30] sm:$0xf]  ;;  %v2659_v27 = vld [vmem:[%s3846_s7 + $0x34] sm:$0xf0] }
 0x13f   : > { %v684_v43 = vmax.f32 %v676_v35, 0.0  ;;  %v796_v47 = vmul.f32 %v3126_v41, %v785_v37  ;;  %v2665_v35 = vld [vmem:[%s3846_s7 + $0x64] sm:$0xf0]  ;;  %1555 = vmatpush.bf16.msrb.mxu3 %v2455_v29  ;;  %v2367_v29 = vor.u32 %v2675_v42, %v2366_v12  ;;  %v2303_v31 = vor.u32 %v2659_v27, %v2302_v24  ;;  %v2342_v12 = vld [vmem:[%s3846_s7 + $0x80] sm:$0xf] }
 0x140   : > { %v746_v46 = vsub.f32 1.5, %v745_v38  ;;  %v606_v45 = vpop.xlane.xlu1 %605  ;;  %1583 = vmatpush.bf16.msra.mxu0 %v2527_v32  ;;  %v2673_v32 = vld [vmem:[%s3846_s7 + $0xa4] sm:$0xf0]  ;;  %v2336_v24 = vld [vmem:[%s3846_s7 + $0x78] sm:$0xf0] }
 0x141   : > { %v3168_v11 = vadd.f32 1e-06, %v684_v43  ;;  %v3171_v6 = vmul.f32 %v3002_v59, %v606_v45  ;;  %v2807_v19 = vpop.eup %2806  ;;  %v807_v51 = vadd.f32 %v3137_v54, %v796_v47  ;;  %v2679_v45 = vld [vmem:[%s3846_s7 + $0xd4] sm:$0xf0]  ;;  %v2446_v47 = vld [vmem:[%s3846_s7 + $0x150] sm:$0xf] }
 0x142   : > { %v747_v48 = vmul.f32 %v2805_v23, %v746_v46  ;;  %v653_v50 = vpop.xlane.xlu0 %652  ;;  %v753_v52 = vmul.f32 %v2807_v19, %v699_v28  ;;  %vm759_vm5 = vweird.f32 %v2807_v19  ;;  %v2327_v46 = vor.u32 %v2665_v35, %v2326_v33  ;;  %v2422_v33 = vld [vmem:[%s3846_s7 + $0x120] sm:$0xf]  ;;  %v2689_v35 = vld [vmem:[%s3846_s7 + $0x124] sm:$0xf0]  ;;  %v2680_v27 = vld [vmem:[%s3846_s7 + $0xe4] sm:$0xf] }
 0x143   : > { %2808 = vrsqrt.f32 %v3168_v11  ;;  %v669_v53 = vmul.f32 %v3171_v6, %v3171_v6  ;;  %v661_v55 = vmul.f32 %v653_v50, %v3002_v59  ;;  %v815_v60 = vmax.f32 %v807_v51, 0.0  ;;  %vm3201_vm7 = vmor %vm758_vm6, %vm759_vm5  ;;  %v2713_v50 = vld [vmem:[%s3846_s7 + $0x1e4] sm:$0xf0] }
 0x144   : > { %v751_v56 = vsel %vm750_vm4, %v2805_v23, %v747_v48  ;;  %v754_v57 = vmul.f32 %v2807_v19, %v753_v52  ;;  %v2335_v23 = vor.u32 %v2667_v17, %v2334_v15  ;;  %v2383_v26 = vor.u32 %v2679_v45, %v2382_v36  ;;  %v2518_v48 = vld [vmem:[%s3846_s7 + $0x1e0] sm:$0xf]  ;;  %v2430_v15 = vld [vmem:[%s3846_s7 + $0x130] sm:$0xf]  ;;  %v2685_v42 = vld [vmem:[%s3846_s7 + $0x104] sm:$0xf0] }
 0x145   : > { %v677_v62 = vsub.f32 %v661_v55, %v669_v53  ;;  %v821_v0 = vpack.c.bf16 %v815_v60, %v814_v58  ;;  %v786_v16 = vmul.f32 %v751_v56, %v690_v61  ;;  %v2519_v56 = vor.u32 %v2713_v50, %v2518_v48  ;;  %v2663_v58 = vld [vmem:[%s3846_s7 + $0x54] sm:$0xf0] }
 0x146   : > { %v755_v63 = vmul.f32 0.5, %v754_v57  ;;  %1496 = vmatpush.bf16.msrb.mxu1 %v2335_v23  ;;  %v2318_v57 = vld [vmem:[%s3846_s7 + $0x50] sm:$0xf]  ;;  %vm768_vm9 = vweird.f32 %v3168_v11  ;;  %1527 = vmatpush.bf16.msrb.mxu2 %v2383_v26  ;;  %v2709_v23 = vld [vmem:[%s3846_s7 + $0x1c4] sm:$0xf0]  ;;  %v2431_v30 = vor.u32 %v2691_v20, %v2430_v15  ;;  %v2423_v45 = vor.u32 %v2689_v35, %v2422_v33 }
 0x147   : > { %v685_v1 = vmax.f32 %v677_v62, 0.0  ;;  %2261 = vmatmul.msk.bf16.gmra.mxu1 %vm582_vm3, %v821_v0  ;;  %2265 = vmatmul.msk.bf16.gmra.mxu2 %vm582_vm3, %v821_v0  ;;  %v797_v39 = vmul.f32 %v3126_v41, %v786_v16  ;;  %v2319_v61 = vor.u32 %v2663_v58, %v2318_v57  ;;  %v2374_v62 = vld [vmem:[%s3846_s7 + $0xc0] sm:$0xf]  ;;  %v2350_v58 = vld [vmem:[%s3846_s7 + $0x90] sm:$0xf] }
 0x148   : > { %v756_v4 = vsub.f32 1.5, %v755_v63  ;;  %2269 = vmatmul.msk.bf16.gmra.mxu3 %vm582_vm3, %v821_v0  ;;  %2273 = vmatmul.msk.bf16.gmra.mxu0 %vm582_vm3, %v821_v0  ;;  %v2677_v63 = vld [vmem:[%s3846_s7 + $0xc4] sm:$0xf0]  ;;  %v2438_v0 = vld [vmem:[%s3846_s7 + $0x140] sm:$0xf] }
 0x149   : > { %v3182_v2 = vpop.eup %2808  ;;  %v3188_v5 = vadd.f32 1e-06, %v685_v1  ;;  %v808_v43 = vadd.f32 %v3137_v54, %v797_v39  ;;  %1584 = vmatpush.bf16.msra.mxu0 %v2519_v56  ;;  %v2705_v56 = vld [vmem:[%s3846_s7 + $0x1a4] sm:$0xf0]  ;;  %v2698_v20 = vld [vmem:[%s3846_s7 + $0x174] sm:$0xf] }
 0x14a   : > { %v763_v59 = vmul.f32 %v3182_v2, %v3168_v11  ;;  %v757_v8 = vmul.f32 %v2807_v19, %v756_v4  ;;  %vm769_vm8 = vweird.f32 %v3182_v2  ;;  %1497 = vmatpush.bf16.msrb.mxu1 %v2327_v46  ;;  %v2693_v4 = vld [vmem:[%s3846_s7 + $0x144] sm:$0xf0]  ;;  %v2528_v35 = vld [vmem:[%s3846_s7 + $0x1f8] sm:$0xf0] }
 0x14b   : > { %2810 = vrsqrt.f32 %v3188_v5  ;;  %vm3291_vm10 = vmor %vm768_vm9, %vm769_vm8  ;;  %v816_v16 = vmax.f32 %v808_v43, 0.0  ;;  %v2439_v39 = vor.u32 %v2693_v4, %v2438_v0  ;;  %vm778_vm12 = vweird.f32 %v3188_v5  ;;  %v2478_v0 = vld [vmem:[%s3846_s7 + $0x190] sm:$0xf] }
 0x14c   : > { %v764_v14 = vmul.f32 %v3182_v2, %v763_v59  ;;  %v761_v22 = vsel %vm3201_vm7, %v2807_v19, %v757_v8  ;;  %v2695_v19 = vld [vmem:[%s3846_s7 + $0x154] sm:$0xf0]  ;;  %v2510_v59 = vld [vmem:[%s3846_s7 + $0x1d0] sm:$0xf]  ;;  %v2310_v8 = vld [vmem:[%s3846_s7 + $0x40] sm:$0xf] }
 0x14d   : > { %v787_v28 = vmul.f32 %v761_v22, %v691_v7  ;;  %v2447_v55 = vor.u32 %v2695_v19, %v2446_v47  ;;  %v2711_v7 = vld [vmem:[%s3846_s7 + $0x1d4] sm:$0xf0]  ;;  %v2311_v25 = vor.u32 %v2661_v9, %v2310_v8  ;;  %v2502_v22 = vld [vmem:[%s3846_s7 + $0x1c0] sm:$0xf]  ;;  %v2414_v4 = vld [vmem:[%s3846_s7 + $0x110] sm:$0xf] }
 0x14e   : > { %v765_v21 = vmul.f32 0.5, %v764_v14  ;;  %1498 = vmatpush.bf16.msrb.mxu1 %v2319_v61  ;;  %v2375_v14 = vor.u32 %v2677_v63, %v2374_v62  ;;  %v2511_v44 = vor.u32 %v2711_v7, %v2510_v59  ;;  %v2286_v62 = vld [vmem:[%s3846_s7 + $0x10] sm:$0xf]  ;;  %v2655_v63 = vld [vmem:[%s3846_s7 + $0x14] sm:$0xf0] }
 0x14f   : > { %v798_v38 = vmul.f32 %v3126_v41, %v787_v28  ;;  %1556 = vmatpush.bf16.msrb.mxu3 %v2447_v55  ;;  %v693_v28 = vsub.f32 %v2995_v49, %v3171_v6  ;;  %v2358_v49 = vld [vmem:[%s3846_s7 + $0xa0] sm:$0xf]  ;;  %v2287_v11 = vor.u32 %v2655_v63, %v2286_v62  ;;  %v2687_v59 = vld [vmem:[%s3846_s7 + $0x114] sm:$0xf0]  ;;  %v2653_v7 = vld [vmem:[%s3846_s7 + $0x4] sm:$0xf0] }
 0x150   : > { %v766_v37 = vsub.f32 1.5, %v765_v21  ;;  %1528 = vmatpush.bf16.msrb.mxu2 %v2375_v14  ;;  %1585 = vmatpush.bf16.msra.mxu0 %v2511_v44  ;;  %v2359_v46 = vor.u32 %v2673_v32, %v2358_v49  ;;  %v2470_v8 = vld [vmem:[%s3846_s7 + $0x180] sm:$0xf]  ;;  %v2701_v9 = vld [vmem:[%s3846_s7 + $0x184] sm:$0xf0] }
 0x151   : > { %v3267_v51 = vpop.eup %2810  ;;  %v809_v53 = vadd.f32 %v3137_v54, %v798_v38  ;;  %v2707_v38 = vld [vmem:[%s3846_s7 + $0x1b4] sm:$0xf0]  ;;  %v2400_v44 = vld [vmem:[%s3846_s7 + $0xf8] sm:$0xf0]  ;;  %v2712_v63 = vld [vmem:[%s3846_s7 + $0x1e4] sm:$0xf] }
 0x152   : > { %v767_v52 = vmul.f32 %v3182_v2, %v766_v37  ;;  %v773_v60 = vmul.f32 %v3267_v51, %v3188_v5  ;;  %vm779_vm11 = vweird.f32 %v3267_v51  ;;  %1499 = vmatpush.bf16.msrb.mxu1 %v2311_v25  ;;  %v2503_v5 = vor.u32 %v2709_v23, %v2502_v22  ;;  %v2494_v37 = vld [vmem:[%s3846_s7 + $0x1b0] sm:$0xf]  ;;  %v2464_v22 = vld [vmem:[%s3846_s7 + $0x178] sm:$0xf0] }
 0x153   : > { %v817_v1 = vmax.f32 %v809_v53, 0.0  ;;  %vm3351_vm13 = vmor %vm778_vm12, %vm779_vm11  ;;  %1557 = vmatpush.bf16.msrb.mxu3 %v2439_v39  ;;  %v2495_v19 = vor.u32 %v2707_v38, %v2494_v37  ;;  %v2486_v53 = vld [vmem:[%s3846_s7 + $0x1a0] sm:$0xf]  ;;  %v2467_v23 = vor.u32 %v2698_v20, %v2464_v22  ;;  %v2664_v38 = vld [vmem:[%s3846_s7 + $0x64] sm:$0xf] }
 0x154   : > { %v771_v34 = vsel %vm3291_vm10, %v3182_v2, %v767_v52  ;;  %v774_v40 = vmul.f32 %v3267_v51, %v773_v60  ;;  %1529 = vmatpush.bf16.msrb.mxu2 %v2367_v29  ;;  %1586 = vmatpush.bf16.msra.mxu0 %v2503_v5  ;;  %v2487_v57 = vor.u32 %v2705_v56, %v2486_v53  ;;  %v2671_v60 = vld [vmem:[%s3846_s7 + $0x94] sm:$0xf0]  ;;  %v2406_v39 = vld [vmem:[%s3846_s7 + $0x100] sm:$0xf]  ;;  %v2456_v5 = vld [vmem:[%s3846_s7 + $0x168] sm:$0xf0] }
 0x155   : > { %v822_v2 = vpack.c.bf16 %v817_v1, %v816_v16  ;;  %v788_v17 = vmul.f32 %v771_v34, %v692_v10  ;;  %v2351_v61 = vor.u32 %v2671_v60, %v2350_v58  ;;  %v2703_v16 = vld [vmem:[%s3846_s7 + $0x194] sm:$0xf0]  ;;  %v2278_v34 = vld [vmem:[%s3846_s7] sm:$0xf]  ;;  %v2407_v15 = vor.u32 %v2685_v42, %v2406_v39  ;;  %v2448_v58 = vld [vmem:[%s3846_s7 + $0x158] sm:$0xf0] }
 0x156   : > { %v775_v13 = vmul.f32 0.5, %v774_v40  ;;  %1500 = vmatpush.bf16.msrb.mxu1 %v2303_v31  ;;  %v2479_v1 = vor.u32 %v2703_v16, %v2478_v0  ;;  %v2415_v40 = vor.u32 %v2687_v59, %v2414_v4  ;;  %v2279_v10 = vor.u32 %v2653_v7, %v2278_v34  ;;  %v840_v29 = vld [vmem:[%s486_s18] sm:$0xf]  ;;  %v2714_v31 = vld [vmem:[%s3846_s7 + $0x1f4] sm:$0xf] }
 0x157   : > { %2262 = vmatmul.msk.bf16.gmra.mxu1 %vm582_vm3, %v822_v2  ;;  %2266 = vmatmul.msk.bf16.gmra.mxu2 %vm582_vm3, %v822_v2  ;;  %v799_v6 = vmul.f32 %v3126_v41, %v788_v17  ;;  %v2682_v17 = vld [vmem:[%s3846_s7 + $0xf4] sm:$0xf]  ;;  %v3481_v32 = vperm.slane %v840_v29, 0  ;;  %v2531_v37 = vor.u32 %v2714_v31, %v2528_v35  ;;  %v2520_v0 = vld [vmem:[%s3846_s7 + $0x1e8] sm:$0xf0] }
 0x158   : > { %v776_v18 = vsub.f32 1.5, %v775_v13  ;;  %2270 = vmatmul.msk.bf16.gmra.mxu3 %vm582_vm3, %v822_v2  ;;  %2274 = vmatmul.msk.bf16.gmra.mxu0 %vm582_vm3, %v822_v2  ;;  %v2471_v2 = vor.u32 %v2701_v9, %v2470_v8  ;;  %v2669_v13 = vld [vmem:[%s3846_s7 + $0x84] sm:$0xf0]  ;;  %v2403_v25 = vor.u32 %v2682_v17, %v2400_v44  ;;  %v2662_v4 = vld [vmem:[%s3846_s7 + $0x54] sm:$0xf] }
 0x159   : > { %1558 = vmatpush.bf16.msrb.mxu3 %v2431_v30  ;;  %v810_v26 = vadd.f32 %v3137_v54, %v799_v6  ;;  %1530 = vmatpush.bf16.msrb.mxu2 %v2359_v46  ;;  %v2343_v14 = vor.u32 %v2669_v13, %v2342_v12  ;;  %v2696_v6 = vld [vmem:[%s3846_s7 + $0x164] sm:$0xf]  ;;  %v2320_v59 = vld [vmem:[%s3846_s7 + $0x58] sm:$0xf0]  ;;  %v2376_v9 = vld [vmem:[%s3846_s7 + $0xc8] sm:$0xf0] }
 0x15a   : > { %v777_v21 = vmul.f32 %v3267_v51, %v776_v18  ;;  %1587 = vmatpush.bf16.msra.mxu0 %v2495_v19  ;;  %v2666_v18 = vld [vmem:[%s3846_s7 + $0x74] sm:$0xf]  ;;  %v2459_v33 = vor.u32 %v2696_v6, %v2456_v5  ;;  %v2323_v7 = vor.u32 %v2662_v4, %v2320_v59  ;;  %v2676_v8 = vld [vmem:[%s3846_s7 + $0xc4] sm:$0xf] }
 0x15b   : > { %v818_v50 = vmax.f32 %v810_v26, 0.0  ;;  %v2384_v26 = vld [vmem:[%s3846_s7 + $0xd8] sm:$0xf0]  ;;  %v2379_v13 = vor.u32 %v2676_v8, %v2376_v9  ;;  %v2674_v31 = vld [vmem:[%s3846_s7 + $0xb4] sm:$0xf] }
 0x15c   : > { %v781_v36 = vsel %vm3351_vm13, %v3267_v51, %v777_v21  ;;  %v2392_v21 = vld [vmem:[%s3846_s7 + $0xe8] sm:$0xf0]  ;;  %v2496_v8 = vld [vmem:[%s3846_s7 + $0x1b8] sm:$0xf0] }
 0x15d   : > { %v789_v43 = vmul.f32 %v781_v36, %v693_v28  ;;  %1559 = vmatpush.bf16.msrb.mxu3 %v2423_v45  ;;  %1531 = vmatpush.bf16.msrb.mxu2 %v2351_v61  ;;  %v2339_v28 = vor.u32 %v2666_v18, %v2336_v24  ;;  %v2395_v3 = vor.u32 %v2680_v27, %v2392_v21  ;;  %v3486_v36 = vperm.slane %v840_v29, 3  ;;  %v2440_v18 = vld [vmem:[%s3846_s7 + $0x148] sm:$0xf0]  ;;  %v2512_v21 = vld [vmem:[%s3846_s7 + $0x1d8] sm:$0xf0] }
 0x15e   : > { %1588 = vmatpush.bf16.msra.mxu0 %v2487_v57  ;;  %v2694_v57 = vld [vmem:[%s3846_s7 + $0x154] sm:$0xf] }
 0x15f   : > { %v800_v47 = vmul.f32 %v3126_v41, %v789_v43  ;;  %v2294_v41 = vld [vmem:[%s3846_s7 + $0x20] sm:$0xf]  ;;  %v2328_v43 = vld [vmem:[%s3846_s7 + $0x68] sm:$0xf0]  ;;  %v2451_v62 = vor.u32 %v2694_v57, %v2448_v58 }
 0x160   : > { %v2331_v46 = vor.u32 %v2664_v38, %v2328_v43 }
 0x161   : > { %v811_v48 = vadd.f32 %v3137_v54, %v800_v47  ;;  %v2657_v54 = vld [vmem:[%s3846_s7 + $0x24] sm:$0xf0]  ;;  %1560 = vmatpush.bf16.msrb.mxu3 %v2415_v40  ;;  %1532 = vmatpush.bf16.msrb.mxu2 %v2343_v14  ;;  %v2678_v47 = vld [vmem:[%s3846_s7 + $0xd4] sm:$0xf] }
 0x162   : > { %v2295_v55 = vor.u32 %v2657_v54, %v2294_v41  ;;  %1589 = vmatpush.bf16.msra.mxu0 %v2479_v1  ;;  %v3502_v41 = vperm.slane %v840_v29, 1  ;;  %v2523_v1 = vor.u32 %v2712_v63, %v2520_v0 }
 0x163   : > { %v819_v51 = vmax.f32 %v811_v48, 0.0 }
 0x164   : > { %1501 = vmatpush.bf16.msrb.mxu1 %v2295_v55  ;;  %v3505_v55 = vperm.slane %v840_v29, 2 }
 0x165   : > { %v823_v52 = vpack.c.bf16 %v819_v51, %v818_v50  ;;  %1561 = vmatpush.bf16.msrb.mxu3 %v2407_v15  ;;  %1641 = vmatpush.bf16.msra.mxu2 %v2403_v25  ;;  %v2387_v50 = vor.u32 %v2678_v47, %v2384_v26 }
 0x166   : > { %1590 = vmatpush.bf16.msra.mxu0 %v2471_v2 }
 0x167   : > { %2263 = vmatmul.msk.bf16.gmra.mxu1 %vm582_vm3, %v823_v52  ;;  %2267 = vmatmul.msk.bf16.gmra.mxu2 %vm582_vm3, %v823_v52 }
 0x168   : > { %2271 = vmatmul.msk.bf16.gmra.mxu3 %vm582_vm3, %v823_v52  ;;  %2275 = vmatmul.msk.bf16.gmra.mxu0 %vm582_vm3, %v823_v52 }
 0x169   : > { %1502 = vmatpush.bf16.msrb.mxu1 %v2287_v11  ;;  %1670 = vmatpush.bf16.msra.mxu3 %v2467_v23  ;;  %v2692_v23 = vld [vmem:[%s3846_s7 + $0x144] sm:$0xf] }
 0x16a   : > { %1642 = vmatpush.bf16.msra.mxu2 %v2395_v3  ;;  %1699 = vmatpush.bf16.msrb.mxu0 %v2531_v37  ;;  %v2443_v27 = vor.u32 %v2692_v23, %v2440_v18  ;;  %v2656_v18 = vld [vmem:[%s3846_s7 + $0x24] sm:$0xf] }
 0x16d   : > { %1503 = vmatpush.bf16.msrb.mxu1 %v2279_v10  ;;  %1671 = vmatpush.bf16.msra.mxu3 %v2459_v33  ;;  %v2368_v33 = vld [vmem:[%s3846_s7 + $0xb8] sm:$0xf0] }
 0x16e   : > { %1643 = vmatpush.bf16.msra.mxu2 %v2387_v50  ;;  %1700 = vmatpush.bf16.msrb.mxu0 %v2523_v1  ;;  %v2371_v38 = vor.u32 %v2674_v31, %v2368_v33  ;;  %v2352_v31 = vld [vmem:[%s3846_s7 + $0x98] sm:$0xf0]  ;;  %v2686_v33 = vld [vmem:[%s3846_s7 + $0x114] sm:$0xf] }
 0x171   : > { %1612 = vmatpush.bf16.msra.mxu1 %v2339_v28  ;;  %1672 = vmatpush.bf16.msra.mxu3 %v2451_v62  ;;  %v2710_v28 = vld [vmem:[%s3846_s7 + $0x1d4] sm:$0xf] }
 0x172   : > { %1644 = vmatpush.bf16.msra.mxu2 %v2379_v13  ;;  %v2515_v29 = vor.u32 %v2710_v28, %v2512_v21 }
 0x174   : > { %1701 = vmatpush.bf16.msrb.mxu0 %v2515_v29  ;;  %v2704_v29 = vld [vmem:[%s3846_s7 + $0x1a4] sm:$0xf] }
 0x175   : > { %1613 = vmatpush.bf16.msra.mxu1 %v2331_v46  ;;  %1673 = vmatpush.bf16.msra.mxu3 %v2443_v27  ;;  %v2296_v27 = vld [vmem:[%s3846_s7 + $0x28] sm:$0xf0] }
 0x176   : > { %1645 = vmatpush.bf16.msra.mxu2 %v2371_v38  ;;  %v2299_v21 = vor.u32 %v2656_v18, %v2296_v27 }
 0x179   : > { %1614 = vmatpush.bf16.msra.mxu1 %v2323_v7  ;;  %v2706_v7 = vld [vmem:[%s3846_s7 + $0x1b4] sm:$0xf] }
 0x1b4   : > { %v951_v30 = vpop.f32.mrf.mxu1 }
 0x1b5   : > { %v1038_v49 = vpop.f32.mrf.mxu0  ;;  %v952_v19 = vadd.f32 %v951_v30, %v3481_v32  ;;  %v2660_v30 = vld [vmem:[%s3846_s7 + $0x44] sm:$0xf] }
 0x1b6   : > { %v1039_v51 = vadd.f32 %v1038_v49, %v3486_v36  ;;  %v2312_v49 = vld [vmem:[%s3846_s7 + $0x48] sm:$0xf0] }
 0x1b7   : > { %v1058_v60 = vmax.f32 %v952_v19, 0.0  ;;  %v2315_v6 = vor.u32 %v2660_v30, %v2312_v49  ;;  %v2690_v19 = vld [vmem:[%s3846_s7 + $0x134] sm:$0xf]  ;;  %v2488_v30 = vld [vmem:[%s3846_s7 + $0x1a8] sm:$0xf0] }
 0x1b8   : > { %v1061_v11 = vmax.f32 %v1039_v51, 0.0  ;;  %v2491_v49 = vor.u32 %v2704_v29, %v2488_v30 }
 0x1b9   : > { %1615 = vmatpush.bf16.msra.mxu1 %v2315_v6 }
 0x1ba   : > { %v980_v45 = vpop.f32.mrf.mxu2 }
 0x1bb   : > { %v1009_v48 = vpop.f32.mrf.mxu3  ;;  %v981_v34 = vadd.f32 %v980_v45, %v3502_v41 }
 0x1bc   : > { %v953_v52 = vpop.f32.mrf.mxu1  ;;  %v1010_v10 = vadd.f32 %v1009_v48, %v3505_v55  ;;  %v2432_v48 = vld [vmem:[%s3846_s7 + $0x138] sm:$0xf0] }
 0x1bd   : > { %v954_v54 = vadd.f32 %v953_v52, %v3481_v32  ;;  %v1040_v53 = vpop.f32.mrf.mxu0  ;;  %v1059_v17 = vmax.f32 %v981_v34, 0.0  ;;  %v2435_v52 = vor.u32 %v2690_v19, %v2432_v48 }
 0x1be   : > { %v1041_v56 = vadd.f32 %v1040_v53, %v3486_v36  ;;  %v1060_v20 = vmax.f32 %v1010_v10, 0.0  ;;  %v2504_v53 = vld [vmem:[%s3846_s7 + $0x1c8] sm:$0xf0] }
 0x1bf   : > { %v1062_v61 = vmax.f32 %v954_v54, 0.0  ;;  %v2708_v54 = vld [vmem:[%s3846_s7 + $0x1c4] sm:$0xf]  ;;  %1674 = vmatpush.bf16.msra.mxu3 %v2435_v52 }
 0x1c0   : > { %v1065_v16 = vmax.f32 %v1041_v56, 0.0  ;;  %v2507_v58 = vor.u32 %v2708_v54, %v2504_v53  ;;  %v2652_v52 = vld [vmem:[%s3846_s7 + $0x4] sm:$0xf] }
 0x1c1   : > { %v3527_v40 = vpack.c.bf16 %v1062_v61, %v1058_v60  ;;  %v2658_v60 = vld [vmem:[%s3846_s7 + $0x34] sm:$0xf]  ;;  %v2304_v61 = vld [vmem:[%s3846_s7 + $0x38] sm:$0xf0] }
 0x1c2   : > { %v3536_v2 = vpack.c.bf16 %v1065_v16, %v1061_v11  ;;  %v982_v12 = vpop.f32.mrf.mxu2  ;;  %v2307_v0 = vor.u32 %v2658_v60, %v2304_v61  ;;  %v2672_v11 = vld [vmem:[%s3846_s7 + $0xa4] sm:$0xf]  ;;  %v2360_v16 = vld [vmem:[%s3846_s7 + $0xa8] sm:$0xf0]  ;;  %1702 = vmatpush.bf16.msrb.mxu0 %v2507_v58 }
 0x1c3   : > { %v983_v14 = vadd.f32 %v982_v12, %v3502_v41  ;;  %v1011_v39 = vpop.f32.mrf.mxu3  ;;  %1504 = vmatmul.bf16.vlgmr.msrb.gmra.mxu1 %v3527_v40  ;;  %v2363_v34 = vor.u32 %v2672_v11, %v2360_v16  ;;  %v2499_v12 = vor.u32 %v2706_v7, %v2496_v8  ;;  %v2700_v58 = vld [vmem:[%s3846_s7 + $0x184] sm:$0xf] }
 0x1c4   : > { %v1012_v42 = vadd.f32 %v1011_v39, %v3505_v55  ;;  %1591 = vmatmul.bf16.vlgmr.msra.gmra.mxu0 %v3536_v2  ;;  %v956_v15 = vpop.f32.mrf.mxu1  ;;  %1616 = vmatpush.bf16.msra.mxu1 %v2307_v0  ;;  %v2668_v0 = vld [vmem:[%s3846_s7 + $0x84] sm:$0xf] }
 0x1c5   : > { %v1063_v44 = vmax.f32 %v983_v14, 0.0  ;;  %v1043_v25 = vpop.f32.mrf.mxu0  ;;  %v957_v35 = vadd.f32 %v956_v15, %v3481_v32  ;;  %1646 = vmatpush.bf16.msra.mxu2 %v2363_v34 }
 0x1c6   : > { %v1064_v22 = vmax.f32 %v1012_v42, 0.0  ;;  %v1044_v43 = vadd.f32 %v1043_v25, %v3486_v36  ;;  %v2688_v25 = vld [vmem:[%s3846_s7 + $0x124] sm:$0xf]  ;;  %1703 = vmatpush.bf16.msrb.mxu0 %v2499_v12 }
 0x1c7   : > { %v3548_v24 = vpack.c.bf16 %v1063_v44, %v1059_v17  ;;  %v1066_v50 = vmax.f32 %v957_v35, 0.0 }
 0x1c8   : > { %v3556_v3 = vpack.c.bf16 %v1064_v22, %v1060_v20  ;;  %v1069_v56 = vmax.f32 %v1044_v43, 0.0  ;;  %v2424_v20 = vld [vmem:[%s3846_s7 + $0x128] sm:$0xf0]  ;;  %1617 = vmatpush.bf16.msra.mxu1 %v2299_v21  ;;  %v2416_v43 = vld [vmem:[%s3846_s7 + $0x118] sm:$0xf0] }
 0x1c9   : > { %1533 = vmatmul.bf16.vlgmr.msrb.gmra.mxu2 %v3548_v24  ;;  %v2427_v23 = vor.u32 %v2688_v25, %v2424_v20  ;;  %v2419_v19 = vor.u32 %v2686_v33, %v2416_v43 }
 0x1ca   : > { %1562 = vmatmul.bf16.vlgmr.msrb.gmra.mxu3 %v3556_v3  ;;  %v985_v5 = vpop.f32.mrf.mxu2  ;;  %1704 = vmatpush.bf16.msrb.mxu0 %v2491_v49 }
 0x1cb   : > { %v1014_v37 = vpop.f32.mrf.mxu3  ;;  %v986_v62 = vadd.f32 %v985_v5, %v3502_v41  ;;  %1675 = vmatpush.bf16.msra.mxu3 %v2427_v23  ;;  %v2670_v5 = vld [vmem:[%s3846_s7 + $0x94] sm:$0xf] }
 0x1cc   : > { %v958_v46 = vpop.f32.mrf.mxu1  ;;  %v1015_v1 = vadd.f32 %v1014_v37, %v3505_v55  ;;  %v2355_v38 = vor.u32 %v2670_v5, %v2352_v31 }
 0x1cd   : > { %v959_v45 = vadd.f32 %v958_v46, %v3481_v32  ;;  %v1045_v47 = vpop.f32.mrf.mxu0  ;;  %v1067_v39 = vmax.f32 %v986_v62, 0.0  ;;  %v2654_v46 = vld [vmem:[%s3846_s7 + $0x14] sm:$0xf]  ;;  %v2472_v62 = vld [vmem:[%s3846_s7 + $0x188] sm:$0xf0] }
 0x1ce   : > { %v1046_v26 = vadd.f32 %v1045_v47, %v3486_v36  ;;  %v1068_v17 = vmax.f32 %v1015_v1, 0.0  ;;  %1647 = vmatpush.bf16.msra.mxu2 %v2355_v38  ;;  %v2475_v1 = vor.u32 %v2700_v58, %v2472_v62  ;;  %v2731_v62 = vld [vmem:[%s3848_s9 + $0x78] sm:$0xff] }
 0x1cf   : > { %v1070_v51 = vmax.f32 %v959_v45, 0.0  ;;  %v2288_v45 = vld [vmem:[%s3846_s7 + $0x18] sm:$0xf0]  ;;  %1676 = vmatpush.bf16.msra.mxu3 %v2419_v19 }
 0x1d0   : > { %v1073_v57 = vmax.f32 %v1046_v26, 0.0  ;;  %v2291_v48 = vor.u32 %v2654_v46, %v2288_v45 }
 0x1d1   : > { %v3595_v63 = vpack.c.bf16 %v1070_v51, %v1066_v50  ;;  %v2702_v50 = vld [vmem:[%s3846_s7 + $0x194] sm:$0xf]  ;;  %v2480_v51 = vld [vmem:[%s3846_s7 + $0x198] sm:$0xf0] }
 0x1d2   : > { %v987_v4 = vpop.f32.mrf.mxu2  ;;  %v3604_v59 = vpack.c.bf16 %v1073_v57, %v1069_v56  ;;  %v2483_v56 = vor.u32 %v2702_v50, %v2480_v51  ;;  %v2280_v57 = vld [vmem:[%s3846_s7 + $0x8] sm:$0xf0]  ;;  %1618 = vmatpush.bf16.msra.mxu1 %v2291_v48 }
 0x1d3   : > { %v988_v9 = vadd.f32 %v987_v4, %v3502_v41  ;;  %v1016_v10 = vpop.f32.mrf.mxu3  ;;  %1509 = vmatmul.bf16.gmra.mxu1 %v3595_v63  ;;  %v2283_v61 = vor.u32 %v2652_v52, %v2280_v57  ;;  %v2344_v4 = vld [vmem:[%s3846_s7 + $0x88] sm:$0xf0] }
 0x1d4   : > { %v1017_v13 = vadd.f32 %v1016_v10, %v3505_v55  ;;  %1596 = vmatmul.bf16.gmra.mxu0 %v3604_v59  ;;  %v961_v14 = vpop.f32.mrf.mxu1  ;;  %v2347_v8 = vor.u32 %v2668_v0, %v2344_v4  ;;  %v3750_v0 = vld [vmem:[%s3847_s8] sm:$0x3]  ;;  %v2730_v4 = vld [vmem:[%s3848_s9 + $0x70] sm:$0xff] }
 0x1d5   : > { %v1071_v42 = vmax.f32 %v988_v9, 0.0  ;;  %v1048_v15 = vpop.f32.mrf.mxu0  ;;  %v962_v35 = vadd.f32 %v961_v14, %v3481_v32  ;;  %1705 = vmatpush.bf16.msrb.mxu0 %v2483_v56 }
 0x1d6   : > { %v1072_v44 = vmax.f32 %v1017_v13, 0.0  ;;  %v1049_v47 = vadd.f32 %v1048_v15, %v3486_v36  ;;  %1619 = vmatpush.bf16.msra.mxu1 %v2283_v61  ;;  %1648 = vmatpush.bf16.msra.mxu2 %v2347_v8  ;;  %v2684_v15 = vld [vmem:[%s3846_s7 + $0x104] sm:$0xf] }
 0x1d7   : > { %v3622_v22 = vpack.c.bf16 %v1071_v42, %v1067_v39  ;;  %v1074_v11 = vmax.f32 %v962_v35, 0.0 }
 0x1d8   : > { %v3630_v28 = vpack.c.bf16 %v1072_v44, %v1068_v17  ;;  %v1077_v34 = vmax.f32 %v1049_v47, 0.0  ;;  %v2408_v17 = vld [vmem:[%s3846_s7 + $0x108] sm:$0xf0] }
 0x1d9   : > { %1538 = vmatmul.bf16.gmra.mxu2 %v3622_v22  ;;  %1706 = vmatpush.bf16.msrb.mxu0 %v2475_v1  ;;  %v2411_v20 = vor.u32 %v2684_v15, %v2408_v17 }
 0x1da   : > { %1567 = vmatmul.bf16.gmra.mxu3 %v3630_v28  ;;  %v990_v6 = vpop.f32.mrf.mxu2  ;;  %1913 = vmatpush.bf16.msrb.mxu2 %v2731_v62 }
 0x1db   : > { %v1019_v37 = vpop.f32.mrf.mxu3  ;;  %v991_v9 = vadd.f32 %v990_v6, %v3502_v41  ;;  %1677 = vmatpush.bf16.msra.mxu3 %v2411_v20 }
 0x1dc   : > { %v963_v26 = vpop.f32.mrf.mxu1  ;;  %v1020_v12 = vadd.f32 %v1019_v37, %v3505_v55 }
 0x1dd   : > { %v964_v54 = vadd.f32 %v963_v26, %v3481_v32  ;;  %v1050_v53 = vpop.f32.mrf.mxu0  ;;  %v1075_v23 = vmax.f32 %v991_v9, 0.0 }
 0x1de   : > { %v1051_v60 = vadd.f32 %v1050_v53, %v3486_v36  ;;  %v1076_v21 = vmax.f32 %v1020_v12, 0.0  ;;  %1914 = vmatpush.bf16.msrb.mxu2 %v2730_v4  ;;  %v2724_v4 = vld [vmem:[%s3848_s9 + $0x40] sm:$0xff] }
 0x1df   : > { %v1078_v16 = vmax.f32 %v964_v54, 0.0 }
 0x1e0   : > { %v1081_v7 = vmax.f32 %v1051_v60, 0.0 }
 0x1e1   : > { %v3687_v10 = vpack.c.bf16 %v1078_v16, %v1074_v11  ;;  %v3753_v16 = vperm.slane %v3750_v0, 0 }
 0x1e2   : > { %v992_v13 = vpop.f32.mrf.mxu2  ;;  %v3690_v14 = vpack.c.bf16 %v1081_v7, %v1077_v34 }
 0x1e3   : > { %v993_v39 = vadd.f32 %v992_v13, %v3502_v41  ;;  %v1021_v42 = vpop.f32.mrf.mxu3  ;;  %1514 = vmatmul.bf16.gmra.mxu1 %v3687_v10 }
 0x1e4   : > { %v1022_v44 = vadd.f32 %v1021_v42, %v3505_v55  ;;  %1601 = vmatmul.bf16.gmra.mxu0 %v3690_v14  ;;  %v966_v25 = vpop.f32.mrf.mxu1 }
 0x1e5   : > { %v1079_v18 = vmax.f32 %v993_v39, 0.0  ;;  %v1053_v27 = vpop.f32.mrf.mxu0  ;;  %v967_v5 = vadd.f32 %v966_v25, %v3481_v32  ;;  %v2729_v39 = vld [vmem:[%s3848_s9 + $0x68] sm:$0xff] }
 0x1e6   : > { %v1080_v29 = vmax.f32 %v1022_v44, 0.0  ;;  %v1054_v33 = vadd.f32 %v1053_v27, %v3486_v36  ;;  %1915 = vmatpush.bf16.msrb.mxu2 %v2729_v39 }
 0x1e7   : > { %v1099_v30 = vpack.c.bf16 %v1079_v18, %v1075_v23  ;;  %v1082_v46 = vmax.f32 %v967_v5, 0.0 }
 0x1e8   : > { %v1100_v49 = vpack.c.bf16 %v1080_v29, %v1076_v21  ;;  %v1085_v47 = vmax.f32 %v1054_v33, 0.0  ;;  %v2728_v29 = vld [vmem:[%s3848_s9 + $0x60] sm:$0xff] }
 0x1e9   : > { %1543 = vmatmul.bf16.gmra.mxu2 %v1099_v30 }
 0x1ea   : > { %1572 = vmatmul.bf16.gmra.mxu3 %v1100_v49  ;;  %v995_v6 = vpop.f32.mrf.mxu2  ;;  %1916 = vmatpush.bf16.msrb.mxu2 %v2728_v29 }
 0x1eb   : > { %v1024_v31 = vpop.f32.mrf.mxu3  ;;  %v996_v19 = vadd.f32 %v995_v6, %v3502_v41 }
 0x1ec   : > { %v968_v35 = vpop.f32.mrf.mxu1  ;;  %v1025_v50 = vadd.f32 %v1024_v31, %v3505_v55 }
 0x1ed   : > { %v969_v37 = vadd.f32 %v968_v35, %v3481_v32  ;;  %v1055_v38 = vpop.f32.mrf.mxu0  ;;  %v1083_v56 = vmax.f32 %v996_v19, 0.0 }
 0x1ee   : > { %v1056_v43 = vadd.f32 %v1055_v38, %v3486_v36  ;;  %v1084_v57 = vmax.f32 %v1025_v50, 0.0 }
 0x1ef   : > { %v1086_v45 = vmax.f32 %v969_v37, 0.0 }
 0x1f0   : > { %v1089_v26 = vmax.f32 %v1056_v43, 0.0  ;;  %v2727_v43 = vld [vmem:[%s3848_s9 + $0x58] sm:$0xff] }
 0x1f1   : > { %v1102_v48 = vpack.c.bf16 %v1086_v45, %v1082_v46  ;;  %1917 = vmatpush.bf16.msrb.mxu2 %v2727_v43 }
 0x1f2   : > { %v997_v51 = vpop.f32.mrf.mxu2  ;;  %v1105_v52 = vpack.c.bf16 %v1089_v26, %v1085_v47 }
 0x1f3   : > { %v998_v54 = vadd.f32 %v997_v51, %v3502_v41  ;;  %v1026_v53 = vpop.f32.mrf.mxu3  ;;  %1519 = vmatmul.bf16.gmra.mxu1 %v1102_v48  ;;  %v2723_v41 = vld [vmem:[%s3848_s9 + $0x38] sm:$0xff] }
 0x1f4   : > { %v1027_v32 = vadd.f32 %v1026_v53, %v3505_v55  ;;  %1606 = vmatmul.bf16.gmra.mxu0 %v1105_v52  ;;  %1884 = vmatpush.bf16.msrb.mxu1 %v2723_v41  ;;  %v2722_v55 = vld [vmem:[%s3848_s9 + $0x30] sm:$0xff] }
 0x1f5   : > { %v1087_v36 = vmax.f32 %v998_v54, 0.0  ;;  %v2726_v53 = vld [vmem:[%s3848_s9 + $0x50] sm:$0xff] }
 0x1f6   : > { %v1088_v58 = vmax.f32 %v1027_v32, 0.0  ;;  %1918 = vmatpush.bf16.msrb.mxu2 %v2726_v53 }
 0x1f7   : > { %v1103_v60 = vpack.c.bf16 %v1087_v36, %v1083_v56 }
 0x1f8   : > { %v1104_v61 = vpack.c.bf16 %v1088_v58, %v1084_v57  ;;  %1885 = vmatpush.bf16.msrb.mxu1 %v2722_v55 }
 0x1f9   : > { %1548 = vmatmul.bf16.gmra.mxu2 %v1103_v60 }
 0x1fa   : > { %1577 = vmatmul.bf16.gmra.mxu3 %v1104_v61 }
 0x203   : > { %1620 = vmatmul.bf16.vlgmr.msra.gmra.mxu1 %v3527_v40  ;;  %v2721_v40 = vld [vmem:[%s3848_s9 + $0x28] sm:$0xff] }
 0x204   : > { %1707 = vmatmul.bf16.vlgmr.msrb.gmra.mxu0 %v3536_v2  ;;  %1886 = vmatpush.bf16.msrb.mxu1 %v2721_v40  ;;  %v2720_v2 = vld [vmem:[%s3848_s9 + $0x20] sm:$0xff]  ;;  %v2725_v40 = vld [vmem:[%s3848_s9 + $0x48] sm:$0xff] }
 0x205   : > { %1919 = vmatpush.bf16.msrb.mxu2 %v2725_v40 }
 0x208   : > { %1887 = vmatpush.bf16.msrb.mxu1 %v2720_v2 }
 0x209   : > { %1649 = vmatmul.bf16.vlgmr.msra.gmra.mxu2 %v3548_v24  ;;  %v2719_v24 = vld [vmem:[%s3848_s9 + $0x18] sm:$0xff] }
 0x20a   : > { %1678 = vmatmul.bf16.vlgmr.msra.gmra.mxu3 %v3556_v3  ;;  %v2718_v3 = vld [vmem:[%s3848_s9 + $0x10] sm:$0xff]  ;;  %1920 = vmatpush.bf16.msrb.mxu2 %v2724_v4 }
 0x20c   : > { %1888 = vmatpush.bf16.msrb.mxu1 %v2719_v24 }
 0x210   : > { %1889 = vmatpush.bf16.msrb.mxu1 %v2718_v3 }
 0x213   : > { %1625 = vmatmul.bf16.gmra.mxu1 %v3595_v63  ;;  %v2717_v63 = vld [vmem:[%s3848_s9 + $0x8] sm:$0xff] }
 0x214   : > { %1712 = vmatmul.bf16.gmra.mxu0 %v3604_v59  ;;  %1890 = vmatpush.bf16.msrb.mxu1 %v2717_v63  ;;  %v2716_v59 = vld [vmem:[%s3848_s9] sm:$0xff] }
 0x218   : > { %1891 = vmatpush.bf16.msrb.mxu1 %v2716_v59 }
 0x219   : > { %1654 = vmatmul.bf16.gmra.mxu2 %v3622_v22 }
 0x21a   : > { %1683 = vmatmul.bf16.gmra.mxu3 %v3630_v28 }
 0x223   : > { %1630 = vmatmul.bf16.gmra.mxu1 %v3687_v10 }
 0x224   : > { %1717 = vmatmul.bf16.gmra.mxu0 %v3690_v14 }
 0x229   : > { %1659 = vmatmul.bf16.gmra.mxu2 %v1099_v30 }
 0x22a   : > { %1688 = vmatmul.bf16.gmra.mxu3 %v1100_v49 }
 0x233   : > { %1635 = vmatmul.bf16.gmra.mxu1 %v1102_v48 }
 0x234   : > { %1722 = vmatmul.bf16.gmra.mxu0 %v1105_v52 }
 0x239   : > { %1664 = vmatmul.bf16.gmra.mxu2 %v1103_v60 }
 0x23a   : > { %1693 = vmatmul.bf16.gmra.mxu3 %v1104_v61 }
 0x240   : > { %v1505_v22 = vpop.f32.mrf.mxu1 }
 0x241   : > { %v1592_v28 = vpop.f32.mrf.mxu0  ;;  %v1506_v7 = vadd.f32 %v1505_v22, %v3753_v16 }
 0x248   : > { %v1507_v11 = vpop.f32.mrf.mxu1 }
 0x249   : > { %v1594_v1 = vpop.f32.mrf.mxu0  ;;  %v1508_v13 = vadd.f32 %v1507_v11, %v3753_v16 }
 0x24c   : > { %v1534_v34 = vpop.f32.mrf.mxu2 }
 0x24d   : > { %v1563_v8 = vpop.f32.mrf.mxu3  ;;  %v1535_v9 = vadd.f32 %v1534_v34, %v1506_v7 }
 0x24f   : > { %v1564_v14 = vadd.f32 %v1563_v8, %v1535_v9 }
 0x250   : > { %v1510_v10 = vpop.f32.mrf.mxu1 }
 0x251   : > { %v1597_v12 = vpop.f32.mrf.mxu0  ;;  %v1593_v44 = vadd.f32 %v1592_v28, %v1564_v14  ;;  %v1511_v49 = vadd.f32 %v1510_v10, %v3753_v16 }
 0x253   : > { %v1728_v27 = vmax.f32 %v1593_v44, 0.0 }
 0x254   : > { %v1536_v42 = vpop.f32.mrf.mxu2 }
 0x255   : > { %v1537_v15 = vadd.f32 %v1536_v42, %v1508_v13  ;;  %v1565_v17 = vpop.f32.mrf.mxu3 }
 0x257   : > { %v1566_v25 = vadd.f32 %v1565_v17, %v1537_v15 }
 0x258   : > { %v1512_v20 = vpop.f32.mrf.mxu1 }
 0x259   : > { %v1595_v23 = vadd.f32 %v1594_v1, %v1566_v25  ;;  %v1599_v18 = vpop.f32.mrf.mxu0  ;;  %v1513_v37 = vadd.f32 %v1512_v20, %v3753_v16 }
 0x25b   : > { %v1730_v21 = vmax.f32 %v1595_v23, 0.0  ;;  %v3785_v23 = vperm.slane %v3750_v0, 1 }
 0x25c   : > { %v1539_v30 = vpop.f32.mrf.mxu2 }
 0x25d   : > { %v1744_v6 = vpack.c.bf16 %v1730_v21, %v1728_v27  ;;  %v1568_v5 = vpop.f32.mrf.mxu3  ;;  %v1540_v31 = vadd.f32 %v1539_v30, %v1511_v49 }
 0x25f   : > { %1892 = vmatmul.bf16.vlgmr.msrb.gmra.mxu1 %v1744_v6  ;;  %v1569_v38 = vadd.f32 %v1568_v5, %v1540_v31 }
 0x260   : > { %v1515_v33 = vpop.f32.mrf.mxu1 }
 0x261   : > { %v1602_v35 = vpop.f32.mrf.mxu0  ;;  %v1598_v26 = vadd.f32 %v1597_v12, %v1569_v38  ;;  %v1516_v56 = vadd.f32 %v1515_v33, %v3753_v16 }
 0x263   : > { %v1732_v52 = vmax.f32 %v1598_v26, 0.0 }
 0x264   : > { %v1541_v46 = vpop.f32.mrf.mxu2 }
 0x265   : > { %v1542_v45 = vadd.f32 %v1541_v46, %v1513_v37  ;;  %v1570_v47 = vpop.f32.mrf.mxu3 }
 0x267   : > { %v1571_v19 = vadd.f32 %v1570_v47, %v1542_v45 }
 0x268   : > { %v1517_v48 = vpop.f32.mrf.mxu1 }
 0x269   : > { %v1600_v50 = vadd.f32 %v1599_v18, %v1571_v19  ;;  %v1604_v51 = vpop.f32.mrf.mxu0  ;;  %v1518_v41 = vadd.f32 %v1517_v48, %v3753_v16 }
 0x26b   : > { %v1734_v54 = vmax.f32 %v1600_v50, 0.0 }
 0x26c   : > { %v1544_v32 = vpop.f32.mrf.mxu2 }
 0x26d   : > { %v1573_v36 = vpop.f32.mrf.mxu3  ;;  %v1746_v57 = vpack.c.bf16 %v1734_v54, %v1732_v52  ;;  %v1545_v58 = vadd.f32 %v1544_v32, %v1516_v56 }
 0x26f   : > { %1897 = vmatmul.bf16.gmra.mxu1 %v1746_v57  ;;  %v1574_v55 = vadd.f32 %v1573_v36, %v1545_v58 }
 0x270   : > { %v1520_v60 = vpop.f32.mrf.mxu1 }
 0x271   : > { %v1607_v61 = vpop.f32.mrf.mxu0  ;;  %v1603_v63 = vadd.f32 %v1602_v35, %v1574_v55  ;;  %v1521_v7 = vadd.f32 %v1520_v60, %v3753_v16 }
 0x273   : > { %v1736_v11 = vmax.f32 %v1603_v63, 0.0 }
 0x274   : > { %v1546_v2 = vpop.f32.mrf.mxu2 }
 0x275   : > { %v1547_v24 = vadd.f32 %v1546_v2, %v1518_v41  ;;  %v1575_v3 = vpop.f32.mrf.mxu3 }
 0x277   : > { %v1576_v59 = vadd.f32 %v1575_v3, %v1547_v24 }
 0x278   : > { %v1522_v22 = vpop.f32.mrf.mxu1 }
 0x279   : > { %v1605_v28 = vadd.f32 %v1604_v51, %v1576_v59  ;;  %v1609_v62 = vpop.f32.mrf.mxu0  ;;  %v1523_v14 = vadd.f32 %v1522_v22, %v3753_v16 }
 0x27b   : > { %v1738_v1 = vmax.f32 %v1605_v28, 0.0 }
 0x27c   : > { %v1549_v34 = vpop.f32.mrf.mxu2 }
 0x27d   : > { %v1578_v8 = vpop.f32.mrf.mxu3  ;;  %v1748_v9 = vpack.c.bf16 %v1738_v1, %v1736_v11  ;;  %v1550_v10 = vadd.f32 %v1549_v34, %v1521_v7 }
 0x27f   : > { %1902 = vmatmul.bf16.gmra.mxu1 %v1748_v9  ;;  %v1579_v39 = vadd.f32 %v1578_v8, %v1550_v10 }
 0x280   : > { %v1621_v12 = vpop.f32.mrf.mxu1 }
 0x281   : > { %v1708_v13 = vpop.f32.mrf.mxu0  ;;  %v1608_v44 = vadd.f32 %v1607_v61, %v1579_v39  ;;  %v1622_v49 = vadd.f32 %v1621_v12, %v3785_v23 }
 0x283   : > { %v1740_v27 = vmax.f32 %v1608_v44, 0.0 }
 0x284   : > { %v1551_v42 = vpop.f32.mrf.mxu2 }
 0x285   : > { %v1552_v15 = vadd.f32 %v1551_v42, %v1523_v14  ;;  %v1580_v17 = vpop.f32.mrf.mxu3 }
 0x287   : > { %v1581_v25 = vadd.f32 %v1580_v17, %v1552_v15 }
 0x288   : > { %v1623_v20 = vpop.f32.mrf.mxu1 }
 0x289   : > { %v1610_v18 = vadd.f32 %v1609_v62, %v1581_v25  ;;  %v1710_v29 = vpop.f32.mrf.mxu0  ;;  %v1624_v33 = vadd.f32 %v1623_v20, %v3785_v23 }
 0x28b   : > { %v1742_v21 = vmax.f32 %v1610_v18, 0.0 }
 0x28c   : > { %v1650_v30 = vpop.f32.mrf.mxu2 }
 0x28d   : > { %v1679_v6 = vpop.f32.mrf.mxu3  ;;  %v1750_v5 = vpack.c.bf16 %v1742_v21, %v1740_v27  ;;  %v1651_v16 = vadd.f32 %v1650_v30, %v1622_v49 }
 0x28f   : > { %1907 = vmatmul.bf16.gmra.mxu1 %v1750_v5  ;;  %v1680_v35 = vadd.f32 %v1679_v6, %v1651_v16 }
 0x290   : > { %v1626_v31 = vpop.f32.mrf.mxu1 }
 0x291   : > { %v1713_v0 = vpop.f32.mrf.mxu0  ;;  %v1709_v46 = vadd.f32 %v1708_v13, %v1680_v35  ;;  %v1627_v51 = vadd.f32 %v1626_v31, %v3785_v23 }
 0x293   : > { %v1729_v19 = vmax.f32 %v1709_v46, 0.0  ;;  %v2736_v46 = vld [vmem:[%s3850_s11 + $0x20] sm:$0xff] }
 0x294   : > { %v1652_v37 = vpop.f32.mrf.mxu2 }
 0x295   : > { %v1653_v38 = vadd.f32 %v1652_v37, %v1624_v33  ;;  %v1681_v43 = vpop.f32.mrf.mxu3 }
 0x297   : > { %v1682_v45 = vadd.f32 %v1681_v43, %v1653_v38  ;;  %v2739_v43 = vld [vmem:[%s3850_s11 + $0x38] sm:$0xff] }
 0x298   : > { %v1628_v47 = vpop.f32.mrf.mxu1  ;;  %2022 = vmatpush.bf16.msrb.mxu3 %v2739_v43 }
 0x299   : > { %v1711_v26 = vadd.f32 %v1710_v29, %v1682_v45  ;;  %v1715_v32 = vpop.f32.mrf.mxu0  ;;  %v1629_v36 = vadd.f32 %v1628_v47, %v3785_v23  ;;  %v2735_v45 = vld [vmem:[%s3850_s11 + $0x18] sm:$0xff]  ;;  %v2734_v47 = vld [vmem:[%s3850_s11 + $0x10] sm:$0xff] }
 0x29b   : > { %v1731_v48 = vmax.f32 %v1711_v26, 0.0  ;;  %v2733_v26 = vld [vmem:[%s3850_s11 + $0x8] sm:$0xff] }
 0x29c   : > { %v1655_v50 = vpop.f32.mrf.mxu2 }
 0x29d   : > { %v1745_v52 = vpack.c.bf16 %v1731_v48, %v1729_v19  ;;  %v1684_v54 = vpop.f32.mrf.mxu3  ;;  %v1656_v53 = vadd.f32 %v1655_v50, %v1627_v51  ;;  %v2732_v19 = vld [vmem:[%s3850_s11] sm:$0xff] }
 0x29f   : > { %1921 = vmatmul.bf16.vlgmr.msrb.gmra.mxu2 %v1745_v52  ;;  %v1685_v57 = vadd.f32 %v1684_v54, %v1656_v53  ;;  %v2792_v52 = vld [vmem:[%s3849_s10] ss:$0 sm:$0xff] }
 0x2a0   : > { %v1631_v56 = vpop.f32.mrf.mxu1 }
 0x2a1   : > { %v1714_v41 = vadd.f32 %v1713_v0, %v1685_v57  ;;  %v1718_v2 = vpop.f32.mrf.mxu0  ;;  %v1632_v22 = vadd.f32 %v1631_v56, %v3785_v23  ;;  %v2737_v0 = vld [vmem:[%s3850_s11 + $0x28] sm:$0xff] }
 0x2a3   : > { %v1733_v24 = vmax.f32 %v1714_v41, 0.0 }
 0x2a4   : > { %v1657_v58 = vpop.f32.mrf.mxu2 }
 0x2a5   : > { %v1658_v60 = vadd.f32 %v1657_v58, %v1629_v36  ;;  %v1686_v61 = vpop.f32.mrf.mxu3 }
 0x2a7   : > { %v1687_v55 = vadd.f32 %v1686_v61, %v1658_v60 }
 0x2a8   : > { %v1633_v63 = vpop.f32.mrf.mxu1 }
 0x2a9   : > { %v1716_v40 = vadd.f32 %v1715_v32, %v1687_v55  ;;  %v1634_v1 = vadd.f32 %v1633_v63, %v3785_v23  ;;  %v1720_v34 = vpop.f32.mrf.mxu0 }
 0x2ab   : > { %v1735_v3 = vmax.f32 %v1716_v40, 0.0 }
 0x2ac   : > { %v1660_v59 = vpop.f32.mrf.mxu2 }
 0x2ad   : > { %v1689_v28 = vpop.f32.mrf.mxu3  ;;  %v1747_v62 = vpack.c.bf16 %v1735_v3, %v1733_v24  ;;  %v1661_v11 = vadd.f32 %v1660_v59, %v1632_v22 }
 0x2af   : > { %1926 = vmatmul.bf16.gmra.mxu2 %v1747_v62  ;;  %v1690_v4 = vadd.f32 %v1689_v28, %v1661_v11 }
 0x2b0   : > { %v1636_v10 = vpop.f32.mrf.mxu1 }
 0x2b1   : > { %v1719_v12 = vadd.f32 %v1718_v2, %v1690_v4  ;;  %v1637_v17 = vadd.f32 %v1636_v10, %v3785_v23  ;;  %v1723_v20 = vpop.f32.mrf.mxu0 }
 0x2b3   : > { %v1737_v39 = vmax.f32 %v1719_v12, 0.0 }
 0x2b4   : > { %v1662_v7 = vpop.f32.mrf.mxu2 }
 0x2b5   : > { %v1663_v8 = vadd.f32 %v1662_v7, %v1634_v1  ;;  %v1691_v9 = vpop.f32.mrf.mxu3 }
 0x2b7   : > { %v1692_v13 = vadd.f32 %v1691_v9, %v1663_v8 }
 0x2b8   : > { %v1638_v27 = vpop.f32.mrf.mxu1 }
 0x2b9   : > { %v1721_v14 = vadd.f32 %v1720_v34, %v1692_v13  ;;  %v1639_v21 = vadd.f32 %v1638_v27, %v3785_v23  ;;  %v1725_v31 = vpop.f32.mrf.mxu0  ;;  %v2738_v23 = vld [vmem:[%s3850_s11 + $0x30] sm:$0xff] }
 0x2ba   : > { %2023 = vmatpush.bf16.msrb.mxu3 %v2738_v23 }
 0x2bb   : > { %v1739_v42 = vmax.f32 %v1721_v14, 0.0 }
 0x2bc   : > { %v1665_v15 = vpop.f32.mrf.mxu2 }
 0x2bd   : > { %v1694_v44 = vpop.f32.mrf.mxu3  ;;  %v1749_v25 = vpack.c.bf16 %v1739_v42, %v1737_v39  ;;  %v1666_v18 = vadd.f32 %v1665_v15, %v1637_v17 }
 0x2be   : > { %2024 = vmatpush.bf16.msrb.mxu3 %v2737_v0 }
 0x2bf   : > { %1931 = vmatmul.bf16.gmra.mxu2 %v1749_v25  ;;  %v1695_v29 = vadd.f32 %v1694_v44, %v1666_v18 }
 0x2c1   : > { %v1724_v5 = vadd.f32 %v1723_v20, %v1695_v29 }
 0x2c2   : > { %2025 = vmatpush.bf16.msrb.mxu3 %v2736_v46 }
 0x2c3   : > { %v1741_v35 = vmax.f32 %v1724_v5, 0.0 }
 0x2c4   : > { %v1667_v30 = vpop.f32.mrf.mxu2 }
 0x2c5   : > { %v1668_v49 = vadd.f32 %v1667_v30, %v1639_v21  ;;  %v1696_v6 = vpop.f32.mrf.mxu3  ;;  %v2793_v30 = vld [vmem:[%s3851_s12] ss:$0 sm:$0xff] }
 0x2c6   : > { %2026 = vmatpush.bf16.msrb.mxu3 %v2735_v45 }
 0x2c7   : > { %v1697_v16 = vadd.f32 %v1696_v6, %v1668_v49 }
 0x2c9   : > { %v1726_v33 = vadd.f32 %v1725_v31, %v1697_v16 }
 0x2ca   : > { %2027 = vmatpush.bf16.msrb.mxu3 %v2734_v47 }
 0x2cb   : > { %v1743_v37 = vmax.f32 %v1726_v33, 0.0 }
 0x2cd   : > { %v1751_v38 = vpack.c.bf16 %v1743_v37, %v1741_v35 }
 0x2ce   : > { %2028 = vmatpush.bf16.msrb.mxu3 %v2733_v26 }
 0x2cf   : > { %1936 = vmatmul.bf16.gmra.mxu2 %v1751_v38 }
 0x2d2   : > { %2029 = vmatpush.bf16.msrb.mxu3 %v2732_v19 }
 0x2dc   : > { %v1893_v48 = vpop.f32.mrf.mxu1 }
 0x2dd   : > { %v1894_v53 = vadd.f32 %v2792_v52, %v1893_v48 }
 0x2e4   : > { %v1895_v50 = vpop.f32.mrf.mxu1 }
 0x2e5   : > { %v1896_v32 = vadd.f32 %v2792_v52, %v1895_v50 }
 0x2ec   : > { %v1898_v54 = vpop.f32.mrf.mxu1 }
 0x2ed   : > { %v1899_v40 = vadd.f32 %v2792_v52, %v1898_v54 }
 0x2f4   : > { %v1900_v61 = vpop.f32.mrf.mxu1 }
 0x2f5   : > { %v1901_v24 = vadd.f32 %v2792_v52, %v1900_v61 }
 0x2fc   : > { %v1903_v2 = vpop.f32.mrf.mxu1 }
 0x2fd   : > { %v1904_v4 = vadd.f32 %v2792_v52, %v1903_v2 }
 0x304   : > { %v1905_v11 = vpop.f32.mrf.mxu1 }
 0x305   : > { %v1906_v34 = vadd.f32 %v2792_v52, %v1905_v11 }
 0x30c   : > { %v1908_v10 = vpop.f32.mrf.mxu1 }
 0x30d   : > { %v1909_v15 = vadd.f32 %v2792_v52, %v1908_v10 }
 0x314   : > { %v1910_v42 = vpop.f32.mrf.mxu1 }
 0x315   : > { %v1911_v17 = vadd.f32 %v2792_v52, %v1910_v42 }
 0x322   : > { %v1922_v51 = vpop.f32.mrf.mxu2 }
 0x323   : > { %v1923_v56 = vadd.f32 %v1922_v51, %v1894_v53 }
 0x325   : > { %v1942_v58 = vmax.f32 %v1923_v56, 0.0 }
 0x32a   : > { %v1924_v36 = vpop.f32.mrf.mxu2 }
 0x32b   : > { %v1925_v57 = vadd.f32 %v1924_v36, %v1896_v32 }
 0x32d   : > { %v1943_v60 = vmax.f32 %v1925_v57, 0.0 }
 0x32f   : > { %v1950_v41 = vpack.c.bf16 %v1943_v60, %v1942_v58 }
 0x331   : > { %2030 = vmatmul.bf16.vlgmr.msrb.gmra.mxu3 %v1950_v41 }
 0x332   : > { %v1927_v55 = vpop.f32.mrf.mxu2 }
 0x333   : > { %v1928_v3 = vadd.f32 %v1927_v55, %v1899_v40 }
 0x335   : > { %v1944_v22 = vmax.f32 %v1928_v3, 0.0 }
 0x33a   : > { %v1929_v63 = vpop.f32.mrf.mxu2 }
 0x33b   : > { %v1930_v59 = vadd.f32 %v1929_v63, %v1901_v24 }
 0x33d   : > { %v1945_v28 = vmax.f32 %v1930_v59, 0.0 }
 0x33f   : > { %v1951_v62 = vpack.c.bf16 %v1945_v28, %v1944_v22 }
 0x341   : > { %2035 = vmatmul.bf16.gmra.mxu3 %v1951_v62 }
 0x342   : > { %v1932_v1 = vpop.f32.mrf.mxu2 }
 0x343   : > { %v1933_v7 = vadd.f32 %v1932_v1, %v1904_v4 }
 0x345   : > { %v1946_v12 = vmax.f32 %v1933_v7, 0.0 }
 0x34a   : > { %v1934_v8 = vpop.f32.mrf.mxu2 }
 0x34b   : > { %v1935_v9 = vadd.f32 %v1934_v8, %v1906_v34 }
 0x34d   : > { %v1947_v13 = vmax.f32 %v1935_v9, 0.0 }
 0x34f   : > { %v1952_v14 = vpack.c.bf16 %v1947_v13, %v1946_v12 }
 0x351   : > { %2040 = vmatmul.bf16.gmra.mxu3 %v1952_v14 }
 0x352   : > { %v1937_v39 = vpop.f32.mrf.mxu2 }
 0x353   : > { %v1938_v44 = vadd.f32 %v1937_v39, %v1909_v15 }
 0x355   : > { %v1948_v18 = vmax.f32 %v1938_v44, 0.0 }
 0x35a   : > { %v1939_v25 = vpop.f32.mrf.mxu2 }
 0x35b   : > { %v1940_v20 = vadd.f32 %v1939_v25, %v1911_v17 }
 0x35d   : > { %v1949_v27 = vmax.f32 %v1940_v20, 0.0 }
 0x35f   : > { %v1953_v21 = vpack.c.bf16 %v1949_v27, %v1948_v18 }
 0x361   : > { %2045 = vmatmul.bf16.gmra.mxu3 %v1953_v21 }
 0x3b4   : > { %v2031_v29 = vpop.f32.mrf.mxu3 }
 0x3b5   : > { %v2032_v6 = vadd.f32 %v2793_v30, %v2031_v29 }
 0x3bc   : > { %v2033_v49 = vpop.f32.mrf.mxu3 }
 0x3bd   : > { %v2034_v5 = vadd.f32 %v2793_v30, %v2033_v49 }
 0x3bf   : > { %v2743_v16 = vpack.c.bf16 %v2034_v5, %v2032_v6 }
 0x3c1   : > { %2744 = vst [vmem:[%s495_s21] sm:$0xff] %v2743_v16  }
 0x3c4   : > { %v2036_v31 = vpop.f32.mrf.mxu3 }
 0x3c5   : > { %v2037_v35 = vadd.f32 %v2793_v30, %v2036_v31 }
 0x3cc   : > { %v2038_v33 = vpop.f32.mrf.mxu3 }
 0x3cd   : > { %v2039_v37 = vadd.f32 %v2793_v30, %v2038_v33 }
 0x3cf   : > { %v2748_v38 = vpack.c.bf16 %v2039_v37, %v2037_v35 }
 0x3d1   : > { %2760 = vst [vmem:[%s495_s21 + $0x8] sm:$0xff] %v2748_v38  }
 0x3d4   : > { %v2041_v43 = vpop.f32.mrf.mxu3 }
 0x3d5   : > { %v2042_v0 = vadd.f32 %v2793_v30, %v2041_v43 }
 0x3dc   : > { %v2043_v23 = vpop.f32.mrf.mxu3 }
 0x3dd   : > { %v2044_v46 = vadd.f32 %v2793_v30, %v2043_v23 }
 0x3df   : > { %v2753_v45 = vpack.c.bf16 %v2044_v46, %v2042_v0 }
 0x3e1   : > { %2761 = vst [vmem:[%s495_s21 + $0x10] sm:$0xff] %v2753_v45  }
 0x3e4   : > { %v2046_v47 = vpop.f32.mrf.mxu3 }
 0x3e5   : > { %v2047_v19 = vadd.f32 %v2793_v30, %v2046_v47 }
 0x3ec   : > { %v2048_v26 = vpop.f32.mrf.mxu3 }
 0x3ed   : > { %v2049_v48 = vadd.f32 %v2793_v30, %v2048_v26 }
 0x3ef   : > { %v2758_v50 = vpack.c.bf16 %v2049_v48, %v2047_v19 }
 0x3f1   : > { %2762 = vst [vmem:[%s495_s21 + $0x18] sm:$0xff] %v2758_v50  }
 0x3f2 PF: > { %s23_s27 = sadd.s32 1, %s2834_s27   ;;  %s3859_s25 = smov %s2830_s26 }
 0x3f3   : > { %p20_p5 = scmp.ge.s32.totalorder %s23_s27, 4   ;;  %s3860_s26 = smov %s3862_s28 }
 0x3f5   :  { %22 = sbr.rel (!%p20_p5) target bundleno = 2 (0x2), region = 105 }

</bundles_post_ra>
